<compile_context>
chip_gen: v6e
topology: v6e:2x2x1
jax: 0.10.0
libtpu: 0.0.40
codegen_flags: <defaults>
</compile_context>

<pallas_src>
import functools

import jax
import jax.numpy as jnp
from jax.experimental import pallas as pl
from jax.experimental.pallas import tpu as pltpu


def _round_up(x, m):
    return (x + m - 1) // m * m


def _mlp_kernel(x_ref, w1_ref, b1_ref, w2_ref, b2_ref, w3_ref, b3_ref, o_ref,
                *, apply_sigmoid: bool):
    # x arrives f32; cast to bf16 in-kernel (rides in spare VPU slots).
    x = x_ref[...].astype(jnp.bfloat16)

    # Layer 0: Linear + ReLU. bf16 MXU inputs, f32 accumulation.
    h = jnp.dot(x, w1_ref[...], preferred_element_type=jnp.float32)
    h = jnp.maximum(h + b1_ref[...], 0.0)
    # TODO(synk): dropout path (dropout != -1) not implemented — the reference
    #             module's default dropout=-1 makes it a no-op.

    # Layer 1: Linear + ReLU.
    h = jnp.dot(h.astype(jnp.bfloat16), w2_ref[...],
                preferred_element_type=jnp.float32)
    h = jnp.maximum(h + b2_ref[...], 0.0)

    # Layer 2 (output): Linear, sigmoid only if discrim=True.
    o = jnp.dot(h.astype(jnp.bfloat16), w3_ref[...],
                preferred_element_type=jnp.float32)
    o = o + b3_ref[...]
    if apply_sigmoid:
        o = jax.nn.sigmoid(o)
    o_ref[...] = o.astype(o_ref.dtype)


def prepare_mlp_params(params):
    """One-time layout prep (call once, reuse across forwards).

    Input: f32 params {w1,b1,w2,b2,w3,b3} with w stored [in, out].
    Output: bf16 weights, f32 [1, out] biases, final-layer N padded to 128.
    """
    w1, b1 = params["w1"], params["b1"]
    w2, b2 = params["w2"], params["b2"]
    w3, b3 = params["w3"], params["b3"]
    out_dim = w3.shape[1]
    n_pad = _round_up(out_dim, 128)
    bf16, f32 = jnp.bfloat16, jnp.float32
    w3_p = jnp.zeros((w3.shape[0], n_pad), bf16).at[:, :out_dim].set(w3.astype(bf16))
    b3_p = jnp.zeros((1, n_pad), f32).at[:, :out_dim].set(
        jnp.reshape(b3, (1, -1)).astype(f32))
    return {
        "w1": w1.astype(bf16), "b1": jnp.reshape(b1, (1, -1)).astype(f32),
        "w2": w2.astype(bf16), "b2": jnp.reshape(b2, (1, -1)).astype(f32),
        "w3": w3_p, "b3": b3_p,
        "out_dim": out_dim, "n_pad": n_pad,
    }


def _choose_tb(B, block_batch):
    """Balanced batch tile: <= block_batch, multiple of 16, MXU-friendly."""
    nt = max(1, pl.cdiv(B, block_batch))
    if nt < 2 and B > 16:
        nt = 2  # >= 2 grid steps so both of v7x's TensorCores get work
    tb = _round_up(pl.cdiv(B, nt), 16)
    best_total = pl.cdiv(B, tb) * tb
    # Snap up to a full MXU M-tile (256 on v6e/v7x, 128 on v5e) only when it
    # adds no padding rows and keeps >= min(nt, 2) grid steps.
    for m in (256, 128):
        cand = _round_up(tb, m)
        total = pl.cdiv(B, cand) * cand
        if total <= best_total and pl.cdiv(B, cand) >= min(nt, 2):
            return cand
    return tb


def mlp_forward(x, prepared, *, discrim=False, block_batch=512):
    """x: [B, input_dim] float32. prepared: output of prepare_mlp_params."""
    w1, b1 = prepared["w1"], prepared["b1"]
    w2, b2 = prepared["w2"], prepared["b2"]
    w3, b3 = prepared["w3"], prepared["b3"]
    out_dim, n_pad = prepared["out_dim"], prepared["n_pad"]

    B, in_dim = x.shape
    h1, h2 = w1.shape[1], w2.shape[1]
    assert w1.shape[0] == in_dim

    tb = _choose_tb(B, block_batch)
    b_pad = pl.cdiv(B, tb) * tb
    grid = b_pad // tb

    # Pad the batch only when needed; x stays f32, K is not padded.
    x_in = x if b_pad == B else jnp.pad(x, ((0, b_pad - B), (0, 0)))

    # Rough VMEM budget: resident weights + double-buffered x/out tiles + f32
    # intermediates, 2x headroom; clamp to [32, 64] MiB (v7x physical = 64).
    est = (2 * (in_dim * h1 + h1 * h2 + h2 * n_pad)    # bf16 weights
           + 4 * (h1 + h2 + n_pad)                     # f32 biases
           + 2 * tb * in_dim * 4 + 2 * tb * n_pad * 4  # pipelined x / out tiles
           + 2 * tb * (h1 + h2) * 4)                   # f32 intermediates
    vmem_limit = int(min(64 << 20, max(32 << 20, 2 * est)))

    kernel = functools.partial(_mlp_kernel, apply_sigmoid=discrim)
    out_shape = jax.ShapeDtypeStruct((b_pad, n_pad), x.dtype)
    x_spec = pl.BlockSpec((tb, in_dim), lambda i: (i, 0))
    out_spec = pl.BlockSpec((tb, n_pad), lambda i: (i, 0))
    cparams = pltpu.CompilerParams(
        dimension_semantics=("parallel",),   # megacore split on v7x
        vmem_limit_bytes=vmem_limit,
    )

    def run(single_buffer_weights):
        if single_buffer_weights:
            # Constant block index -> one buffer is enough; halves weight VMEM.
            resident = lambda a: pl.BlockSpec(a.shape, lambda i: (0, 0),
                                              pipeline_mode=pl.Buffered(1))
        else:
            resident = lambda a: pl.BlockSpec(a.shape, lambda i: (0, 0))
        return pl.pallas_call(
            kernel,
            out_shape=out_shape,
            grid=(grid,),
            in_specs=[x_spec,
                      resident(w1), resident(b1),
                      resident(w2), resident(b2),
                      resident(w3), resident(b3)],
            out_specs=out_spec,
            compiler_params=cparams,
        )(x_in, w1, b1, w2, b2, w3, b3)

    try:
        out_p = run(True)
    except Exception:
        # Fallback if this JAX build rejects pipeline_mode on pallas_call specs.
        out_p = run(False)

    if b_pad == B and n_pad == out_dim:
        return out_p
    return out_p[:B, :out_dim]


def init_mlp_params(key, input_dim, output_dim, hidden_size=(1024, 512)):
    """Deterministic init matching torch.nn.Linear's U(-1/sqrt(fan_in), +)."""
    dims = [input_dim, *hidden_size, output_dim]
    params = {}
    for i in range(len(dims) - 1):
        fan_in, fan_out = dims[i], dims[i + 1]
        key, kw, kb = jax.random.split(key, 3)
        bound = 1.0 / jnp.sqrt(fan_in)
        # stored as [in, out] (transposed vs PyTorch's [out, in])
        params[f"w{i+1}"] = jax.random.uniform(
            kw, (fan_in, fan_out), jnp.float32, -bound, bound)
        params[f"b{i+1}"] = jax.random.uniform(
            kb, (1, fan_out), jnp.float32, -bound, bound)
    return params


def _reference(x, params, discrim):
    h = jnp.maximum(x @ params["w1"] + params["b1"], 0.0)
    h = jnp.maximum(h @ params["w2"] + params["b2"], 0.0)
    o = h @ params["w3"] + params["b3"]
    return jax.nn.sigmoid(o) if discrim else o


if __name__ == "__main__":
    key = jax.random.PRNGKey(0)
    k_param, k_x, k_x2 = jax.random.split(key, 3)

    B, input_dim, output_dim = 4, 16, 8
    hidden_size = (1024, 512)  # module defaults

    params = init_mlp_params(k_param, input_dim, output_dim, hidden_size)
    prepared = prepare_mlp_params(params)   # one-time bf16/padding prep

    x = jax.random.normal(k_x, (B, input_dim), jnp.float32)

    out = jax.block_until_ready(mlp_forward(x, prepared, discrim=False))
    out_d = jax.block_until_ready(mlp_forward(x, prepared, discrim=True))

    ref = _reference(x, params, False)
    ref_d = _reference(x, params, True)
    assert out.shape == (B, output_dim)
    assert out_d.shape == (B, output_dim)
    assert jnp.allclose(out, ref, atol=5e-2, rtol=5e-2)
    assert jnp.allclose(out_d, ref_d, atol=5e-2, rtol=5e-2)

    # Second case: non-multiple batch -> exercises balanced tiles, batch
    # padding, and a >=2-step ("parallel") grid.
    B2 = 40
    x2 = jax.random.normal(k_x2, (B2, input_dim), jnp.float32)
    out2 = jax.block_until_ready(mlp_forward(x2, prepared, discrim=False))
    ref2 = _reference(x2, params, False)
    assert out2.shape == (B2, output_dim)
    assert jnp.allclose(out2, ref2, atol=5e-2, rtol=5e-2)

    print("KERNEL_OK")
</pallas_src>

<mosaic_0001>
module attributes {stable_mosaic.version = 11 : i64} {
  func.func @_mlp_kernel(%arg0: i32, %arg1: memref<16x16xf32, #tpu.memory_space<vmem>>, %arg2: memref<16x1024xbf16, #tpu.memory_space<vmem>>, %arg3: memref<1x1024xf32, #tpu.memory_space<vmem>>, %arg4: memref<1024x512xbf16, #tpu.memory_space<vmem>>, %arg5: memref<1x512xf32, #tpu.memory_space<vmem>>, %arg6: memref<512x128xbf16, #tpu.memory_space<vmem>>, %arg7: memref<1x128xf32, #tpu.memory_space<vmem>>, %arg8: memref<16x128xf32, #tpu.memory_space<vmem>>) attributes {dimension_semantics = [#tpu.dimension_semantics<parallel>], iteration_bounds = array<i64: 1>, scalar_prefetch = 0 : i64, scratch_operands = 0 : i64, tpu.core_type = #tpu.core_type<tc>, window_params = [{transform_indices = @transform_0, window_bounds = array<i64: 16, 16>}, {pipeline_mode = #tpu.pipeline_mode<synchronous>, transform_indices = @transform_1, window_bounds = array<i64: 16, 1024>}, {pipeline_mode = #tpu.pipeline_mode<synchronous>, transform_indices = @transform_2, window_bounds = array<i64: 1, 1024>}, {pipeline_mode = #tpu.pipeline_mode<synchronous>, transform_indices = @transform_3, window_bounds = array<i64: 1024, 512>}, {pipeline_mode = #tpu.pipeline_mode<synchronous>, transform_indices = @transform_4, window_bounds = array<i64: 1, 512>}, {pipeline_mode = #tpu.pipeline_mode<synchronous>, transform_indices = @transform_5, window_bounds = array<i64: 512, 128>}, {pipeline_mode = #tpu.pipeline_mode<synchronous>, transform_indices = @transform_6, window_bounds = array<i64: 1, 128>}, {transform_indices = @transform_7, window_bounds = array<i64: 16, 128>}]} {
    %c0 = arith.constant 0 : index
    %c0_0 = arith.constant 0 : index
    %0 = vector.load %arg1[%c0, %c0_0] : memref<16x16xf32, #tpu.memory_space<vmem>>, vector<16x16xf32>
    %1 = arith.truncf %0 : vector<16x16xf32> to vector<16x16xbf16>
    %c0_1 = arith.constant 0 : index
    %c0_2 = arith.constant 0 : index
    %2 = vector.load %arg2[%c0_1, %c0_2] : memref<16x1024xbf16, #tpu.memory_space<vmem>>, vector<16x1024xbf16>
    %cst = arith.constant dense<0.000000e+00> : vector<16x1024xf32>
    %3 = tpu.matmul %1, %2, %cst {dimension_numbers = #tpu.dot_dimension_numbers<[1], [0], [0], [1], [0, 0, 1, 1], [], []>} : vector<16x16xbf16>, vector<16x1024xbf16>, vector<16x1024xf32> -> vector<16x1024xf32>
    %c0_3 = arith.constant 0 : index
    %c0_4 = arith.constant 0 : index
    %4 = vector.load %arg3[%c0_3, %c0_4] : memref<1x1024xf32, #tpu.memory_space<vmem>>, vector<1x1024xf32>
    %5 = vector.broadcast %4 : vector<1x1024xf32> to vector<16x1024xf32>
    %6 = arith.addf %3, %5 : vector<16x1024xf32>
    %cst_5 = arith.constant 0.000000e+00 : f32
    %7 = vector.broadcast %cst_5 : f32 to vector<16x1024xf32>
    %8 = arith.maximumf %6, %7 : vector<16x1024xf32>
    %9 = arith.truncf %8 : vector<16x1024xf32> to vector<16x1024xbf16>
    %c0_6 = arith.constant 0 : index
    %c0_7 = arith.constant 0 : index
    %10 = vector.load %arg4[%c0_6, %c0_7] : memref<1024x512xbf16, #tpu.memory_space<vmem>>, vector<1024x512xbf16>
    %cst_8 = arith.constant dense<0.000000e+00> : vector<16x512xf32>
    %11 = tpu.matmul %9, %10, %cst_8 {dimension_numbers = #tpu.dot_dimension_numbers<[1], [0], [0], [1], [0, 0, 1, 1], [], []>} : vector<16x1024xbf16>, vector<1024x512xbf16>, vector<16x512xf32> -> vector<16x512xf32>
    %c0_9 = arith.constant 0 : index
    %c0_10 = arith.constant 0 : index
    %12 = vector.load %arg5[%c0_9, %c0_10] : memref<1x512xf32, #tpu.memory_space<vmem>>, vector<1x512xf32>
    %13 = vector.broadcast %12 : vector<1x512xf32> to vector<16x512xf32>
    %14 = arith.addf %11, %13 : vector<16x512xf32>
    %cst_11 = arith.constant 0.000000e+00 : f32
    %15 = vector.broadcast %cst_11 : f32 to vector<16x512xf32>
    %16 = arith.maximumf %14, %15 : vector<16x512xf32>
    %17 = arith.truncf %16 : vector<16x512xf32> to vector<16x512xbf16>
    %c0_12 = arith.constant 0 : index
    %c0_13 = arith.constant 0 : index
    %18 = vector.load %arg6[%c0_12, %c0_13] : memref<512x128xbf16, #tpu.memory_space<vmem>>, vector<512x128xbf16>
    %cst_14 = arith.constant dense<0.000000e+00> : vector<16x128xf32>
    %19 = tpu.matmul %17, %18, %cst_14 {dimension_numbers = #tpu.dot_dimension_numbers<[1], [0], [0], [1], [0, 0, 1, 1], [], []>} : vector<16x512xbf16>, vector<512x128xbf16>, vector<16x128xf32> -> vector<16x128xf32>
    %c0_15 = arith.constant 0 : index
    %c0_16 = arith.constant 0 : index
    %20 = vector.load %arg7[%c0_15, %c0_16] : memref<1x128xf32, #tpu.memory_space<vmem>>, vector<1x128xf32>
    %21 = vector.broadcast %20 : vector<1x128xf32> to vector<16x128xf32>
    %22 = arith.addf %19, %21 : vector<16x128xf32>
    %c0_17 = arith.constant 0 : index
    %c0_18 = arith.constant 0 : index
    %23 = vector.load %arg8[%c0_17, %c0_18] : memref<16x128xf32, #tpu.memory_space<vmem>>, vector<16x128xf32>
    tpu.vector_store %arg8[%c0_17, %c0_18], %22 {strides = array<i32>} : memref<16x128xf32, #tpu.memory_space<vmem>>, vector<16x128xf32>,
    return
  }
  func.func @transform_0(%arg0: i32) -> (i32, i32) {
    %c0_i32 = arith.constant 0 : i32
    %c0_i32_0 = arith.constant 0 : i32
    return %arg0, %c0_i32 : i32, i32
  }
  func.func @transform_1(%arg0: i32) -> (i32, i32) {
    %c0_i32 = arith.constant 0 : i32
    %c0_i32_0 = arith.constant 0 : i32
    %c0_i32_1 = arith.constant 0 : i32
    return %c0_i32, %c0_i32_0 : i32, i32
  }
  func.func @transform_2(%arg0: i32) -> (i32, i32) {
    %c0_i32 = arith.constant 0 : i32
    %c0_i32_0 = arith.constant 0 : i32
    %c0_i32_1 = arith.constant 0 : i32
    return %c0_i32, %c0_i32_0 : i32, i32
  }
  func.func @transform_3(%arg0: i32) -> (i32, i32) {
    %c0_i32 = arith.constant 0 : i32
    %c0_i32_0 = arith.constant 0 : i32
    %c0_i32_1 = arith.constant 0 : i32
    return %c0_i32, %c0_i32_0 : i32, i32
  }
  func.func @transform_4(%arg0: i32) -> (i32, i32) {
    %c0_i32 = arith.constant 0 : i32
    %c0_i32_0 = arith.constant 0 : i32
    %c0_i32_1 = arith.constant 0 : i32
    return %c0_i32, %c0_i32_0 : i32, i32
  }
  func.func @transform_5(%arg0: i32) -> (i32, i32) {
    %c0_i32 = arith.constant 0 : i32
    %c0_i32_0 = arith.constant 0 : i32
    %c0_i32_1 = arith.constant 0 : i32
    return %c0_i32, %c0_i32_0 : i32, i32
  }
  func.func @transform_6(%arg0: i32) -> (i32, i32) {
    %c0_i32 = arith.constant 0 : i32
    %c0_i32_0 = arith.constant 0 : i32
    %c0_i32_1 = arith.constant 0 : i32
    return %c0_i32, %c0_i32_0 : i32, i32
  }
  func.func @transform_7(%arg0: i32) -> (i32, i32) {
    %c0_i32 = arith.constant 0 : i32
    %c0_i32_0 = arith.constant 0 : i32
    return %arg0, %c0_i32 : i32, i32
  }
}

module attributes {stable_mosaic.version = 11 : i64} {
  func.func @_mlp_kernel(%arg0: i32, %arg1: memref<16x16xf32, #tpu.memory_space<vmem>>, %arg2: memref<16x1024xbf16, #tpu.memory_space<vmem>>, %arg3: memref<1x1024xf32, #tpu.memory_space<vmem>>, %arg4: memref<1024x512xbf16, #tpu.memory_space<vmem>>, %arg5: memref<1x512xf32, #tpu.memory_space<vmem>>, %arg6: memref<512x128xbf16, #tpu.memory_space<vmem>>, %arg7: memref<1x128xf32, #tpu.memory_space<vmem>>, %arg8: memref<16x128xf32, #tpu.memory_space<vmem>>) attributes {dimension_semantics = [#tpu.dimension_semantics<parallel>], iteration_bounds = array<i64: 1>, scalar_prefetch = 0 : i64, scratch_operands = 0 : i64, tpu.core_type = #tpu.core_type<tc>, window_params = [{transform_indices = @transform_0, window_bounds = array<i64: 16, 16>}, {pipeline_mode = #tpu.pipeline_mode<synchronous>, transform_indices = @transform_1, window_bounds = array<i64: 16, 1024>}, {pipeline_mode = #tpu.pipeline_mode<synchronous>, transform_indices = @transform_2, window_bounds = array<i64: 1, 1024>}, {pipeline_mode = #tpu.pipeline_mode<synchronous>, transform_indices = @transform_3, window_bounds = array<i64: 1024, 512>}, {pipeline_mode = #tpu.pipeline_mode<synchronous>, transform_indices = @transform_4, window_bounds = array<i64: 1, 512>}, {pipeline_mode = #tpu.pipeline_mode<synchronous>, transform_indices = @transform_5, window_bounds = array<i64: 512, 128>}, {pipeline_mode = #tpu.pipeline_mode<synchronous>, transform_indices = @transform_6, window_bounds = array<i64: 1, 128>}, {transform_indices = @transform_7, window_bounds = array<i64: 16, 128>}]} {
    %c0 = arith.constant 0 : index
    %c0_0 = arith.constant 0 : index
    %0 = vector.load %arg1[%c0, %c0_0] : memref<16x16xf32, #tpu.memory_space<vmem>>, vector<16x16xf32>
    %1 = arith.truncf %0 : vector<16x16xf32> to vector<16x16xbf16>
    %c0_1 = arith.constant 0 : index
    %c0_2 = arith.constant 0 : index
    %2 = vector.load %arg2[%c0_1, %c0_2] : memref<16x1024xbf16, #tpu.memory_space<vmem>>, vector<16x1024xbf16>
    %cst = arith.constant dense<0.000000e+00> : vector<16x1024xf32>
    %3 = tpu.matmul %1, %2, %cst {dimension_numbers = #tpu.dot_dimension_numbers<[1], [0], [0], [1], [0, 0, 1, 1], [], []>} : vector<16x16xbf16>, vector<16x1024xbf16>, vector<16x1024xf32> -> vector<16x1024xf32>
    %c0_3 = arith.constant 0 : index
    %c0_4 = arith.constant 0 : index
    %4 = vector.load %arg3[%c0_3, %c0_4] : memref<1x1024xf32, #tpu.memory_space<vmem>>, vector<1x1024xf32>
    %5 = vector.broadcast %4 : vector<1x1024xf32> to vector<16x1024xf32>
    %6 = arith.addf %3, %5 : vector<16x1024xf32>
    %cst_5 = arith.constant 0.000000e+00 : f32
    %7 = vector.broadcast %cst_5 : f32 to vector<16x1024xf32>
    %8 = arith.maximumf %6, %7 : vector<16x1024xf32>
    %9 = arith.truncf %8 : vector<16x1024xf32> to vector<16x1024xbf16>
    %c0_6 = arith.constant 0 : index
    %c0_7 = arith.constant 0 : index
    %10 = vector.load %arg4[%c0_6, %c0_7] : memref<1024x512xbf16, #tpu.memory_space<vmem>>, vector<1024x512xbf16>
    %cst_8 = arith.constant dense<0.000000e+00> : vector<16x512xf32>
    %11 = tpu.matmul %9, %10, %cst_8 {dimension_numbers = #tpu.dot_dimension_numbers<[1], [0], [0], [1], [0, 0, 1, 1], [], []>} : vector<16x1024xbf16>, vector<1024x512xbf16>, vector<16x512xf32> -> vector<16x512xf32>
    %c0_9 = arith.constant 0 : index
    %c0_10 = arith.constant 0 : index
    %12 = vector.load %arg5[%c0_9, %c0_10] : memref<1x512xf32, #tpu.memory_space<vmem>>, vector<1x512xf32>
    %13 = vector.broadcast %12 : vector<1x512xf32> to vector<16x512xf32>
    %14 = arith.addf %11, %13 : vector<16x512xf32>
    %cst_11 = arith.constant 0.000000e+00 : f32
    %15 = vector.broadcast %cst_11 : f32 to vector<16x512xf32>
    %16 = arith.maximumf %14, %15 : vector<16x512xf32>
    %17 = arith.truncf %16 : vector<16x512xf32> to vector<16x512xbf16>
    %c0_12 = arith.constant 0 : index
    %c0_13 = arith.constant 0 : index
    %18 = vector.load %arg6[%c0_12, %c0_13] : memref<512x128xbf16, #tpu.memory_space<vmem>>, vector<512x128xbf16>
    %cst_14 = arith.constant dense<0.000000e+00> : vector<16x128xf32>
    %19 = tpu.matmul %17, %18, %cst_14 {dimension_numbers = #tpu.dot_dimension_numbers<[1], [0], [0], [1], [0, 0, 1, 1], [], []>} : vector<16x512xbf16>, vector<512x128xbf16>, vector<16x128xf32> -> vector<16x128xf32>
    %c0_15 = arith.constant 0 : index
    %c0_16 = arith.constant 0 : index
    %20 = vector.load %arg7[%c0_15, %c0_16] : memref<1x128xf32, #tpu.memory_space<vmem>>, vector<1x128xf32>
    %21 = vector.broadcast %20 : vector<1x128xf32> to vector<16x128xf32>
    %22 = arith.addf %19, %21 : vector<16x128xf32>
    %c0_17 = arith.constant 0 : index
    %c0_18 = arith.constant 0 : index
    %23 = vector.load %arg8[%c0_17, %c0_18] : memref<16x128xf32, #tpu.memory_space<vmem>>, vector<16x128xf32>
    tpu.vector_store %arg8[%c0_17, %c0_18], %22 {strides = array<i32>} : memref<16x128xf32, #tpu.memory_space<vmem>>, vector<16x128xf32>,
    return
  }
  func.func @transform_0(%arg0: i32) -> (i32, i32) {
    %c0_i32 = arith.constant 0 : i32
    %c0_i32_0 = arith.constant 0 : i32
    return %arg0, %c0_i32 : i32, i32
  }
  func.func @transform_1(%arg0: i32) -> (i32, i32) {
    %c0_i32 = arith.constant 0 : i32
    %c0_i32_0 = arith.constant 0 : i32
    %c0_i32_1 = arith.constant 0 : i32
    return %c0_i32, %c0_i32_0 : i32, i32
  }
  func.func @transform_2(%arg0: i32) -> (i32, i32) {
    %c0_i32 = arith.constant 0 : i32
    %c0_i32_0 = arith.constant 0 : i32
    %c0_i32_1 = arith.constant 0 : i32
    return %c0_i32, %c0_i32_0 : i32, i32
  }
  func.func @transform_3(%arg0: i32) -> (i32, i32) {
    %c0_i32 = arith.constant 0 : i32
    %c0_i32_0 = arith.constant 0 : i32
    %c0_i32_1 = arith.constant 0 : i32
    return %c0_i32, %c0_i32_0 : i32, i32
  }
  func.func @transform_4(%arg0: i32) -> (i32, i32) {
    %c0_i32 = arith.constant 0 : i32
    %c0_i32_0 = arith.constant 0 : i32
    %c0_i32_1 = arith.constant 0 : i32
    return %c0_i32, %c0_i32_0 : i32, i32
  }
  func.func @transform_5(%arg0: i32) -> (i32, i32) {
    %c0_i32 = arith.constant 0 : i32
    %c0_i32_0 = arith.constant 0 : i32
    %c0_i32_1 = arith.constant 0 : i32
    return %c0_i32, %c0_i32_0 : i32, i32
  }
  func.func @transform_6(%arg0: i32) -> (i32, i32) {
    %c0_i32 = arith.constant 0 : i32
    %c0_i32_0 = arith.constant 0 : i32
    %c0_i32_1 = arith.constant 0 : i32
    return %c0_i32, %c0_i32_0 : i32, i32
  }
  func.func @transform_7(%arg0: i32) -> (i32, i32) {
    %c0_i32 = arith.constant 0 : i32
    %c0_i32_0 = arith.constant 0 : i32
    return %arg0, %c0_i32 : i32, i32
  }
}

</mosaic_0001>

<bundles_post_ra>
// kernel: tpu_custom_call.1
= control target key start
LH: loop header
LB: loop body
LE: loop exit
PB: predicated region body
PF: predicated region fallthrough
CT: control target
= control target key end

     0   :  { %12 = vsyncpa [#allocation3], 0  ;;  %s3740_s0 = inlined_call_operand.hbm [shape: f32[16,16], index: 0, kind: input, shape index: {}]   ;;  %s3741_s1 = inlined_call_operand.hbm [shape: bf16[16,1024], index: 1, kind: input, shape index: {}]   ;;  %s3742_s2 = inlined_call_operand.hbm [shape: f32[1,1024], index: 2, kind: input, shape index: {}]   ;;  %s3743_s3 = inlined_call_operand.hbm [shape: bf16[1024,512], index: 3, kind: input, shape index: {}]   ;;  %s3744_s4 = inlined_call_operand.vmem [shape: f32[1,512], index: 4, kind: input, shape index: {}]   ;;  %s3745_s5 = inlined_call_operand.hbm [shape: bf16[512,128], index: 5, kind: input, shape index: {}]   ;;  %s3746_s6 = inlined_call_operand.vmem [shape: f32[1,128], index: 6, kind: input, shape index: {}]   ;;  %s3747_s7 = inlined_call_operand.hbm [shape: f32[16,128], index: 7, kind: output, shape index: {}]  }
   0x1   :  { %13 = vsyncpa [#allocation6], 0 }
   0x2   :  { %14 = vsyncpa [#allocation9], 0 }
   0x3   :  { %15 = vsyncpa [#allocation4], 0  ;;  %s3571_s24 = smov [#allocation5]  }
   0x4   :  { %s33_s25 = sshll.u32 %s3571_s24, 4  ;;  %s34_s25 = int_to_ptr.vmem [resolvable:$true] %s33_s25 }
   0x5   :  { %s3451_s26 = scalar_lea.vmem %s34_s25, 1024  ;;  %p3456_p1 = scmp.lt.s32.totalorder %s34_s25, %s34_s25 }
   0x6   :  { %p3452_p0 = scmp.ne.s32.totalorder %s34_s25, %s3451_s26  ;;  %p3457_p2 = scmp.lt.s32.totalorder %s3451_s26, %s3451_s26 }
   0x8   :  { %p3458_p3 = por %p3457_p2, %p3456_p1 }
   0xa   :  { %p3459_p4 = pnand %p3458_p3, %p3452_p0 }
   0xc   :  { %3462 = shalt.err (!%p3459_p4)
}
   0xd   :  { %s3572_s27 = smov 512   ;;  %s3573_s28 = smov 32  }
   0xe   :  { %39 = dma.hbm_to_vmem [thread:$0]  %s3741_s1, 1024, %s34_s25, [#allocation6], %s3572_s27, %s3572_s27, %s3573_s28  }
   0xf   :  { %s3574_s8 = smov [#allocation8]  }
  0x10   :  { %s55_s9 = sshll.u32 %s3574_s8, 4  ;;  %s56_s9 = int_to_ptr.vmem [resolvable:$true] %s55_s9 }
  0x11   :  { %s3471_s10 = scalar_lea.vmem %s56_s9, 32768  ;;  %p3476_p6 = scmp.lt.s32.totalorder %s56_s9, %s56_s9 }
  0x12   :  { %p3472_p5 = scmp.ne.s32.totalorder %s56_s9, %s3471_s10  ;;  %p3477_p7 = scmp.lt.s32.totalorder %s3471_s10, %s3471_s10 }
  0x14   :  { %p3478_p8 = por %p3477_p7, %p3476_p6 }
  0x16   :  { %p3479_p9 = pnand %p3478_p8, %p3472_p5 }
  0x18   :  { %3482 = shalt.err (!%p3479_p9)
}
  0x19   :  { %s3575_s11 = smov 256   ;;  %s3576_s12 = smov 16  }
  0x1a   :  { %61 = dma.hbm_to_vmem [thread:$0]  %s3743_s3, 32768, %s56_s9, [#allocation9], %s3575_s11, %s3575_s11, %s3576_s12  }
  0x1b   :  { %s3577_s15 = smov [#allocation2]  }
  0x1c   :  { %s21_s16 = sshll.u32 %s3577_s15, 4  ;;  %s22_s16 = int_to_ptr.vmem [resolvable:$true] %s21_s16 }
  0x1d   :  { %s3491_s1 = scalar_lea.vmem %s22_s16, 256  ;;  %p3496_p11 = scmp.lt.s32.totalorder %s22_s16, %s22_s16 }
  0x1e   :  { %p3492_p10 = scmp.ne.s32.totalorder %s22_s16, %s3491_s1  ;;  %p3497_p12 = scmp.lt.s32.totalorder %s3491_s1, %s3491_s1 }
  0x20   :  { %p3498_p13 = por %p3497_p12, %p3496_p11 }
  0x22   :  { %p3499_p0 = pnand %p3498_p13, %p3492_p10 }
  0x24   :  { %3502 = shalt.err (!%p3499_p0)
}
  0x25   :  { %s3578_s17 = smov 128   ;;  %s3579_s18 = smov 8  }
  0x26   :  { %27 = dma.hbm_to_vmem [thread:$0]  %s3740_s0, 256, %s22_s16, [#allocation3], %s3578_s17, %s3578_s17, %s3579_s18  }
  0x27   :  { %s3580_s3 = smov [#allocation7]   ;;  %s3581_s22 = smov [#allocation10]  }
  0x28   :  { %s46_s21 = sshll.u32 %s3580_s3, 4  ;;  %s69_s23 = sshll.u32 %s3581_s22, 4  ;;  %s47_s21 = int_to_ptr.vmem [resolvable:$true] %s46_s21  ;;  %s70_s23 = int_to_ptr.vmem [resolvable:$true] %s69_s23 }
  0x29   :  { %s3511_s24 = scalar_lea.vmem %s47_s21, 128  ;;  %p3516_p2 = scmp.lt.s32.totalorder %s47_s21, %s47_s21 }
  0x2a   :  { %p3512_p1 = scmp.ne.s32.totalorder %s47_s21, %s3511_s24  ;;  %p3517_p3 = scmp.lt.s32.totalorder %s3511_s24, %s3511_s24 }
  0x2c   :  { %p3518_p4 = por %p3517_p3, %p3516_p2 }
  0x2e   :  { %p3519_p5 = pnand %p3518_p4, %p3512_p1 }
  0x30   :  { %3522 = shalt.err (!%p3519_p5)
}
  0x31   :  { %49 = dma.hbm_to_vmem [thread:$0]  %s3742_s2, 128, %s47_s21, [#allocation6]  }
  0x32   :  { %s3531_s27 = scalar_lea.vmem %s70_s23, 4096  ;;  %p3536_p7 = scmp.lt.s32.totalorder %s70_s23, %s70_s23 }
  0x33   :  { %p3532_p6 = scmp.ne.s32.totalorder %s70_s23, %s3531_s27  ;;  %p3537_p8 = scmp.lt.s32.totalorder %s3531_s27, %s3531_s27 }
  0x35   :  { %p3538_p9 = por %p3537_p8, %p3536_p7 }
  0x37   :  { %p3539_p10 = pnand %p3538_p9, %p3532_p6 }
  0x39   :  { %3542 = shalt.err (!%p3539_p10)
}
  0x3a   :  { %s3582_s0 = smov 64   ;;  %s3583_s28 = smov 4  }
  0x3b   :  { %75 = dma.hbm_to_vmem [thread:$0]  %s3745_s5, 4096, %s70_s23, [#allocation9], %s3582_s0, %s3582_s0, %s3583_s28  }
  0x3c   :  { %3563 = dma.done.wait [#allocation3], 256  }
  0x3d   :  { %3564 = vsyncadd [#allocation3], 4294967040 }
  0x3e   :  { %3565 = dma.done.wait [#allocation6], 1152  }
  0x3f   :  { %3566 = vsyncadd [#allocation6], 4294966144 }
  0x40   :  { %3567 = dma.done.wait [#allocation9], 36864  }
  0x41   :  { %3568 = vsyncadd [#allocation9], 4294930432  ;;  %v3584_v0 = vmov 0   ;;  %v97_v1 = vld [vmem:[#allocation5] sm:$0xff]  ;;  %v98_v3 = vld [vmem:[#allocation5 + $0x8] sm:$0xff]  ;;  %vm187_vm0 = vcmask 130048  }
  0x42   :  { %223 = vmatprep.mubr.bf16.mxu0 %v3584_v0  ;;  %266 = vmatprep.mubr.bf16.mxu1 %v3584_v0  ;;  %v101_v2 = vld [vmem:[#allocation5 + $0x20] sm:$0xff]  ;;  %v102_v5 = vld [vmem:[#allocation5 + $0x28] sm:$0xff]  ;;  %v94_v7 = vld [vmem:[#allocation2] sm:$0xff]  ;;  %s3585_s9 = smov [#allocation11]  }
  0x43   :  { %v2668_v4 = vcombine.high %v97_v1, %v101_v2  ;;  %v2667_v6 = vcombine.low %v97_v1, %v101_v2  ;;  %v95_v8 = vld [vmem:[#allocation2 + $0x8] sm:$0xff]  ;;  %v2670_v9 = vcombine.high %v98_v3, %v102_v5  ;;  %v2669_v10 = vcombine.low %v98_v3, %v102_v5  ;;  %v99_v11 = vld [vmem:[#allocation5 + $0x10] sm:$0xff]  ;;  %s2653_s10 = sshll.u32 %s3585_s9, 4  ;;  %s2654_s10 = int_to_ptr.vmem [resolvable:$true] %s2653_s10 }
  0x44   :  { %v103_v12 = vld [vmem:[#allocation5 + $0x30] sm:$0xff]  ;;  %v100_v13 = vld [vmem:[#allocation5 + $0x18] sm:$0xff]  ;;  %v96_v14 = vpack.c.bf16 %v95_v8, %v94_v7  ;;  %s3543_s11 = scalar_lea.vmem %s2654_s10, 256  ;;  %p3548_p12 = scmp.lt.s32.totalorder %s2654_s10, %s2654_s10 }
  0x45   :  { %205 = vmatprep.subr.bf16.mxu0 %v2668_v4  ;;  %v2672_v15 = vcombine.high %v99_v11, %v103_v12  ;;  %v104_v16 = vld [vmem:[#allocation5 + $0x38] sm:$0xff]  ;;  %248 = vmatprep.subr.bf16.mxu1 %v2670_v9  ;;  %v2671_v17 = vcombine.low %v99_v11, %v103_v12  ;;  %p3544_p11 = scmp.ne.s32.totalorder %s2654_s10, %s3543_s11  ;;  %p3549_p13 = scmp.lt.s32.totalorder %s3543_s11, %s3543_s11 }
  0x46   :  { %206 = vmatpush1.bf16.msra.mxu0 %v2667_v6  ;;  %v2674_v18 = vcombine.high %v100_v13, %v104_v16  ;;  %249 = vmatpush1.bf16.msra.mxu1 %v2669_v10  ;;  %v2673_v19 = vcombine.low %v100_v13, %v104_v16  ;;  %v3029_v20 = vld [vmem:[#allocation8 + $0xe4] ss:$16 sps:$4 sm:$0xff]   ;;  %v3027_v22 = vld [vmem:[#allocation8 + $0xe0] ss:$16 sps:$4 sm:$0xff]  }
  0x47   :  { %291 = vmatprep.subr.bf16.mxu0 %v2672_v15  ;;  %v3032_v21 = vld [vmem:[#allocation8 + $0x2e4] ss:$16 sps:$4 sm:$0xff]   ;;  %v3030_v23 = vld [vmem:[#allocation8 + $0x2e0] ss:$16 sps:$4 sm:$0xff]   ;;  %p3550_p0 = por %p3549_p13, %p3548_p12 }
  0x48   :  { %334 = vmatprep.subr.bf16.mxu1 %v2674_v18  ;;  %v3035_v24 = vld [vmem:[#allocation8 + $0xc4] ss:$16 sps:$4 sm:$0xff]   ;;  %v3033_v26 = vld [vmem:[#allocation8 + $0xc0] ss:$16 sps:$4 sm:$0xff]  }
  0x49   :  { %2675 = vmatmul.mubr.msk.bf16.vlgmr.msra.gmra.mxu0 %vm187_vm0, %v96_v14  ;;  %2676 = vmatmul.mubr.msk.bf16.vlgmr.msra.gmra.mxu1 %vm187_vm0, %v96_v14  ;;  %v3038_v25 = vld [vmem:[#allocation8 + $0x2c4] ss:$16 sps:$4 sm:$0xff]   ;;  %v3036_v27 = vld [vmem:[#allocation8 + $0x2c0] ss:$16 sps:$4 sm:$0xff]   ;;  %p3551_p1 = pnand %p3550_p0, %p3544_p11 }
  0x4a   :  { %292 = vmatpush1.bf16.msra.mxu0 %v2671_v17  ;;  %309 = vmatprep.mubr.bf16.mxu0 %v3584_v0  ;;  %v3041_v28 = vld [vmem:[#allocation8 + $0xa4] ss:$16 sps:$4 sm:$0xff]   ;;  %v3039_v30 = vld [vmem:[#allocation8 + $0xa0] ss:$16 sps:$4 sm:$0xff]  }
  0x4b   :  { %335 = vmatpush1.bf16.msra.mxu1 %v2673_v19  ;;  %352 = vmatprep.mubr.bf16.mxu1 %v3584_v0  ;;  %v3044_v29 = vld [vmem:[#allocation8 + $0x2a4] ss:$16 sps:$4 sm:$0xff]   ;;  %v3042_v31 = vld [vmem:[#allocation8 + $0x2a0] ss:$16 sps:$4 sm:$0xff]  }
  0x4c   :  { %1945 = vmatprep.subr.bf16.mxu0 %v3029_v20  ;;  %1988 = vmatprep.subr.bf16.mxu1 %v3032_v21  ;;  %v3047_v32 = vld [vmem:[#allocation8 + $0x84] ss:$16 sps:$4 sm:$0xff]   ;;  %v3045_v34 = vld [vmem:[#allocation8 + $0x80] ss:$16 sps:$4 sm:$0xff]  }
  0x4d   :  { %v3050_v33 = vld [vmem:[#allocation8 + $0x284] ss:$16 sps:$4 sm:$0xff]   ;;  %v3048_v35 = vld [vmem:[#allocation8 + $0x280] ss:$16 sps:$4 sm:$0xff]  }
  0x4e   :  { %v3053_v36 = vld [vmem:[#allocation8 + $0x64] ss:$16 sps:$4 sm:$0xff]   ;;  %v3051_v38 = vld [vmem:[#allocation8 + $0x60] ss:$16 sps:$4 sm:$0xff]  }
  0x4f   :  { %v3056_v37 = vld [vmem:[#allocation8 + $0x264] ss:$16 sps:$4 sm:$0xff]   ;;  %v3054_v39 = vld [vmem:[#allocation8 + $0x260] ss:$16 sps:$4 sm:$0xff]  }
  0x50   :  { %v3059_v40 = vld [vmem:[#allocation8 + $0x44] ss:$16 sps:$4 sm:$0xff]   ;;  %v3057_v42 = vld [vmem:[#allocation8 + $0x40] ss:$16 sps:$4 sm:$0xff]  }
  0x51   :  { %2677 = vmatmul.mubr.msk.bf16.vlgmr.msra.gmra.mxu0 %vm187_vm0, %v96_v14  ;;  %2678 = vmatmul.mubr.msk.bf16.vlgmr.msra.gmra.mxu1 %vm187_vm0, %v96_v14  ;;  %v3062_v41 = vld [vmem:[#allocation8 + $0x244] ss:$16 sps:$4 sm:$0xff]   ;;  %v3060_v43 = vld [vmem:[#allocation8 + $0x240] ss:$16 sps:$4 sm:$0xff]  }
  0x52   :  { %1946 = vmatpush1.bf16.msra.mxu0 %v3027_v22  ;;  %1989 = vmatpush1.bf16.msra.mxu1 %v3030_v23  ;;  %v3065_v44 = vld [vmem:[#allocation8 + $0x24] ss:$16 sps:$4 sm:$0xff]   ;;  %v3063_v46 = vld [vmem:[#allocation8 + $0x20] ss:$16 sps:$4 sm:$0xff]   ;;  %v107_v22 = vlaneseq }
  0x53   :  { %1947 = vmatprep.subr.bf16.mxu0 %v3035_v24  ;;  %1990 = vmatprep.subr.bf16.mxu1 %v3038_v25  ;;  %v3068_v45 = vld [vmem:[#allocation8 + $0x224] ss:$16 sps:$4 sm:$0xff]   ;;  %v3066_v47 = vld [vmem:[#allocation8 + $0x220] ss:$16 sps:$4 sm:$0xff]  }
  0x54   :  { %v3071_v48 = vld [vmem:[#allocation8 + $0x4] ss:$16 sps:$4 sm:$0xff]   ;;  %v3069_v49 = vld [vmem:[#allocation8] ss:$16 sps:$4 sm:$0xff]   ;;  %v3648_v23 = vshrl.u32 %v107_v22, 7 }
  0x55   :  { %v3074_v50 = vld [vmem:[#allocation8 + $0x204] ss:$16 sps:$4 sm:$0xff]   ;;  %v3072_v51 = vld [vmem:[#allocation8 + $0x200] ss:$16 sps:$4 sm:$0xff]  }
  0x56   :  { %1948 = vmatpush1.bf16.msra.mxu0 %v3033_v26  ;;  %1991 = vmatpush1.bf16.msra.mxu1 %v3036_v27  ;;  %v3077_v52 = vld [vmem:[#allocation8 + $0x1e4] ss:$16 sps:$4 sm:$0xff]   ;;  %v3075_v54 = vld [vmem:[#allocation8 + $0x1e0] ss:$16 sps:$4 sm:$0xff]   ;;  %v113_v24 = vsub.s32 1, %v3648_v23  ;;  %v109_v25 = vsub.s32 0, %v3648_v23 }
  0x57   :  { %1949 = vmatprep.subr.bf16.mxu0 %v3041_v28  ;;  %1992 = vmatprep.subr.bf16.mxu1 %v3044_v29  ;;  %v3080_v53 = vld [vmem:[#allocation8 + $0x3e4] ss:$16 sps:$4 sm:$0xff]   ;;  %v3078_v55 = vld [vmem:[#allocation8 + $0x3e0] ss:$16 sps:$4 sm:$0xff]   ;;  %v121_v26 = vsub.s32 3, %v3648_v23  ;;  %v3653_v27 = vld [vmem:[#allocation7] sm:$0xff] }
  0x58   :  { %v3083_v56 = vld [vmem:[#allocation8 + $0x1c4] ss:$16 sps:$4 sm:$0xff]   ;;  %v3081_v58 = vld [vmem:[#allocation8 + $0x1c0] ss:$16 sps:$4 sm:$0xff]   ;;  %v117_v28 = vsub.s32 2, %v3648_v23 }
  0x59   :  { %v3086_v57 = vld [vmem:[#allocation8 + $0x3c4] ss:$16 sps:$4 sm:$0xff]   ;;  %v3084_v59 = vld [vmem:[#allocation8 + $0x3c0] ss:$16 sps:$4 sm:$0xff]  }
  0x5a   :  { %1950 = vmatpush1.bf16.msra.mxu0 %v3039_v30  ;;  %1993 = vmatpush1.bf16.msra.mxu1 %v3042_v31  ;;  %v3089_v60 = vld [vmem:[#allocation8 + $0x1a4] ss:$16 sps:$4 sm:$0xff]   ;;  %v3087_v62 = vld [vmem:[#allocation8 + $0x1a0] ss:$16 sps:$4 sm:$0xff]   ;;  %v114_v31 = vrot.slane %v3653_v27, %v113_v24 }
  0x5b   :  { %1951 = vmatprep.subr.bf16.mxu0 %v3047_v32  ;;  %1994 = vmatprep.subr.bf16.mxu1 %v3050_v33  ;;  %v3092_v61 = vld [vmem:[#allocation8 + $0x3a4] ss:$16 sps:$4 sm:$0xff]   ;;  %v3090_v63 = vld [vmem:[#allocation8 + $0x3a0] ss:$16 sps:$4 sm:$0xff]   ;;  %v110_v32 = vrot.slane %v3653_v27, %v109_v25 }
  0x5c   :  { %v3095_v0 = vld [vmem:[#allocation8 + $0x184] ss:$16 sps:$4 sm:$0xff]   ;;  %v3093_v2 = vld [vmem:[#allocation8 + $0x180] ss:$16 sps:$4 sm:$0xff]  }
  0x5d   :  { %v3098_v1 = vld [vmem:[#allocation8 + $0x384] ss:$16 sps:$4 sm:$0xff]   ;;  %v3096_v3 = vld [vmem:[#allocation8 + $0x380] ss:$16 sps:$4 sm:$0xff]  }
  0x5e   :  { %1952 = vmatpush1.bf16.msra.mxu0 %v3045_v34  ;;  %1995 = vmatpush1.bf16.msra.mxu1 %v3048_v35  ;;  %v3101_v4 = vld [vmem:[#allocation8 + $0x164] ss:$16 sps:$4 sm:$0xff]   ;;  %v3099_v6 = vld [vmem:[#allocation8 + $0x160] ss:$16 sps:$4 sm:$0xff]   ;;  %v122_v34 = vrot.slane %v3653_v27, %v121_v26  ;;  %v118_v35 = vrot.slane %v3653_v27, %v117_v28 }
  0x5f   :  { %1953 = vmatprep.subr.bf16.mxu0 %v3053_v36  ;;  %1996 = vmatprep.subr.bf16.mxu1 %v3056_v37  ;;  %v3104_v5 = vld [vmem:[#allocation8 + $0x364] ss:$16 sps:$4 sm:$0xff]   ;;  %v3102_v7 = vld [vmem:[#allocation8 + $0x360] ss:$16 sps:$4 sm:$0xff]   ;;  %v129_v37 = vsub.s32 5, %v3648_v23 }
  0x60   :  { %v3107_v8 = vld [vmem:[#allocation8 + $0x144] ss:$16 sps:$4 sm:$0xff]   ;;  %v3105_v10 = vld [vmem:[#allocation8 + $0x140] ss:$16 sps:$4 sm:$0xff]  }
  0x61   :  { %v3110_v9 = vld [vmem:[#allocation8 + $0x344] ss:$16 sps:$4 sm:$0xff]   ;;  %v3108_v11 = vld [vmem:[#allocation8 + $0x340] ss:$16 sps:$4 sm:$0xff]  }
  0x62   :  { %1954 = vmatpush1.bf16.msra.mxu0 %v3051_v38  ;;  %1997 = vmatpush1.bf16.msra.mxu1 %v3054_v39  ;;  %v3113_v12 = vld [vmem:[#allocation8 + $0x124] ss:$16 sps:$4 sm:$0xff]   ;;  %v3111_v14 = vld [vmem:[#allocation8 + $0x120] ss:$16 sps:$4 sm:$0xff]   ;;  %v137_v39 = vsub.s32 7, %v3648_v23 }
  0x63   :  { %1955 = vmatprep.subr.bf16.mxu0 %v3059_v40  ;;  %1998 = vmatprep.subr.bf16.mxu1 %v3062_v41  ;;  %v3116_v13 = vld [vmem:[#allocation8 + $0x324] ss:$16 sps:$4 sm:$0xff]   ;;  %v3114_v15 = vld [vmem:[#allocation8 + $0x320] ss:$16 sps:$4 sm:$0xff]  }
  0x64   :  { %v3119_v16 = vld [vmem:[#allocation8 + $0x104] ss:$16 sps:$4 sm:$0xff]   ;;  %v3117_v18 = vld [vmem:[#allocation8 + $0x100] ss:$16 sps:$4 sm:$0xff]  }
  0x65   :  { %v3122_v17 = vld [vmem:[#allocation8 + $0x304] ss:$16 sps:$4 sm:$0xff]   ;;  %v3120_v19 = vld [vmem:[#allocation8 + $0x300] ss:$16 sps:$4 sm:$0xff]  }
  0x66   :  { %1956 = vmatpush1.bf16.msra.mxu0 %v3057_v42  ;;  %1999 = vmatpush1.bf16.msra.mxu1 %v3060_v43  ;;  %v3125_v20 = vld [vmem:[#allocation8 + $0x4e4] ss:$16 sps:$4 sm:$0xff]  }
  0x67   :  { %1957 = vmatprep.subr.bf16.mxu0 %v3065_v44  ;;  %2000 = vmatprep.subr.bf16.mxu1 %v3068_v45  ;;  %v3128_v21 = vld [vmem:[#allocation8 + $0x6e4] ss:$16 sps:$4 sm:$0xff]  }
  0x68   :  { %v3140_v22 = vld [vmem:[#allocation8 + $0x6a4] ss:$16 sps:$4 sm:$0xff]  }
  0x6a   :  { %1958 = vmatpush1.bf16.msra.mxu0 %v3063_v46  ;;  %2001 = vmatpush1.bf16.msra.mxu1 %v3066_v47 }
  0x6b   :  { %1959 = vmatprep.subr.bf16.mxu0 %v3071_v48  ;;  %2002 = vmatprep.subr.bf16.mxu1 %v3074_v50  ;;  %v130_v50 = vrot.slane %v3653_v27, %v129_v37  ;;  %v3141_v37 = vld [vmem:[#allocation8 + $0x480] ss:$16 sps:$4 sm:$0xff]  }
  0x6e   :  { %1960 = vmatpush1.bf16.msra.mxu0 %v3069_v49  ;;  %2003 = vmatpush1.bf16.msra.mxu1 %v3072_v51 }
  0x6f   :  { %1961 = vmatprep.subr.bf16.mxu0 %v3077_v52  ;;  %2004 = vmatprep.subr.bf16.mxu1 %v3080_v53 }
  0x72   :  { %1962 = vmatpush2.bf16.msra.mxu0 %v3075_v54  ;;  %2005 = vmatpush2.bf16.msra.mxu1 %v3078_v55  ;;  %v138_v54 = vrot.slane %v3653_v27, %v137_v39  ;;  %v3149_v39 = vld [vmem:[#allocation8 + $0x464] ss:$16 sps:$4 sm:$0xff]  }
  0x73   :  { %1963 = vmatprep.subr.bf16.mxu0 %v3083_v56  ;;  %2006 = vmatprep.subr.bf16.mxu1 %v3086_v57 }
  0x76   :  { %1964 = vmatpush2.bf16.msra.mxu0 %v3081_v58  ;;  %2007 = vmatpush2.bf16.msra.mxu1 %v3084_v59 }
  0x77   :  { %1965 = vmatprep.subr.bf16.mxu0 %v3089_v60  ;;  %2008 = vmatprep.subr.bf16.mxu1 %v3092_v61 }
  0x7a   :  { %1966 = vmatpush2.bf16.msra.mxu0 %v3087_v62  ;;  %2009 = vmatpush2.bf16.msra.mxu1 %v3090_v63 }
  0x7b   :  { %1967 = vmatprep.subr.bf16.mxu0 %v3095_v0  ;;  %2010 = vmatprep.subr.bf16.mxu1 %v3098_v1  ;;  %v3123_v1 = vld [vmem:[#allocation8 + $0x4e0] ss:$16 sps:$4 sm:$0xff]  }
  0x7e   :  { %1968 = vmatpush2.bf16.msra.mxu0 %v3093_v2  ;;  %2011 = vmatpush2.bf16.msra.mxu1 %v3096_v3 }
  0x7f   :  { %1969 = vmatprep.subr.bf16.mxu0 %v3101_v4  ;;  %2012 = vmatprep.subr.bf16.mxu1 %v3104_v5 }
  0x82   :  { %1970 = vmatpush2.bf16.msra.mxu0 %v3099_v6  ;;  %2013 = vmatpush2.bf16.msra.mxu1 %v3102_v7  ;;  %v3126_v6 = vld [vmem:[#allocation8 + $0x6e0] ss:$16 sps:$4 sm:$0xff]   ;;  %v3131_v7 = vld [vmem:[#allocation8 + $0x4c4] ss:$16 sps:$4 sm:$0xff]  }
  0x83   :  { %1971 = vmatprep.subr.bf16.mxu0 %v3107_v8  ;;  %2014 = vmatprep.subr.bf16.mxu1 %v3110_v9 }
  0x86   :  { %1972 = vmatpush2.bf16.msra.mxu0 %v3105_v10  ;;  %2015 = vmatpush2.bf16.msra.mxu1 %v3108_v11  ;;  %v3134_v11 = vld [vmem:[#allocation8 + $0x6c4] ss:$16 sps:$4 sm:$0xff]  }
  0x87   :  { %1973 = vmatprep.subr.bf16.mxu0 %v3113_v12  ;;  %2016 = vmatprep.subr.bf16.mxu1 %v3116_v13 }
  0x8a   :  { %1974 = vmatpush2.bf16.msra.mxu0 %v3111_v14  ;;  %2017 = vmatpush2.bf16.msra.mxu1 %v3114_v15  ;;  %v3129_v14 = vld [vmem:[#allocation8 + $0x4c0] ss:$16 sps:$4 sm:$0xff]  }
  0x8b   :  { %1975 = vmatprep.subr.bf16.mxu0 %v3119_v16  ;;  %2018 = vmatprep.subr.bf16.mxu1 %v3122_v17 }
  0x8e   :  { %1976 = vmatpush2.bf16.msra.mxu0 %v3117_v18  ;;  %2019 = vmatpush2.bf16.msra.mxu1 %v3120_v19  ;;  %v3132_v18 = vld [vmem:[#allocation8 + $0x6c0] ss:$16 sps:$4 sm:$0xff]   ;;  %v3137_v19 = vld [vmem:[#allocation8 + $0x4a4] ss:$16 sps:$4 sm:$0xff]  }
  0x8f   :  { %2031 = vmatprep.subr.bf16.mxu0 %v3125_v20  ;;  %2074 = vmatprep.subr.bf16.mxu1 %v3128_v21 }
 0x109   :  { %v225_v29 = vpop.f32.mrf.mxu0  ;;  %v268_v30 = vpop.f32.mrf.mxu1 }
 0x10a   :  { %v226_v43 = vadd.f32 %v225_v29, %v110_v32  ;;  %v269_v47 = vadd.f32 %v268_v30, %v118_v35 }
 0x10b   :  { %v227_v33 = vpop.f32.mrf.mxu0  ;;  %v270_v36 = vpop.f32.mrf.mxu1 }
 0x10c   :  { %v228_v40 = vadd.f32 %v227_v33, %v114_v31  ;;  %v271_v44 = vadd.f32 %v270_v36, %v122_v34  ;;  %v363_v59 = vmax.f32 %v226_v43, 0.0  ;;  %v365_v63 = vmax.f32 %v269_v47, 0.0  ;;  %v3138_v33 = vld [vmem:[#allocation8 + $0x6a0] ss:$16 sps:$4 sm:$0xff]   ;;  %v3146_v36 = vld [vmem:[#allocation8 + $0x684] ss:$16 sps:$4 sm:$0xff]  }
 0x10d   :  { %v229_v38 = vpop.f32.mrf.mxu0  ;;  %v272_v42 = vpop.f32.mrf.mxu1  ;;  %v3155_v43 = vld [vmem:[#allocation8 + $0x444] ss:$16 sps:$4 sm:$0xff]  }
 0x10e   :  { %v230_v41 = vadd.f32 %v229_v38, %v110_v32  ;;  %v273_v45 = vadd.f32 %v272_v42, %v118_v35  ;;  %v364_v55 = vmax.f32 %v228_v40, 0.0  ;;  %v366_v60 = vmax.f32 %v271_v44, 0.0  ;;  %v3144_v38 = vld [vmem:[#allocation8 + $0x680] ss:$16 sps:$4 sm:$0xff]   ;;  %v3152_v40 = vld [vmem:[#allocation8 + $0x664] ss:$16 sps:$4 sm:$0xff]  }
 0x10f   :  { %v231_v46 = vpop.f32.mrf.mxu0  ;;  %v274_v49 = vpop.f32.mrf.mxu1  ;;  %v3150_v42 = vld [vmem:[#allocation8 + $0x660] ss:$16 sps:$4 sm:$0xff]   ;;  %v3158_v44 = vld [vmem:[#allocation8 + $0x644] ss:$16 sps:$4 sm:$0xff]  }
 0x110   :  { %v232_v48 = vadd.f32 %v231_v46, %v114_v31  ;;  %v371_v51 = vmax.f32 %v230_v41, 0.0  ;;  %v275_v52 = vadd.f32 %v274_v49, %v122_v34  ;;  %v373_v56 = vmax.f32 %v273_v45, 0.0  ;;  %v3135_v31 = vld [vmem:[#allocation8 + $0x4a0] ss:$16 sps:$4 sm:$0xff]   ;;  %v3143_v34 = vld [vmem:[#allocation8 + $0x484] ss:$16 sps:$4 sm:$0xff]  }
 0x111   :  { %v3671_v53 = vpop.f32.mrf.mxu0  ;;  %v3674_v58 = vpop.f32.mrf.mxu1  ;;  %v3147_v41 = vld [vmem:[#allocation8 + $0x460] ss:$16 sps:$4 sm:$0xff]   ;;  %v3161_v47 = vld [vmem:[#allocation8 + $0x424] ss:$16 sps:$4 sm:$0xff]  }
 0x112   :  { %v372_v57 = vmax.f32 %v232_v48, 0.0  ;;  %v374_v61 = vmax.f32 %v275_v52, 0.0  ;;  %v3678_v4 = vpack.c.bf16 %v371_v51, %v363_v59  ;;  %v3684_v10 = vpack.c.bf16 %v373_v56, %v365_v63  ;;  %v3153_v45 = vld [vmem:[#allocation8 + $0x440] ss:$16 sps:$4 sm:$0xff]   ;;  %v3164_v48 = vld [vmem:[#allocation8 + $0x624] ss:$16 sps:$4 sm:$0xff]  }
 0x113   :  { %v313_v62 = vpop.f32.mrf.mxu0  ;;  %v356_v3 = vpop.f32.mrf.mxu1  ;;  %v3156_v46 = vld [vmem:[#allocation8 + $0x640] ss:$16 sps:$4 sm:$0xff]   ;;  %v3167_v51 = vld [vmem:[#allocation8 + $0x404] ss:$16 sps:$4 sm:$0xff]  }
 0x114   :  { %v3676_v0 = vpack.c.bf16 %v372_v57, %v364_v55  ;;  %v314_v2 = vadd.f32 %v313_v62, %v130_v50  ;;  %v3680_v5 = vpack.c.bf16 %v374_v61, %v366_v60  ;;  %v357_v9 = vadd.f32 %v356_v3, %v138_v54  ;;  %v3159_v49 = vld [vmem:[#allocation8 + $0x420] ss:$16 sps:$4 sm:$0xff]   ;;  %v3170_v52 = vld [vmem:[#allocation8 + $0x604] ss:$16 sps:$4 sm:$0xff]  }
 0x115   :  { %v3682_v8 = vpop.f32.mrf.mxu0  ;;  %v3687_v12 = vpop.f32.mrf.mxu1  ;;  %v3168_v55 = vld [vmem:[#allocation8 + $0x600] ss:$16 sps:$4 sm:$0xff]   ;;  %v3173_v56 = vld [vmem:[#allocation8 + $0x5e4] ss:$16 sps:$4 sm:$0xff]  }
 0x116   :  { %1977 = vmatprep.mubr.bf16.mxu0 %v3676_v0  ;;  %2020 = vmatprep.mubr.bf16.mxu1 %v3680_v5  ;;  %v368_v15 = vmax.f32 %v314_v2, 0.0  ;;  %v370_v20 = vmax.f32 %v357_v9, 0.0  ;;  %v3176_v57 = vld [vmem:[#allocation8 + $0x7e4] ss:$16 sps:$4 sm:$0xff]   ;;  %v3171_v59 = vld [vmem:[#allocation8 + $0x5e0] ss:$16 sps:$4 sm:$0xff]  }
 0x117   :  { %1978 = vmatmul.mubr.bf16.vlgmr.msra.gmra.mxu0 %v3678_v4  ;;  %v317_v13 = vpop.f32.mrf.mxu0  ;;  %2021 = vmatmul.mubr.bf16.vlgmr.msra.gmra.mxu1 %v3684_v10  ;;  %v360_v17 = vpop.f32.mrf.mxu1  ;;  %v3174_v60 = vld [vmem:[#allocation8 + $0x7e0] ss:$16 sps:$4 sm:$0xff]   ;;  %v3179_v61 = vld [vmem:[#allocation8 + $0x5c4] ss:$16 sps:$4 sm:$0xff]  }
 0x118   :  { %2032 = vmatpush1.bf16.msra.mxu0 %v3123_v1  ;;  %v318_v16 = vadd.f32 %v317_v13, %v130_v50  ;;  %2075 = vmatpush1.bf16.msra.mxu1 %v3126_v6  ;;  %v361_v21 = vadd.f32 %v360_v17, %v138_v54  ;;  %v3162_v50 = vld [vmem:[#allocation8 + $0x620] ss:$16 sps:$4 sm:$0xff]   ;;  %v3182_v62 = vld [vmem:[#allocation8 + $0x7c4] ss:$16 sps:$4 sm:$0xff]  }
 0x119   :  { %2033 = vmatprep.subr.bf16.mxu0 %v3131_v7  ;;  %2076 = vmatprep.subr.bf16.mxu1 %v3134_v11  ;;  %v3165_v54 = vld [vmem:[#allocation8 + $0x400] ss:$16 sps:$4 sm:$0xff]   ;;  %v3185_v2 = vld [vmem:[#allocation8 + $0x5a4] ss:$16 sps:$4 sm:$0xff]  }
 0x11a   :  { %v376_v29 = vmax.f32 %v318_v16, 0.0  ;;  %v378_v30 = vmax.f32 %v361_v21, 0.0  ;;  %v3177_v63 = vld [vmem:[#allocation8 + $0x5c0] ss:$16 sps:$4 sm:$0xff]   ;;  %v3188_v3 = vld [vmem:[#allocation8 + $0x7a4] ss:$16 sps:$4 sm:$0xff]  }
 0x11b   :  { %v3180_v1 = vld [vmem:[#allocation8 + $0x7c0] ss:$16 sps:$4 sm:$0xff]   ;;  %v3191_v9 = vld [vmem:[#allocation8 + $0x584] ss:$16 sps:$4 sm:$0xff]   ;;  %v133_v21 = vsub.s32 6, %v3648_v23 }
 0x11c   :  { %2034 = vmatpush1.bf16.msra.mxu0 %v3129_v14  ;;  %v3692_v32 = vpack.c.bf16 %v376_v29, %v368_v15  ;;  %2077 = vmatpush1.bf16.msra.mxu1 %v3132_v18  ;;  %v3694_v35 = vpack.c.bf16 %v378_v30, %v370_v20  ;;  %v3183_v6 = vld [vmem:[#allocation8 + $0x5a0] ss:$16 sps:$4 sm:$0xff]   ;;  %v3194_v11 = vld [vmem:[#allocation8 + $0x784] ss:$16 sps:$4 sm:$0xff]   ;;  %v125_v18 = vsub.s32 4, %v3648_v23 }
 0x11d   :  { %2035 = vmatprep.subr.bf16.mxu0 %v3137_v19  ;;  %2078 = vmatprep.subr.bf16.mxu1 %v3140_v22  ;;  %v3186_v7 = vld [vmem:[#allocation8 + $0x7a0] ss:$16 sps:$4 sm:$0xff]   ;;  %v3197_v15 = vld [vmem:[#allocation8 + $0x564] ss:$16 sps:$4 sm:$0xff]  }
 0x11e   :  { %2063 = vmatprep.mubr.bf16.mxu0 %v3692_v32  ;;  %2106 = vmatprep.mubr.bf16.mxu1 %v3694_v35  ;;  %v3189_v13 = vld [vmem:[#allocation8 + $0x580] ss:$16 sps:$4 sm:$0xff]   ;;  %v3200_v16 = vld [vmem:[#allocation8 + $0x764] ss:$16 sps:$4 sm:$0xff]   ;;  %v126_v30 = vrot.slane %v3653_v27, %v125_v18  ;;  %v3263_v18 = vld [vmem:[#allocation8 + $0xc] ss:$16 sps:$4 sm:$0xff]  }
 0x11f   :  { %v3192_v14 = vld [vmem:[#allocation8 + $0x780] ss:$16 sps:$4 sm:$0xff]   ;;  %v3203_v20 = vld [vmem:[#allocation8 + $0x544] ss:$16 sps:$4 sm:$0xff]  }
 0x120   :  { %2036 = vmatpush1.bf16.msra.mxu0 %v3135_v31  ;;  %2079 = vmatpush1.bf16.msra.mxu1 %v3138_v33  ;;  %v3195_v17 = vld [vmem:[#allocation8 + $0x560] ss:$16 sps:$4 sm:$0xff]   ;;  %v3206_v22 = vld [vmem:[#allocation8 + $0x744] ss:$16 sps:$4 sm:$0xff]  }
 0x121   :  { %2037 = vmatprep.subr.bf16.mxu0 %v3143_v34  ;;  %2080 = vmatprep.subr.bf16.mxu1 %v3146_v36  ;;  %v3198_v19 = vld [vmem:[#allocation8 + $0x760] ss:$16 sps:$4 sm:$0xff]   ;;  %v3209_v33 = vld [vmem:[#allocation8 + $0x524] ss:$16 sps:$4 sm:$0xff]   ;;  %v134_v34 = vrot.slane %v3653_v27, %v133_v21  ;;  %v3264_v21 = vld [vmem:[#allocation8 + $0x208] ss:$16 sps:$4 sm:$0xff]  }
 0x122   :  { %v3201_v29 = vld [vmem:[#allocation8 + $0x540] ss:$16 sps:$4 sm:$0xff]   ;;  %v3212_v36 = vld [vmem:[#allocation8 + $0x724] ss:$16 sps:$4 sm:$0xff]  }
 0x123   :  { %v3204_v31 = vld [vmem:[#allocation8 + $0x740] ss:$16 sps:$4 sm:$0xff]  }
 0x124   :  { %2038 = vmatpush1.bf16.msra.mxu0 %v3141_v37  ;;  %2081 = vmatpush1.bf16.msra.mxu1 %v3144_v38  ;;  %v3207_v37 = vld [vmem:[#allocation8 + $0x520] ss:$16 sps:$4 sm:$0xff]   ;;  %v312_v38 = vadd.f32 %v3671_v53, %v126_v30  ;;  %v3221_v53 = vld [vmem:[#allocation8 + $0xec] ss:$16 sps:$4 sm:$0xff]  }
 0x125   :  { %2039 = vmatprep.subr.bf16.mxu0 %v3149_v39  ;;  %2082 = vmatprep.subr.bf16.mxu1 %v3152_v40  ;;  %v316_v39 = vadd.f32 %v3682_v8, %v126_v30  ;;  %v3210_v40 = vld [vmem:[#allocation8 + $0x720] ss:$16 sps:$4 sm:$0xff]   ;;  %v3267_v30 = vld [vmem:[#allocation8 + $0x1e8] ss:$16 sps:$4 sm:$0xff]  }
 0x126   :  { %v3213_v27 = vld [vmem:[#allocation8 + $0x500] ss:$16 sps:$4 sm:$0xff]  }
 0x128   :  { %2040 = vmatpush1.bf16.msra.mxu0 %v3147_v41  ;;  %2083 = vmatpush1.bf16.msra.mxu1 %v3150_v42  ;;  %v3215_v41 = vld [vmem:[#allocation8 + $0x504] ss:$16 sps:$4 sm:$0xff]   ;;  %v355_v42 = vadd.f32 %v3674_v58, %v134_v34  ;;  %v3222_v58 = vld [vmem:[#allocation8 + $0x2e8] ss:$16 sps:$4 sm:$0xff]  }
 0x129   :  { %2041 = vmatprep.subr.bf16.mxu0 %v3155_v43  ;;  %2084 = vmatprep.subr.bf16.mxu1 %v3158_v44  ;;  %v359_v43 = vadd.f32 %v3687_v12, %v134_v34  ;;  %v3218_v44 = vld [vmem:[#allocation8 + $0x704] ss:$16 sps:$4 sm:$0xff]   ;;  %v3278_v34 = vld [vmem:[#allocation8 + $0x3cc] ss:$16 sps:$4 sm:$0xff]  }
 0x12b   :  { %v377_v8 = vmax.f32 %v359_v43, 0.0  ;;  %v3290_v43 = vld [vmem:[#allocation8 + $0x38c] ss:$16 sps:$4 sm:$0xff]  }
 0x12c   :  { %2042 = vmatpush1.bf16.msra.mxu0 %v3153_v45  ;;  %2085 = vmatpush1.bf16.msra.mxu1 %v3156_v46  ;;  %v367_v45 = vmax.f32 %v312_v38, 0.0  ;;  %v375_v46 = vmax.f32 %v316_v39, 0.0  ;;  %v3281_v38 = vld [vmem:[#allocation8 + $0x1ac] ss:$16 sps:$4 sm:$0xff]  }
 0x12d   :  { %2043 = vmatprep.subr.bf16.mxu0 %v3161_v47  ;;  %2086 = vmatprep.subr.bf16.mxu1 %v3164_v48  ;;  %v3216_v47 = vld [vmem:[#allocation8 + $0x700] ss:$16 sps:$4 sm:$0xff]   ;;  %v369_v48 = vmax.f32 %v355_v42, 0.0  ;;  %v3284_v39 = vld [vmem:[#allocation8 + $0x3ac] ss:$16 sps:$4 sm:$0xff]  }
 0x12e   :  { %v3287_v42 = vld [vmem:[#allocation8 + $0x18c] ss:$16 sps:$4 sm:$0xff]  }
 0x12f   :  { %v3708_v12 = vpack.c.bf16 %v377_v8, %v369_v48  ;;  %v3299_v48 = vld [vmem:[#allocation8 + $0x14c] ss:$16 sps:$4 sm:$0xff]  }
 0x130   :  { %2044 = vmatpush1.bf16.msra.mxu0 %v3159_v49  ;;  %2087 = vmatpush1.bf16.msra.mxu1 %v3162_v50  ;;  %v3224_v49 = vld [vmem:[#allocation8 + $0x2ec] ss:$16 sps:$4 sm:$0xff]   ;;  %v3219_v50 = vld [vmem:[#allocation8 + $0xe8] ss:$16 sps:$4 sm:$0xff]  }
 0x131   :  { %2045 = vmatprep.subr.bf16.mxu0 %v3167_v51  ;;  %2088 = vmatprep.subr.bf16.mxu1 %v3170_v52  ;;  %v3706_v51 = vpack.c.bf16 %v375_v46, %v367_v45  ;;  %v3227_v52 = vld [vmem:[#allocation8 + $0xcc] ss:$16 sps:$4 sm:$0xff]  }
 0x132   :  { %v3293_v45 = vld [vmem:[#allocation8 + $0x16c] ss:$16 sps:$4 sm:$0xff]  }
 0x133   :  { %v3296_v46 = vld [vmem:[#allocation8 + $0x36c] ss:$16 sps:$4 sm:$0xff]  }
 0x134   :  { %2046 = vmatpush1.bf16.msra.mxu0 %v3165_v54  ;;  %2089 = vmatpush1.bf16.msra.mxu1 %v3168_v55  ;;  %v3230_v54 = vld [vmem:[#allocation8 + $0x2cc] ss:$16 sps:$4 sm:$0xff]   ;;  %v3225_v55 = vld [vmem:[#allocation8 + $0xc8] ss:$16 sps:$4 sm:$0xff]  }
 0x135   :  { %2047 = vmatprep.subr.bf16.mxu0 %v3173_v56  ;;  %2090 = vmatprep.subr.bf16.mxu1 %v3176_v57  ;;  %v3228_v56 = vld [vmem:[#allocation8 + $0x2c8] ss:$16 sps:$4 sm:$0xff]   ;;  %v3233_v57 = vld [vmem:[#allocation8 + $0xac] ss:$16 sps:$4 sm:$0xff]  }
 0x136   :  { %v3302_v8 = vld [vmem:[#allocation8 + $0x34c] ss:$16 sps:$4 sm:$0xff]  }
 0x138   :  { %2048 = vmatpush2.bf16.msra.mxu0 %v3171_v59  ;;  %2091 = vmatpush2.bf16.msra.mxu1 %v3174_v60  ;;  %v3236_v59 = vld [vmem:[#allocation8 + $0x2ac] ss:$16 sps:$4 sm:$0xff]   ;;  %v3231_v60 = vld [vmem:[#allocation8 + $0xa8] ss:$16 sps:$4 sm:$0xff]  }
 0x139   :  { %2049 = vmatprep.subr.bf16.mxu0 %v3179_v61  ;;  %2092 = vmatprep.subr.bf16.mxu1 %v3182_v62  ;;  %v3234_v61 = vld [vmem:[#allocation8 + $0x2a8] ss:$16 sps:$4 sm:$0xff]   ;;  %v3239_v62 = vld [vmem:[#allocation8 + $0x8c] ss:$16 sps:$4 sm:$0xff]  }
 0x13c   :  { %2050 = vmatpush2.bf16.msra.mxu0 %v3177_v63  ;;  %2093 = vmatpush2.bf16.msra.mxu1 %v3180_v1  ;;  %v3242_v63 = vld [vmem:[#allocation8 + $0x28c] ss:$16 sps:$4 sm:$0xff]   ;;  %v3237_v1 = vld [vmem:[#allocation8 + $0x88] ss:$16 sps:$4 sm:$0xff]  }
 0x13d   :  { %2051 = vmatprep.subr.bf16.mxu0 %v3185_v2  ;;  %2094 = vmatprep.subr.bf16.mxu1 %v3188_v3  ;;  %v3245_v2 = vld [vmem:[#allocation8 + $0x6c] ss:$16 sps:$4 sm:$0xff]  }
 0x13e   :  { %v3248_v3 = vld [vmem:[#allocation8 + $0x26c] ss:$16 sps:$4 sm:$0xff]  }
 0x140   :  { %2052 = vmatpush2.bf16.msra.mxu0 %v3183_v6  ;;  %2095 = vmatpush2.bf16.msra.mxu1 %v3186_v7  ;;  %v3246_v6 = vld [vmem:[#allocation8 + $0x268] ss:$16 sps:$4 sm:$0xff]   ;;  %v3251_v7 = vld [vmem:[#allocation8 + $0x4c] ss:$16 sps:$4 sm:$0xff]  }
 0x141   :  { %2053 = vmatprep.subr.bf16.mxu0 %v3191_v9  ;;  %2096 = vmatprep.subr.bf16.mxu1 %v3194_v11  ;;  %v3254_v9 = vld [vmem:[#allocation8 + $0x24c] ss:$16 sps:$4 sm:$0xff]   ;;  %v3249_v11 = vld [vmem:[#allocation8 + $0x48] ss:$16 sps:$4 sm:$0xff]  }
 0x144   :  { %2054 = vmatpush2.bf16.msra.mxu0 %v3189_v13  ;;  %2097 = vmatpush2.bf16.msra.mxu1 %v3192_v14  ;;  %v3252_v13 = vld [vmem:[#allocation8 + $0x248] ss:$16 sps:$4 sm:$0xff]   ;;  %v3257_v14 = vld [vmem:[#allocation8 + $0x2c] ss:$16 sps:$4 sm:$0xff]  }
 0x145   :  { %2055 = vmatprep.subr.bf16.mxu0 %v3197_v15  ;;  %2098 = vmatprep.subr.bf16.mxu1 %v3200_v16  ;;  %v3260_v15 = vld [vmem:[#allocation8 + $0x22c] ss:$16 sps:$4 sm:$0xff]   ;;  %v3255_v16 = vld [vmem:[#allocation8 + $0x28] ss:$16 sps:$4 sm:$0xff]  }
 0x148   :  { %2056 = vmatpush2.bf16.msra.mxu0 %v3195_v17  ;;  %2099 = vmatpush2.bf16.msra.mxu1 %v3198_v19  ;;  %v3258_v17 = vld [vmem:[#allocation8 + $0x228] ss:$16 sps:$4 sm:$0xff]   ;;  %v3266_v19 = vld [vmem:[#allocation8 + $0x20c] ss:$16 sps:$4 sm:$0xff]  }
 0x149   :  { %2057 = vmatprep.subr.bf16.mxu0 %v3203_v20  ;;  %2100 = vmatprep.subr.bf16.mxu1 %v3206_v22  ;;  %v3261_v20 = vld [vmem:[#allocation8 + $0x8] ss:$16 sps:$4 sm:$0xff]   ;;  %v3269_v22 = vld [vmem:[#allocation8 + $0x1ec] ss:$16 sps:$4 sm:$0xff]  }
 0x14c   :  { %2058 = vmatpush2.bf16.msra.mxu0 %v3201_v29  ;;  %2101 = vmatpush2.bf16.msra.mxu1 %v3204_v31  ;;  %v3272_v29 = vld [vmem:[#allocation8 + $0x3ec] ss:$16 sps:$4 sm:$0xff]   ;;  %v3270_v31 = vld [vmem:[#allocation8 + $0x3e8] ss:$16 sps:$4 sm:$0xff]  }
 0x14d   :  { %2059 = vmatprep.subr.bf16.mxu0 %v3209_v33  ;;  %2102 = vmatprep.subr.bf16.mxu1 %v3212_v36  ;;  %v3275_v33 = vld [vmem:[#allocation8 + $0x1cc] ss:$16 sps:$4 sm:$0xff]   ;;  %v3273_v36 = vld [vmem:[#allocation8 + $0x1c8] ss:$16 sps:$4 sm:$0xff]  }
 0x150   :  { %2060 = vmatpush2.bf16.msra.mxu0 %v3207_v37  ;;  %2103 = vmatpush2.bf16.msra.mxu1 %v3210_v40  ;;  %v3276_v37 = vld [vmem:[#allocation8 + $0x3c8] ss:$16 sps:$4 sm:$0xff]  }
 0x151   :  { %2061 = vmatprep.subr.bf16.mxu0 %v3215_v41  ;;  %2104 = vmatprep.subr.bf16.mxu1 %v3218_v44  ;;  %v3279_v40 = vld [vmem:[#allocation8 + $0x1a8] ss:$16 sps:$4 sm:$0xff]  }
 0x152   :  { %v3282_v41 = vld [vmem:[#allocation8 + $0x3a8] ss:$16 sps:$4 sm:$0xff]  }
 0x153   :  { %v3285_v44 = vld [vmem:[#allocation8 + $0x188] ss:$16 sps:$4 sm:$0xff]  }
 0x154   :  { %2062 = vmatpush2.bf16.msra.mxu0 %v3213_v27  ;;  %2105 = vmatpush2.bf16.msra.mxu1 %v3216_v47  ;;  %v3288_v27 = vld [vmem:[#allocation8 + $0x388] ss:$16 sps:$4 sm:$0xff]  }
 0x155   :  { %2117 = vmatprep.subr.bf16.mxu0 %v3221_v53  ;;  %2160 = vmatprep.subr.bf16.mxu1 %v3224_v49  ;;  %v3291_v47 = vld [vmem:[#allocation8 + $0x168] ss:$16 sps:$4 sm:$0xff]  }
 0x156   :  { %v3294_v53 = vld [vmem:[#allocation8 + $0x368] ss:$16 sps:$4 sm:$0xff]  }
 0x157   :  { %2064 = vmatmul.mubr.bf16.vlgmr.msra.gmra.mxu0 %v3706_v51  ;;  %2107 = vmatmul.mubr.bf16.vlgmr.msra.gmra.mxu1 %v3708_v12  ;;  %v3297_v49 = vld [vmem:[#allocation8 + $0x148] ss:$16 sps:$4 sm:$0xff]  }
 0x158   :  { %2118 = vmatpush1.bf16.msra.mxu0 %v3219_v50  ;;  %2149 = vmatprep.mubr.bf16.mxu0 %v3676_v0  ;;  %v3240_v0 = vld [vmem:[#allocation8 + $0x288] ss:$16 sps:$4 sm:$0xff]  }
 0x159   :  { %2161 = vmatpush1.bf16.msra.mxu1 %v3222_v58  ;;  %2192 = vmatprep.mubr.bf16.mxu1 %v3680_v5  ;;  %v3243_v5 = vld [vmem:[#allocation8 + $0x68] ss:$16 sps:$4 sm:$0xff]   ;;  %v3305_v58 = vld [vmem:[#allocation8 + $0x12c] ss:$16 sps:$4 sm:$0xff]  }
 0x15a   :  { %2119 = vmatprep.subr.bf16.mxu0 %v3227_v52  ;;  %2162 = vmatprep.subr.bf16.mxu1 %v3230_v54  ;;  %v3300_v50 = vld [vmem:[#allocation8 + $0x348] ss:$16 sps:$4 sm:$0xff]   ;;  %v3308_v52 = vld [vmem:[#allocation8 + $0x32c] ss:$16 sps:$4 sm:$0xff]  }
 0x15b   :  { %v3303_v54 = vld [vmem:[#allocation8 + $0x128] ss:$16 sps:$4 sm:$0xff]  }
 0x15c   :  { %2120 = vmatpush1.bf16.msra.mxu0 %v3225_v55  ;;  %v3306_v55 = vld [vmem:[#allocation8 + $0x328] ss:$16 sps:$4 sm:$0xff]  }
 0x15d   :  { %2163 = vmatpush1.bf16.msra.mxu1 %v3228_v56  ;;  %2121 = vmatprep.subr.bf16.mxu0 %v3233_v57  ;;  %v3311_v56 = vld [vmem:[#allocation8 + $0x10c] ss:$16 sps:$4 sm:$0xff]  }
 0x15e   :  { %2164 = vmatprep.subr.bf16.mxu1 %v3236_v59  ;;  %v3314_v57 = vld [vmem:[#allocation8 + $0x30c] ss:$16 sps:$4 sm:$0xff]   ;;  %v3309_v59 = vld [vmem:[#allocation8 + $0x108] ss:$16 sps:$4 sm:$0xff]  }
 0x160   :  { %2122 = vmatpush1.bf16.msra.mxu0 %v3231_v60  ;;  %v3312_v60 = vld [vmem:[#allocation8 + $0x308] ss:$16 sps:$4 sm:$0xff]  }
 0x161   :  { %2165 = vmatpush1.bf16.msra.mxu1 %v3234_v61  ;;  %2123 = vmatprep.subr.bf16.mxu0 %v3239_v62  ;;  %v3317_v61 = vld [vmem:[#allocation8 + $0x4ec] ss:$16 sps:$4 sm:$0xff]  }
 0x162   :  { %2166 = vmatprep.subr.bf16.mxu1 %v3242_v63  ;;  %v3320_v62 = vld [vmem:[#allocation8 + $0x6ec] ss:$16 sps:$4 sm:$0xff]   ;;  %v3315_v63 = vld [vmem:[#allocation8 + $0x4e8] ss:$16 sps:$4 sm:$0xff]  }
 0x164   :  { %2124 = vmatpush1.bf16.msra.mxu0 %v3237_v1  ;;  %v3318_v1 = vld [vmem:[#allocation8 + $0x6e8] ss:$16 sps:$4 sm:$0xff]  }
 0x165   :  { %2167 = vmatpush1.bf16.msra.mxu1 %v3240_v0  ;;  %2125 = vmatprep.subr.bf16.mxu0 %v3245_v2  ;;  %v3323_v0 = vld [vmem:[#allocation8 + $0x4cc] ss:$16 sps:$4 sm:$0xff]  }
 0x166   :  { %2168 = vmatprep.subr.bf16.mxu1 %v3248_v3  ;;  %v3326_v2 = vld [vmem:[#allocation8 + $0x6cc] ss:$16 sps:$4 sm:$0xff]   ;;  %v3321_v3 = vld [vmem:[#allocation8 + $0x4c8] ss:$16 sps:$4 sm:$0xff]  }
 0x168   :  { %2126 = vmatpush1.bf16.msra.mxu0 %v3243_v5  ;;  %v3324_v5 = vld [vmem:[#allocation8 + $0x6c8] ss:$16 sps:$4 sm:$0xff]  }
 0x169   :  { %2169 = vmatpush1.bf16.msra.mxu1 %v3246_v6  ;;  %2127 = vmatprep.subr.bf16.mxu0 %v3251_v7  ;;  %v3329_v6 = vld [vmem:[#allocation8 + $0x4ac] ss:$16 sps:$4 sm:$0xff]  }
 0x16a   :  { %2170 = vmatprep.subr.bf16.mxu1 %v3254_v9  ;;  %v3332_v7 = vld [vmem:[#allocation8 + $0x6ac] ss:$16 sps:$4 sm:$0xff]   ;;  %v3327_v9 = vld [vmem:[#allocation8 + $0x4a8] ss:$16 sps:$4 sm:$0xff]  }
 0x16c   :  { %2128 = vmatpush1.bf16.msra.mxu0 %v3249_v11  ;;  %v3335_v11 = vld [vmem:[#allocation8 + $0x48c] ss:$16 sps:$4 sm:$0xff]  }
 0x16d   :  { %2171 = vmatpush1.bf16.msra.mxu1 %v3252_v13  ;;  %2129 = vmatprep.subr.bf16.mxu0 %v3257_v14  ;;  %v3333_v13 = vld [vmem:[#allocation8 + $0x488] ss:$16 sps:$4 sm:$0xff]   ;;  %v3341_v14 = vld [vmem:[#allocation8 + $0x46c] ss:$16 sps:$4 sm:$0xff]  }
 0x16e   :  { %2172 = vmatprep.subr.bf16.mxu1 %v3260_v15  ;;  %v3344_v15 = vld [vmem:[#allocation8 + $0x66c] ss:$16 sps:$4 sm:$0xff]  }
 0x170   :  { %2130 = vmatpush1.bf16.msra.mxu0 %v3255_v16  ;;  %v3342_v16 = vld [vmem:[#allocation8 + $0x668] ss:$16 sps:$4 sm:$0xff]  }
 0x171   :  { %2173 = vmatpush1.bf16.msra.mxu1 %v3258_v17  ;;  %2131 = vmatprep.subr.bf16.mxu0 %v3263_v18  ;;  %v3347_v17 = vld [vmem:[#allocation8 + $0x44c] ss:$16 sps:$4 sm:$0xff]  }
 0x172   :  { %2174 = vmatprep.subr.bf16.mxu1 %v3266_v19  ;;  %v3350_v18 = vld [vmem:[#allocation8 + $0x64c] ss:$16 sps:$4 sm:$0xff]   ;;  %v3345_v19 = vld [vmem:[#allocation8 + $0x448] ss:$16 sps:$4 sm:$0xff]  }
 0x174   :  { %2132 = vmatpush1.bf16.msra.mxu0 %v3261_v20  ;;  %v3348_v20 = vld [vmem:[#allocation8 + $0x648] ss:$16 sps:$4 sm:$0xff]  }
 0x175   :  { %2175 = vmatpush1.bf16.msra.mxu1 %v3264_v21  ;;  %2133 = vmatprep.subr.bf16.mxu0 %v3269_v22  ;;  %v3353_v21 = vld [vmem:[#allocation8 + $0x42c] ss:$16 sps:$4 sm:$0xff]  }
 0x176   :  { %2176 = vmatprep.subr.bf16.mxu1 %v3272_v29  ;;  %v3356_v22 = vld [vmem:[#allocation8 + $0x62c] ss:$16 sps:$4 sm:$0xff]   ;;  %v3351_v29 = vld [vmem:[#allocation8 + $0x428] ss:$16 sps:$4 sm:$0xff]  }
 0x178   :  { %2134 = vmatpush2.bf16.msra.mxu0 %v3267_v30  ;;  %v3354_v30 = vld [vmem:[#allocation8 + $0x628] ss:$16 sps:$4 sm:$0xff]  }
 0x179   :  { %2177 = vmatpush2.bf16.msra.mxu1 %v3270_v31  ;;  %2135 = vmatprep.subr.bf16.mxu0 %v3275_v33  ;;  %v3359_v31 = vld [vmem:[#allocation8 + $0x40c] ss:$16 sps:$4 sm:$0xff]  }
 0x17a   :  { %2178 = vmatprep.subr.bf16.mxu1 %v3278_v34  ;;  %v3362_v33 = vld [vmem:[#allocation8 + $0x60c] ss:$16 sps:$4 sm:$0xff]   ;;  %v3357_v34 = vld [vmem:[#allocation8 + $0x408] ss:$16 sps:$4 sm:$0xff]  }
 0x17c   :  { %2136 = vmatpush2.bf16.msra.mxu0 %v3273_v36  ;;  %v3360_v36 = vld [vmem:[#allocation8 + $0x608] ss:$16 sps:$4 sm:$0xff]  }
 0x17d   :  { %2179 = vmatpush2.bf16.msra.mxu1 %v3276_v37  ;;  %2137 = vmatprep.subr.bf16.mxu0 %v3281_v38  ;;  %v3365_v37 = vld [vmem:[#allocation8 + $0x5ec] ss:$16 sps:$4 sm:$0xff]  }
 0x17e   :  { %2180 = vmatprep.subr.bf16.mxu1 %v3284_v39  ;;  %v3368_v38 = vld [vmem:[#allocation8 + $0x7ec] ss:$16 sps:$4 sm:$0xff]   ;;  %v3363_v39 = vld [vmem:[#allocation8 + $0x5e8] ss:$16 sps:$4 sm:$0xff]  }
 0x180   :  { %2138 = vmatpush2.bf16.msra.mxu0 %v3279_v40  ;;  %v3366_v40 = vld [vmem:[#allocation8 + $0x7e8] ss:$16 sps:$4 sm:$0xff]  }
 0x181   :  { %2181 = vmatpush2.bf16.msra.mxu1 %v3282_v41  ;;  %2139 = vmatprep.subr.bf16.mxu0 %v3287_v42  ;;  %v3371_v41 = vld [vmem:[#allocation8 + $0x5cc] ss:$16 sps:$4 sm:$0xff]  }
 0x182   :  { %2182 = vmatprep.subr.bf16.mxu1 %v3290_v43  ;;  %v3374_v42 = vld [vmem:[#allocation8 + $0x7cc] ss:$16 sps:$4 sm:$0xff]   ;;  %v3369_v43 = vld [vmem:[#allocation8 + $0x5c8] ss:$16 sps:$4 sm:$0xff]  }
 0x184   :  { %2140 = vmatpush2.bf16.msra.mxu0 %v3285_v44  ;;  %v3372_v44 = vld [vmem:[#allocation8 + $0x7c8] ss:$16 sps:$4 sm:$0xff]  }
 0x185   :  { %2183 = vmatpush2.bf16.msra.mxu1 %v3288_v27  ;;  %2141 = vmatprep.subr.bf16.mxu0 %v3293_v45  ;;  %v3377_v27 = vld [vmem:[#allocation8 + $0x5ac] ss:$16 sps:$4 sm:$0xff]  }
 0x186   :  { %2184 = vmatprep.subr.bf16.mxu1 %v3296_v46  ;;  %v3380_v45 = vld [vmem:[#allocation8 + $0x7ac] ss:$16 sps:$4 sm:$0xff]   ;;  %v3375_v46 = vld [vmem:[#allocation8 + $0x5a8] ss:$16 sps:$4 sm:$0xff]  }
 0x188   :  { %2142 = vmatpush2.bf16.msra.mxu0 %v3291_v47  ;;  %v3378_v47 = vld [vmem:[#allocation8 + $0x7a8] ss:$16 sps:$4 sm:$0xff]  }
 0x189   :  { %2185 = vmatpush2.bf16.msra.mxu1 %v3294_v53  ;;  %2143 = vmatprep.subr.bf16.mxu0 %v3299_v48  ;;  %v3383_v53 = vld [vmem:[#allocation8 + $0x58c] ss:$16 sps:$4 sm:$0xff]  }
 0x18a   :  { %2186 = vmatprep.subr.bf16.mxu1 %v3302_v8  ;;  %v3386_v48 = vld [vmem:[#allocation8 + $0x78c] ss:$16 sps:$4 sm:$0xff]   ;;  %v3381_v8 = vld [vmem:[#allocation8 + $0x588] ss:$16 sps:$4 sm:$0xff]  }
 0x18c   :  { %2144 = vmatpush2.bf16.msra.mxu0 %v3297_v49  ;;  %v3384_v49 = vld [vmem:[#allocation8 + $0x788] ss:$16 sps:$4 sm:$0xff]  }
 0x18d   :  { %2187 = vmatpush2.bf16.msra.mxu1 %v3300_v50  ;;  %2145 = vmatprep.subr.bf16.mxu0 %v3305_v58  ;;  %v3389_v50 = vld [vmem:[#allocation8 + $0x56c] ss:$16 sps:$4 sm:$0xff]  }
 0x18e   :  { %2188 = vmatprep.subr.bf16.mxu1 %v3308_v52  ;;  %v3392_v58 = vld [vmem:[#allocation8 + $0x76c] ss:$16 sps:$4 sm:$0xff]   ;;  %v3387_v52 = vld [vmem:[#allocation8 + $0x568] ss:$16 sps:$4 sm:$0xff]  }
 0x190   :  { %2146 = vmatpush2.bf16.msra.mxu0 %v3303_v54  ;;  %v3390_v54 = vld [vmem:[#allocation8 + $0x768] ss:$16 sps:$4 sm:$0xff]  }
 0x191   :  { %2189 = vmatpush2.bf16.msra.mxu1 %v3306_v55  ;;  %2147 = vmatprep.subr.bf16.mxu0 %v3311_v56  ;;  %v3395_v55 = vld [vmem:[#allocation8 + $0x54c] ss:$16 sps:$4 sm:$0xff]  }
 0x192   :  { %2190 = vmatprep.subr.bf16.mxu1 %v3314_v57  ;;  %v3398_v56 = vld [vmem:[#allocation8 + $0x74c] ss:$16 sps:$4 sm:$0xff]   ;;  %v3393_v57 = vld [vmem:[#allocation8 + $0x548] ss:$16 sps:$4 sm:$0xff]  }
 0x194   :  { %2148 = vmatpush2.bf16.msra.mxu0 %v3309_v59  ;;  %v3396_v59 = vld [vmem:[#allocation8 + $0x748] ss:$16 sps:$4 sm:$0xff]  }
 0x195   :  { %2191 = vmatpush2.bf16.msra.mxu1 %v3312_v60  ;;  %2203 = vmatprep.subr.bf16.mxu0 %v3317_v61  ;;  %v3401_v60 = vld [vmem:[#allocation8 + $0x52c] ss:$16 sps:$4 sm:$0xff]  }
 0x196   :  { %2246 = vmatprep.subr.bf16.mxu1 %v3320_v62  ;;  %v3404_v61 = vld [vmem:[#allocation8 + $0x72c] ss:$16 sps:$4 sm:$0xff]   ;;  %v3399_v62 = vld [vmem:[#allocation8 + $0x528] ss:$16 sps:$4 sm:$0xff]  }
 0x197   :  { %2150 = vmatmul.mubr.bf16.vlgmr.msra.gmra.mxu0 %v3678_v4  ;;  %v3330_v4 = vld [vmem:[#allocation8 + $0x6a8] ss:$16 sps:$4 sm:$0xff]  }
 0x198   :  { %2193 = vmatmul.mubr.bf16.vlgmr.msra.gmra.mxu1 %v3684_v10  ;;  %2204 = vmatpush1.bf16.msra.mxu0 %v3315_v63  ;;  %v3338_v10 = vld [vmem:[#allocation8 + $0x68c] ss:$16 sps:$4 sm:$0xff]   ;;  %v3402_v63 = vld [vmem:[#allocation8 + $0x728] ss:$16 sps:$4 sm:$0xff]  }
 0x199   :  { %2235 = vmatprep.mubr.bf16.mxu0 %v3692_v32  ;;  %2247 = vmatpush1.bf16.msra.mxu1 %v3318_v1  ;;  %v3336_v32 = vld [vmem:[#allocation8 + $0x688] ss:$16 sps:$4 sm:$0xff]   ;;  %v3407_v1 = vld [vmem:[#allocation8 + $0x50c] ss:$16 sps:$4 sm:$0xff]  }
 0x19a   :  { %2278 = vmatprep.mubr.bf16.mxu1 %v3694_v35  ;;  %2205 = vmatprep.subr.bf16.mxu0 %v3323_v0  ;;  %v3339_v35 = vld [vmem:[#allocation8 + $0x468] ss:$16 sps:$4 sm:$0xff]   ;;  %v3410_v0 = vld [vmem:[#allocation8 + $0x70c] ss:$16 sps:$4 sm:$0xff]  }
 0x19b   :  { %2248 = vmatprep.subr.bf16.mxu1 %v3326_v2  ;;  %v3405_v2 = vld [vmem:[#allocation8 + $0x508] ss:$16 sps:$4 sm:$0xff]  }
 0x19c   :  { %2206 = vmatpush1.bf16.msra.mxu0 %v3321_v3  ;;  %v3408_v3 = vld [vmem:[#allocation8 + $0x708] ss:$16 sps:$4 sm:$0xff]  }
 0x19d   :  { %2249 = vmatpush1.bf16.msra.mxu1 %v3324_v5  ;;  %2207 = vmatprep.subr.bf16.mxu0 %v3329_v6  ;;  %v3411_v5 = vld [vmem:[#allocation10 + $0x78] sm:$0xff]  }
 0x19e   :  { %2250 = vmatprep.subr.bf16.mxu1 %v3332_v7  ;;  %v3412_v6 = vld [vmem:[#allocation10 + $0x38] sm:$0xff]   ;;  %v3413_v7 = vld [vmem:[#allocation10 + $0x70] sm:$0xff]  }
 0x1a0   :  { %2208 = vmatpush1.bf16.msra.mxu0 %v3327_v9  ;;  %v3414_v9 = vld [vmem:[#allocation10 + $0x30] sm:$0xff]  }
 0x1a1   :  { %2251 = vmatpush1.bf16.msra.mxu1 %v3330_v4  ;;  %2209 = vmatprep.subr.bf16.mxu0 %v3335_v11  ;;  %v3415_v4 = vld [vmem:[#allocation10 + $0x68] sm:$0xff]  }
 0x1a2   :  { %2252 = vmatprep.subr.bf16.mxu1 %v3338_v10  ;;  %v3416_v11 = vld [vmem:[#allocation10 + $0x28] sm:$0xff]   ;;  %v3417_v10 = vld [vmem:[#allocation10 + $0x60] sm:$0xff]  }
 0x1a4   :  { %2210 = vmatpush1.bf16.msra.mxu0 %v3333_v13  ;;  %v3418_v13 = vld [vmem:[#allocation10 + $0x20] sm:$0xff]  }
 0x1a5   :  { %2253 = vmatpush1.bf16.msra.mxu1 %v3336_v32  ;;  %2211 = vmatprep.subr.bf16.mxu0 %v3341_v14  ;;  %v3427_v32 = vld [vmem:[#allocation10 + $0xf8] sm:$0xff]  }
 0x1a6   :  { %2254 = vmatprep.subr.bf16.mxu1 %v3344_v15  ;;  %v3428_v14 = vld [vmem:[#allocation10 + $0xb8] sm:$0xff]   ;;  %v3429_v15 = vld [vmem:[#allocation10 + $0xf0] sm:$0xff]  }
 0x1a8   :  { %2212 = vmatpush1.bf16.msra.mxu0 %v3339_v35  ;;  %v3419_v35 = vld [vmem:[#allocation10 + $0x58] sm:$0xff]  }
 0x1a9   :  { %2255 = vmatpush1.bf16.msra.mxu1 %v3342_v16  ;;  %2213 = vmatprep.subr.bf16.mxu0 %v3347_v17  ;;  %v3431_v16 = vld [vmem:[#allocation10 + $0xe8] sm:$0xff]   ;;  %v3421_v17 = vld [vmem:[#allocation10 + $0x50] sm:$0xff]  }
 0x1aa   :  { %2256 = vmatprep.subr.bf16.mxu1 %v3350_v18  ;;  %v3432_v18 = vld [vmem:[#allocation10 + $0xa8] sm:$0xff]  }
 0x1ac   :  { %2214 = vmatpush1.bf16.msra.mxu0 %v3345_v19  ;;  %v3422_v19 = vld [vmem:[#allocation10 + $0x10] sm:$0xff]  }
 0x1ad   :  { %2257 = vmatpush1.bf16.msra.mxu1 %v3348_v20  ;;  %2215 = vmatprep.subr.bf16.mxu0 %v3353_v21  ;;  %v3433_v20 = vld [vmem:[#allocation10 + $0xe0] sm:$0xff]   ;;  %v3423_v21 = vld [vmem:[#allocation10 + $0x48] sm:$0xff]  }
 0x1ae   :  { %2258 = vmatprep.subr.bf16.mxu1 %v3356_v22  ;;  %v3434_v22 = vld [vmem:[#allocation10 + $0xa0] sm:$0xff]  }
 0x1b0   :  { %2216 = vmatpush1.bf16.msra.mxu0 %v3351_v29  ;;  %v3424_v29 = vld [vmem:[#allocation10 + $0x8] sm:$0xff]  }
 0x1b1   :  { %2259 = vmatpush1.bf16.msra.mxu1 %v3354_v30  ;;  %2217 = vmatprep.subr.bf16.mxu0 %v3359_v31  ;;  %v3425_v30 = vld [vmem:[#allocation10 + $0x40] sm:$0xff]  }
 0x1b2   :  { %2260 = vmatprep.subr.bf16.mxu1 %v3362_v33  ;;  %v3426_v31 = vld [vmem:[#allocation10] sm:$0xff]  }
 0x1b4   :  { %2218 = vmatpush1.bf16.msra.mxu0 %v3357_v34 }
 0x1b5   :  { %2261 = vmatpush1.bf16.msra.mxu1 %v3360_v36  ;;  %2219 = vmatprep.subr.bf16.mxu0 %v3365_v37  ;;  %v643_v37 = vld [vmem:[%s3744_s4] sm:$0xf] }
 0x1b6   :  { %2262 = vmatprep.subr.bf16.mxu1 %v3368_v38 }
 0x1b8   :  { %2220 = vmatpush2.bf16.msra.mxu0 %v3363_v39  ;;  %v652_v39 = vrot.slane %v643_v37, %v113_v24 }
 0x1b9   :  { %2263 = vmatpush2.bf16.msra.mxu1 %v3366_v40  ;;  %2221 = vmatprep.subr.bf16.mxu0 %v3371_v41  ;;  %v648_v40 = vrot.slane %v643_v37, %v109_v25 }
 0x1ba   :  { %2264 = vmatprep.subr.bf16.mxu1 %v3374_v42 }
 0x1bc   :  { %2222 = vmatpush2.bf16.msra.mxu0 %v3369_v43 }
 0x1bd   :  { %2265 = vmatpush2.bf16.msra.mxu1 %v3372_v44  ;;  %2223 = vmatprep.subr.bf16.mxu0 %v3377_v27 }
 0x1be   :  { %2266 = vmatprep.subr.bf16.mxu1 %v3380_v45 }
 0x1c0   :  { %2224 = vmatpush2.bf16.msra.mxu0 %v3375_v46 }
 0x1c1   :  { %2267 = vmatpush2.bf16.msra.mxu1 %v3378_v47  ;;  %2225 = vmatprep.subr.bf16.mxu0 %v3383_v53  ;;  %v3435_v53 = vld [vmem:[#allocation10 + $0xd8] sm:$0xff]  }
 0x1c2   :  { %2268 = vmatprep.subr.bf16.mxu1 %v3386_v48 }
 0x1c4   :  { %2226 = vmatpush2.bf16.msra.mxu0 %v3381_v8 }
 0x1c5   :  { %2269 = vmatpush2.bf16.msra.mxu1 %v3384_v49  ;;  %2227 = vmatprep.subr.bf16.mxu0 %v3389_v50  ;;  %v3436_v50 = vld [vmem:[#allocation10 + $0x98] sm:$0xff]  }
 0x1c6   :  { %2270 = vmatprep.subr.bf16.mxu1 %v3392_v58 }
 0x1c8   :  { %2228 = vmatpush2.bf16.msra.mxu0 %v3387_v52 }
 0x1c9   :  { %2271 = vmatpush2.bf16.msra.mxu1 %v3390_v54  ;;  %2229 = vmatprep.subr.bf16.mxu0 %v3395_v55 }
 0x1ca   :  { %2272 = vmatprep.subr.bf16.mxu1 %v3398_v56 }
 0x1cc   :  { %2230 = vmatpush2.bf16.msra.mxu0 %v3393_v57  ;;  %v3437_v57 = vld [vmem:[#allocation10 + $0xd0] sm:$0xff]  }
 0x1cd   :  { %2273 = vmatpush2.bf16.msra.mxu1 %v3396_v59  ;;  %2231 = vmatprep.subr.bf16.mxu0 %v3401_v60 }
 0x1ce   :  { %2274 = vmatprep.subr.bf16.mxu1 %v3404_v61 }
 0x1d0   :  { %2232 = vmatpush2.bf16.msra.mxu0 %v3399_v62  ;;  %v3438_v62 = vld [vmem:[#allocation10 + $0x90] sm:$0xff]  }
 0x1d1   :  { %2275 = vmatpush2.bf16.msra.mxu1 %v3402_v63  ;;  %2233 = vmatprep.subr.bf16.mxu0 %v3407_v1 }
 0x1d2   :  { %2276 = vmatprep.subr.bf16.mxu1 %v3410_v0 }
 0x1d4   :  { %2234 = vmatpush2.bf16.msra.mxu0 %v3405_v2 }
 0x1d5   :  { %2277 = vmatpush2.bf16.msra.mxu1 %v3408_v3  ;;  %2968 = vmatprep.subr.bf16.mxu0 %v3411_v5 }
 0x1d6   :  { %2990 = vmatprep.subr.bf16.mxu1 %v3427_v32  ;;  %v3441_v32 = vld [vmem:[#allocation10 + $0xc0] sm:$0xff]  }
 0x1d7   :  { %2236 = vmatmul.mubr.bf16.vlgmr.msra.gmra.mxu0 %v3706_v51  ;;  %v3430_v51 = vld [vmem:[#allocation10 + $0xb0] sm:$0xff]   ;;  %v1979_v33 = vpop.f32.mrf.mxu0  ;;  %v2022_v34 = vpop.f32.mrf.mxu1 }
 0x1d8   :  { %2279 = vmatmul.mubr.bf16.vlgmr.msra.gmra.mxu1 %v3708_v12  ;;  %2969 = vmatpush3.bf16.msra.mxu0 %v3412_v6  ;;  %v3420_v12 = vld [vmem:[#allocation10 + $0x18] sm:$0xff]   ;;  %v1980_v44 = vadd.f32 %v1979_v33, %v648_v40  ;;  %v3439_v6 = vld [vmem:[#allocation10 + $0xc8] sm:$0xff]  }
 0x1d9   :  { %2970 = vmatprep.subr.bf16.mxu0 %v3413_v7  ;;  %2991 = vmatpush3.bf16.msra.mxu1 %v3428_v14  ;;  %v1981_v36 = vpop.f32.mrf.mxu0  ;;  %v2024_v38 = vpop.f32.mrf.mxu1 }
 0x1da   :  { %2992 = vmatprep.subr.bf16.mxu1 %v3429_v15  ;;  %v1982_v43 = vadd.f32 %v1981_v36, %v652_v39  ;;  %v2023_v58 = vadd.f32 %v2022_v34, %v1980_v44  ;;  %v3442_v15 = vld [vmem:[#allocation10 + $0x80] sm:$0xff]  }
 0x1db   :  { %v1983_v41 = vpop.f32.mrf.mxu0  ;;  %v2026_v42 = vpop.f32.mrf.mxu1 }
 0x1dc   :  { %2971 = vmatpush3.bf16.msra.mxu0 %v3414_v9  ;;  %v1984_v45 = vadd.f32 %v1983_v41, %v648_v40  ;;  %v2025_v48 = vadd.f32 %v2024_v38, %v1982_v43  ;;  %v3440_v9 = vld [vmem:[#allocation10 + $0x88] sm:$0xff]  }
 0x1dd   :  { %2972 = vmatprep.subr.bf16.mxu0 %v3415_v4  ;;  %2993 = vmatpush3.bf16.msra.mxu1 %v3430_v51  ;;  %v1985_v27 = vpop.f32.mrf.mxu0  ;;  %v2028_v46 = vpop.f32.mrf.mxu1 }
 0x1de   :  { %2994 = vmatprep.subr.bf16.mxu1 %v3431_v16  ;;  %v1986_v8 = vadd.f32 %v1985_v27, %v652_v39  ;;  %v2027_v24 = vadd.f32 %v2026_v42, %v1984_v45 }
 0x1e0   :  { %2973 = vmatpush3.bf16.msra.mxu0 %v3416_v11  ;;  %v2029_v59 = vadd.f32 %v2028_v46, %v1986_v8 }
 0x1e1   :  { %2974 = vmatprep.subr.bf16.mxu0 %v3417_v10  ;;  %2995 = vmatpush3.bf16.msra.mxu1 %v3432_v18  ;;  %v660_v18 = vrot.slane %v643_v37, %v121_v26 }
 0x1e2   :  { %2996 = vmatprep.subr.bf16.mxu1 %v3433_v20 }
 0x1e4   :  { %2975 = vmatpush3.bf16.msra.mxu0 %v3418_v13 }
 0x1e5   :  { %2976 = vmatprep.subr.bf16.mxu0 %v3419_v35  ;;  %2997 = vmatpush3.bf16.msra.mxu1 %v3434_v22 }
 0x1e6   :  { %2998 = vmatprep.subr.bf16.mxu1 %v3435_v53 }
 0x1e8   :  { %2977 = vmatpush3.bf16.msra.mxu0 %v3420_v12 }
 0x1e9   :  { %2978 = vmatprep.subr.bf16.mxu0 %v3421_v17  ;;  %2999 = vmatpush3.bf16.msra.mxu1 %v3436_v50 }
 0x1ea   :  { %3000 = vmatprep.subr.bf16.mxu1 %v3437_v57 }
 0x1ec   :  { %2979 = vmatpush3.bf16.msra.mxu0 %v3422_v19  ;;  %v656_v19 = vrot.slane %v643_v37, %v117_v28 }
 0x1ed   :  { %2980 = vmatprep.subr.bf16.mxu0 %v3423_v21  ;;  %3001 = vmatpush3.bf16.msra.mxu1 %v3438_v62 }
 0x1ee   :  { %3002 = vmatprep.subr.bf16.mxu1 %v3439_v6 }
 0x1f0   :  { %2981 = vmatpush3.bf16.msra.mxu0 %v3424_v29 }
 0x1f1   :  { %2982 = vmatprep.subr.bf16.mxu0 %v3425_v30  ;;  %3003 = vmatpush3.bf16.msra.mxu1 %v3440_v9 }
 0x1f2   :  { %3004 = vmatprep.subr.bf16.mxu1 %v3441_v32 }
 0x1f4   :  { %2983 = vmatpush3.bf16.msra.mxu0 %v3426_v31 }
 0x1f5   :  { %3005 = vmatpush3.bf16.msra.mxu1 %v3442_v15 }
 0x217   :  { %v2065_v47 = vpop.f32.mrf.mxu0  ;;  %v2108_v49 = vpop.f32.mrf.mxu1 }
 0x218   :  { %v2066_v25 = vadd.f32 %v2065_v47, %v2023_v58 }
 0x219   :  { %v2067_v52 = vpop.f32.mrf.mxu0  ;;  %v2110_v55 = vpop.f32.mrf.mxu1 }
 0x21a   :  { %v2068_v54 = vadd.f32 %v2067_v52, %v2025_v48  ;;  %v2109_v3 = vadd.f32 %v2108_v49, %v2066_v25 }
 0x21b   :  { %v2069_v56 = vpop.f32.mrf.mxu0  ;;  %v2112_v61 = vpop.f32.mrf.mxu1 }
 0x21c   :  { %v2070_v60 = vadd.f32 %v2069_v56, %v2027_v24  ;;  %v2111_v1 = vadd.f32 %v2110_v55, %v2068_v54  ;;  %v2289_v13 = vmax.f32 %v2109_v3, 0.0 }
 0x21d   :  { %v2071_v63 = vpop.f32.mrf.mxu0  ;;  %v2114_v5 = vpop.f32.mrf.mxu1 }
 0x21e   :  { %v2113_v0 = vadd.f32 %v2112_v61, %v2070_v60  ;;  %v2072_v2 = vadd.f32 %v2071_v63, %v2029_v59  ;;  %v2290_v11 = vmax.f32 %v2111_v1, 0.0  ;;  %v2935_v60 = vld [vmem:[%s3746_s6] ss:$0 sm:$0xff] }
 0x220   :  { %v2115_v7 = vadd.f32 %v2114_v5, %v2072_v2  ;;  %v2293_v4 = vmax.f32 %v2113_v0, 0.0 }
 0x222   :  { %v2294_v10 = vmax.f32 %v2115_v7, 0.0  ;;  %v2297_v35 = vpack.c.bf16 %v2293_v4, %v2289_v13 }
 0x224   :  { %v2298_v14 = vpack.c.bf16 %v2294_v10, %v2290_v11 }
 0x226   :  { %2596 = vmatprep.mubr.bf16.mxu0 %v2298_v14 }
 0x227   :  { %2597 = vmatmul.mubr.bf16.vlgmr.msra.gmra.mxu0 %v2297_v35 }
 0x257   :  { %v2151_v51 = vpop.f32.mrf.mxu0 }
 0x258   :  { %v2194_v12 = vpop.f32.mrf.mxu1  ;;  %v2152_v29 = vadd.f32 %v2151_v51, %v656_v19 }
 0x259   :  { %v2153_v16 = vpop.f32.mrf.mxu0 }
 0x25a   :  { %v2196_v17 = vpop.f32.mrf.mxu1  ;;  %v2154_v22 = vadd.f32 %v2153_v16, %v660_v18  ;;  %v2195_v40 = vadd.f32 %v2194_v12, %v2152_v29 }
 0x25b   :  { %v2155_v20 = vpop.f32.mrf.mxu0 }
 0x25c   :  { %v2198_v21 = vpop.f32.mrf.mxu1  ;;  %v2156_v31 = vadd.f32 %v2155_v20, %v656_v19  ;;  %v2197_v36 = vadd.f32 %v2196_v17, %v2154_v22 }
 0x25d   :  { %v2157_v30 = vpop.f32.mrf.mxu0 }
 0x25e   :  { %v2200_v33 = vpop.f32.mrf.mxu1  ;;  %v2158_v38 = vadd.f32 %v2157_v30, %v660_v18  ;;  %v2199_v42 = vadd.f32 %v2198_v21, %v2156_v31 }
 0x260   :  { %v2201_v23 = vadd.f32 %v2200_v33, %v2158_v38 }
 0x297   :  { %v2237_v34 = vpop.f32.mrf.mxu0 }
 0x298   :  { %v2280_v39 = vpop.f32.mrf.mxu1  ;;  %v2238_v26 = vadd.f32 %v2237_v34, %v2195_v40 }
 0x299   :  { %v2239_v41 = vpop.f32.mrf.mxu0 }
 0x29a   :  { %v2240_v43 = vadd.f32 %v2239_v41, %v2197_v36  ;;  %v2282_v44 = vpop.f32.mrf.mxu1  ;;  %v2281_v48 = vadd.f32 %v2280_v39, %v2238_v26 }
 0x29b   :  { %v2241_v27 = vpop.f32.mrf.mxu0 }
 0x29c   :  { %v2242_v28 = vadd.f32 %v2241_v27, %v2199_v42  ;;  %v2284_v37 = vpop.f32.mrf.mxu1  ;;  %v2283_v46 = vadd.f32 %v2282_v44, %v2240_v43  ;;  %v2291_v24 = vmax.f32 %v2281_v48, 0.0 }
 0x29d   :  { %v2243_v45 = vpop.f32.mrf.mxu0 }
 0x29e   :  { %v2285_v47 = vadd.f32 %v2284_v37, %v2242_v28  ;;  %v2244_v53 = vadd.f32 %v2243_v45, %v2201_v23  ;;  %v2286_v8 = vpop.f32.mrf.mxu1  ;;  %v2292_v58 = vmax.f32 %v2283_v46, 0.0 }
 0x2a0   :  { %v2287_v49 = vadd.f32 %v2286_v8, %v2244_v53  ;;  %v2295_v50 = vmax.f32 %v2285_v47, 0.0 }
 0x2a2   :  { %v2296_v52 = vmax.f32 %v2287_v49, 0.0  ;;  %v2299_v55 = vpack.c.bf16 %v2295_v50, %v2291_v24 }
 0x2a4   :  { %v2300_v54 = vpack.c.bf16 %v2296_v52, %v2292_v58 }
 0x2a6   :  { %2637 = vmatprep.mubr.bf16.mxu1 %v2300_v54 }
 0x2a7   :  { %2638 = vmatmul.mubr.bf16.vlgmr.msra.gmra.mxu1 %v2299_v55 }
 0x2e7   :  { %v2984_v25 = vpop.f32.mrf.mxu0 }
 0x2e9   :  { %v2985_v56 = vpop.f32.mrf.mxu0 }
 0x2ea   :  { %v2986_v59 = vadd.f32 %v2985_v56, %v2984_v25 }
 0x2eb   :  { %v2987_v57 = vpop.f32.mrf.mxu0 }
 0x2ec   :  { %v2599_v1 = vadd.f32 %v2986_v59, %v2935_v60 }
 0x2ed   :  { %v2988_v61 = vpop.f32.mrf.mxu0 }
 0x2ee   :  { %v2989_v0 = vadd.f32 %v2988_v61, %v2987_v57 }
 0x2f0   :  { %v2602_v7 = vadd.f32 %v2989_v0, %v2935_v60 }
 0x367   :  { %v3006_v62 = vpop.f32.mrf.mxu1 }
 0x369   :  { %v3007_v63 = vpop.f32.mrf.mxu1 }
 0x36a   :  { %v3008_v2 = vadd.f32 %v3007_v63, %v3006_v62 }
 0x36b   :  { %v3009_v3 = vpop.f32.mrf.mxu1 }
 0x36c   :  { %v2640_v5 = vadd.f32 %v3008_v2, %v2599_v1 }
 0x36d   :  { %v3010_v6 = vpop.f32.mrf.mxu1 }
 0x36e   :  { %2646 = vst [vmem:[#allocation11] sm:$0xff] %v2640_v5  ;;  %v3011_v9 = vadd.f32 %v3010_v6, %v3009_v3 }
 0x370   :  { %v2643_v4 = vadd.f32 %v3011_v9, %v2602_v7 }
 0x372   :  { %2647 = vst [vmem:[#allocation11 + $0x8] sm:$0xff] %v2643_v4 }
 0x373   :  { %3554 = shalt.err (!%p3551_p1)
}
 0x374   :  { %2659 = dma.vmem_to_hbm [thread:$0]  %s2654_s10, 256, %s3747_s7, [#allocation4], %s3578_s17, %s3578_s17, %s3579_s18  }
 0x375   :  { %3569 = dma.done.wait [#allocation4], 256  }
 0x376   :  { %3570 = vsyncadd [#allocation4], 4294967040 }
 0x377   :  { %2663 = vsyncpa [#allocation3], 1 }
 0x378   :  { %2664 = vsyncpa [#allocation6], 1 }
 0x379   :  { %2665 = vsyncpa [#allocation9], 1 }
 0x37a   :  { %2666 = vsyncpa [#allocation4], 1 }

// kernel: tpu_custom_call.1
= control target key start
LH: loop header
LB: loop body
LE: loop exit
PB: predicated region body
PF: predicated region fallthrough
CT: control target
= control target key end

     0   :  { %12 = vsyncpa [#allocation3], 0  ;;  %s3740_s0 = inlined_call_operand.hbm [shape: f32[16,16], index: 0, kind: input, shape index: {}]   ;;  %s3741_s1 = inlined_call_operand.hbm [shape: bf16[16,1024], index: 1, kind: input, shape index: {}]   ;;  %s3742_s2 = inlined_call_operand.hbm [shape: f32[1,1024], index: 2, kind: input, shape index: {}]   ;;  %s3743_s3 = inlined_call_operand.hbm [shape: bf16[1024,512], index: 3, kind: input, shape index: {}]   ;;  %s3744_s4 = inlined_call_operand.vmem [shape: f32[1,512], index: 4, kind: input, shape index: {}]   ;;  %s3745_s5 = inlined_call_operand.hbm [shape: bf16[512,128], index: 5, kind: input, shape index: {}]   ;;  %s3746_s6 = inlined_call_operand.vmem [shape: f32[1,128], index: 6, kind: input, shape index: {}]   ;;  %s3747_s7 = inlined_call_operand.hbm [shape: f32[16,128], index: 7, kind: output, shape index: {}]  }
   0x1   :  { %13 = vsyncpa [#allocation6], 0 }
   0x2   :  { %14 = vsyncpa [#allocation9], 0 }
   0x3   :  { %15 = vsyncpa [#allocation4], 0  ;;  %s3571_s24 = smov [#allocation5]  }
   0x4   :  { %s33_s25 = sshll.u32 %s3571_s24, 4  ;;  %s34_s25 = int_to_ptr.vmem [resolvable:$true] %s33_s25 }
   0x5   :  { %s3451_s26 = scalar_lea.vmem %s34_s25, 1024  ;;  %p3456_p1 = scmp.lt.s32.totalorder %s34_s25, %s34_s25 }
   0x6   :  { %p3452_p0 = scmp.ne.s32.totalorder %s34_s25, %s3451_s26  ;;  %p3457_p2 = scmp.lt.s32.totalorder %s3451_s26, %s3451_s26 }
   0x8   :  { %p3458_p3 = por %p3457_p2, %p3456_p1 }
   0xa   :  { %p3459_p4 = pnand %p3458_p3, %p3452_p0 }
   0xc   :  { %3462 = shalt.err (!%p3459_p4)
}
   0xd   :  { %s3572_s27 = smov 512   ;;  %s3573_s28 = smov 32  }
   0xe   :  { %39 = dma.hbm_to_vmem [thread:$0]  %s3741_s1, 1024, %s34_s25, [#allocation6], %s3572_s27, %s3572_s27, %s3573_s28  }
   0xf   :  { %s3574_s8 = smov [#allocation8]  }
  0x10   :  { %s55_s9 = sshll.u32 %s3574_s8, 4  ;;  %s56_s9 = int_to_ptr.vmem [resolvable:$true] %s55_s9 }
  0x11   :  { %s3471_s10 = scalar_lea.vmem %s56_s9, 32768  ;;  %p3476_p6 = scmp.lt.s32.totalorder %s56_s9, %s56_s9 }
  0x12   :  { %p3472_p5 = scmp.ne.s32.totalorder %s56_s9, %s3471_s10  ;;  %p3477_p7 = scmp.lt.s32.totalorder %s3471_s10, %s3471_s10 }
  0x14   :  { %p3478_p8 = por %p3477_p7, %p3476_p6 }
  0x16   :  { %p3479_p9 = pnand %p3478_p8, %p3472_p5 }
  0x18   :  { %3482 = shalt.err (!%p3479_p9)
}
  0x19   :  { %s3575_s11 = smov 256   ;;  %s3576_s12 = smov 16  }
  0x1a   :  { %61 = dma.hbm_to_vmem [thread:$0]  %s3743_s3, 32768, %s56_s9, [#allocation9], %s3575_s11, %s3575_s11, %s3576_s12  }
  0x1b   :  { %s3577_s15 = smov [#allocation2]  }
  0x1c   :  { %s21_s16 = sshll.u32 %s3577_s15, 4  ;;  %s22_s16 = int_to_ptr.vmem [resolvable:$true] %s21_s16 }
  0x1d   :  { %s3491_s1 = scalar_lea.vmem %s22_s16, 256  ;;  %p3496_p11 = scmp.lt.s32.totalorder %s22_s16, %s22_s16 }
  0x1e   :  { %p3492_p10 = scmp.ne.s32.totalorder %s22_s16, %s3491_s1  ;;  %p3497_p12 = scmp.lt.s32.totalorder %s3491_s1, %s3491_s1 }
  0x20   :  { %p3498_p13 = por %p3497_p12, %p3496_p11 }
  0x22   :  { %p3499_p0 = pnand %p3498_p13, %p3492_p10 }
  0x24   :  { %3502 = shalt.err (!%p3499_p0)
}
  0x25   :  { %s3578_s17 = smov 128   ;;  %s3579_s18 = smov 8  }
  0x26   :  { %27 = dma.hbm_to_vmem [thread:$0]  %s3740_s0, 256, %s22_s16, [#allocation3], %s3578_s17, %s3578_s17, %s3579_s18  }
  0x27   :  { %s3580_s3 = smov [#allocation7]   ;;  %s3581_s22 = smov [#allocation10]  }
  0x28   :  { %s46_s21 = sshll.u32 %s3580_s3, 4  ;;  %s69_s23 = sshll.u32 %s3581_s22, 4  ;;  %s47_s21 = int_to_ptr.vmem [resolvable:$true] %s46_s21  ;;  %s70_s23 = int_to_ptr.vmem [resolvable:$true] %s69_s23 }
  0x29   :  { %s3511_s24 = scalar_lea.vmem %s47_s21, 128  ;;  %p3516_p2 = scmp.lt.s32.totalorder %s47_s21, %s47_s21 }
  0x2a   :  { %p3512_p1 = scmp.ne.s32.totalorder %s47_s21, %s3511_s24  ;;  %p3517_p3 = scmp.lt.s32.totalorder %s3511_s24, %s3511_s24 }
  0x2c   :  { %p3518_p4 = por %p3517_p3, %p3516_p2 }
  0x2e   :  { %p3519_p5 = pnand %p3518_p4, %p3512_p1 }
  0x30   :  { %3522 = shalt.err (!%p3519_p5)
}
  0x31   :  { %49 = dma.hbm_to_vmem [thread:$0]  %s3742_s2, 128, %s47_s21, [#allocation6]  }
  0x32   :  { %s3531_s27 = scalar_lea.vmem %s70_s23, 4096  ;;  %p3536_p7 = scmp.lt.s32.totalorder %s70_s23, %s70_s23 }
  0x33   :  { %p3532_p6 = scmp.ne.s32.totalorder %s70_s23, %s3531_s27  ;;  %p3537_p8 = scmp.lt.s32.totalorder %s3531_s27, %s3531_s27 }
  0x35   :  { %p3538_p9 = por %p3537_p8, %p3536_p7 }
  0x37   :  { %p3539_p10 = pnand %p3538_p9, %p3532_p6 }
  0x39   :  { %3542 = shalt.err (!%p3539_p10)
}
  0x3a   :  { %s3582_s0 = smov 64   ;;  %s3583_s28 = smov 4  }
  0x3b   :  { %75 = dma.hbm_to_vmem [thread:$0]  %s3745_s5, 4096, %s70_s23, [#allocation9], %s3582_s0, %s3582_s0, %s3583_s28  }
  0x3c   :  { %3563 = dma.done.wait [#allocation3], 256  }
  0x3d   :  { %3564 = vsyncadd [#allocation3], 4294967040 }
  0x3e   :  { %3565 = dma.done.wait [#allocation6], 1152  }
  0x3f   :  { %3566 = vsyncadd [#allocation6], 4294966144 }
  0x40   :  { %3567 = dma.done.wait [#allocation9], 36864  }
  0x41   :  { %3568 = vsyncadd [#allocation9], 4294930432  ;;  %v3584_v0 = vmov 0   ;;  %v97_v1 = vld [vmem:[#allocation5] sm:$0xff]  ;;  %v98_v3 = vld [vmem:[#allocation5 + $0x8] sm:$0xff]  ;;  %vm187_vm0 = vcmask 130048  }
  0x42   :  { %223 = vmatprep.mubr.bf16.mxu0 %v3584_v0  ;;  %266 = vmatprep.mubr.bf16.mxu1 %v3584_v0  ;;  %v101_v2 = vld [vmem:[#allocation5 + $0x20] sm:$0xff]  ;;  %v102_v5 = vld [vmem:[#allocation5 + $0x28] sm:$0xff]  ;;  %v94_v7 = vld [vmem:[#allocation2] sm:$0xff]  ;;  %s3585_s9 = smov [#allocation11]  }
  0x43   :  { %v2668_v4 = vcombine.high %v97_v1, %v101_v2  ;;  %v2667_v6 = vcombine.low %v97_v1, %v101_v2  ;;  %v95_v8 = vld [vmem:[#allocation2 + $0x8] sm:$0xff]  ;;  %v2670_v9 = vcombine.high %v98_v3, %v102_v5  ;;  %v2669_v10 = vcombine.low %v98_v3, %v102_v5  ;;  %v99_v11 = vld [vmem:[#allocation5 + $0x10] sm:$0xff]  ;;  %s2653_s10 = sshll.u32 %s3585_s9, 4  ;;  %s2654_s10 = int_to_ptr.vmem [resolvable:$true] %s2653_s10 }
  0x44   :  { %v103_v12 = vld [vmem:[#allocation5 + $0x30] sm:$0xff]  ;;  %v100_v13 = vld [vmem:[#allocation5 + $0x18] sm:$0xff]  ;;  %v96_v14 = vpack.c.bf16 %v95_v8, %v94_v7  ;;  %s3543_s11 = scalar_lea.vmem %s2654_s10, 256  ;;  %p3548_p12 = scmp.lt.s32.totalorder %s2654_s10, %s2654_s10 }
  0x45   :  { %205 = vmatprep.subr.bf16.mxu0 %v2668_v4  ;;  %v2672_v15 = vcombine.high %v99_v11, %v103_v12  ;;  %v104_v16 = vld [vmem:[#allocation5 + $0x38] sm:$0xff]  ;;  %248 = vmatprep.subr.bf16.mxu1 %v2670_v9  ;;  %v2671_v17 = vcombine.low %v99_v11, %v103_v12  ;;  %p3544_p11 = scmp.ne.s32.totalorder %s2654_s10, %s3543_s11  ;;  %p3549_p13 = scmp.lt.s32.totalorder %s3543_s11, %s3543_s11 }
  0x46   :  { %206 = vmatpush1.bf16.msra.mxu0 %v2667_v6  ;;  %v2674_v18 = vcombine.high %v100_v13, %v104_v16  ;;  %249 = vmatpush1.bf16.msra.mxu1 %v2669_v10  ;;  %v2673_v19 = vcombine.low %v100_v13, %v104_v16  ;;  %v3029_v20 = vld [vmem:[#allocation8 + $0xe4] ss:$16 sps:$4 sm:$0xff]   ;;  %v3027_v22 = vld [vmem:[#allocation8 + $0xe0] ss:$16 sps:$4 sm:$0xff]  }
  0x47   :  { %291 = vmatprep.subr.bf16.mxu0 %v2672_v15  ;;  %v3032_v21 = vld [vmem:[#allocation8 + $0x2e4] ss:$16 sps:$4 sm:$0xff]   ;;  %v3030_v23 = vld [vmem:[#allocation8 + $0x2e0] ss:$16 sps:$4 sm:$0xff]   ;;  %p3550_p0 = por %p3549_p13, %p3548_p12 }
  0x48   :  { %334 = vmatprep.subr.bf16.mxu1 %v2674_v18  ;;  %v3035_v24 = vld [vmem:[#allocation8 + $0xc4] ss:$16 sps:$4 sm:$0xff]   ;;  %v3033_v26 = vld [vmem:[#allocation8 + $0xc0] ss:$16 sps:$4 sm:$0xff]  }
  0x49   :  { %2675 = vmatmul.mubr.msk.bf16.vlgmr.msra.gmra.mxu0 %vm187_vm0, %v96_v14  ;;  %2676 = vmatmul.mubr.msk.bf16.vlgmr.msra.gmra.mxu1 %vm187_vm0, %v96_v14  ;;  %v3038_v25 = vld [vmem:[#allocation8 + $0x2c4] ss:$16 sps:$4 sm:$0xff]   ;;  %v3036_v27 = vld [vmem:[#allocation8 + $0x2c0] ss:$16 sps:$4 sm:$0xff]   ;;  %p3551_p1 = pnand %p3550_p0, %p3544_p11 }
  0x4a   :  { %292 = vmatpush1.bf16.msra.mxu0 %v2671_v17  ;;  %309 = vmatprep.mubr.bf16.mxu0 %v3584_v0  ;;  %v3041_v28 = vld [vmem:[#allocation8 + $0xa4] ss:$16 sps:$4 sm:$0xff]   ;;  %v3039_v30 = vld [vmem:[#allocation8 + $0xa0] ss:$16 sps:$4 sm:$0xff]  }
  0x4b   :  { %335 = vmatpush1.bf16.msra.mxu1 %v2673_v19  ;;  %352 = vmatprep.mubr.bf16.mxu1 %v3584_v0  ;;  %v3044_v29 = vld [vmem:[#allocation8 + $0x2a4] ss:$16 sps:$4 sm:$0xff]   ;;  %v3042_v31 = vld [vmem:[#allocation8 + $0x2a0] ss:$16 sps:$4 sm:$0xff]  }
  0x4c   :  { %1945 = vmatprep.subr.bf16.mxu0 %v3029_v20  ;;  %1988 = vmatprep.subr.bf16.mxu1 %v3032_v21  ;;  %v3047_v32 = vld [vmem:[#allocation8 + $0x84] ss:$16 sps:$4 sm:$0xff]   ;;  %v3045_v34 = vld [vmem:[#allocation8 + $0x80] ss:$16 sps:$4 sm:$0xff]  }
  0x4d   :  { %v3050_v33 = vld [vmem:[#allocation8 + $0x284] ss:$16 sps:$4 sm:$0xff]   ;;  %v3048_v35 = vld [vmem:[#allocation8 + $0x280] ss:$16 sps:$4 sm:$0xff]  }
  0x4e   :  { %v3053_v36 = vld [vmem:[#allocation8 + $0x64] ss:$16 sps:$4 sm:$0xff]   ;;  %v3051_v38 = vld [vmem:[#allocation8 + $0x60] ss:$16 sps:$4 sm:$0xff]  }
  0x4f   :  { %v3056_v37 = vld [vmem:[#allocation8 + $0x264] ss:$16 sps:$4 sm:$0xff]   ;;  %v3054_v39 = vld [vmem:[#allocation8 + $0x260] ss:$16 sps:$4 sm:$0xff]  }
  0x50   :  { %v3059_v40 = vld [vmem:[#allocation8 + $0x44] ss:$16 sps:$4 sm:$0xff]   ;;  %v3057_v42 = vld [vmem:[#allocation8 + $0x40] ss:$16 sps:$4 sm:$0xff]  }
  0x51   :  { %2677 = vmatmul.mubr.msk.bf16.vlgmr.msra.gmra.mxu0 %vm187_vm0, %v96_v14  ;;  %2678 = vmatmul.mubr.msk.bf16.vlgmr.msra.gmra.mxu1 %vm187_vm0, %v96_v14  ;;  %v3062_v41 = vld [vmem:[#allocation8 + $0x244] ss:$16 sps:$4 sm:$0xff]   ;;  %v3060_v43 = vld [vmem:[#allocation8 + $0x240] ss:$16 sps:$4 sm:$0xff]  }
  0x52   :  { %1946 = vmatpush1.bf16.msra.mxu0 %v3027_v22  ;;  %1989 = vmatpush1.bf16.msra.mxu1 %v3030_v23  ;;  %v3065_v44 = vld [vmem:[#allocation8 + $0x24] ss:$16 sps:$4 sm:$0xff]   ;;  %v3063_v46 = vld [vmem:[#allocation8 + $0x20] ss:$16 sps:$4 sm:$0xff]   ;;  %v107_v22 = vlaneseq }
  0x53   :  { %1947 = vmatprep.subr.bf16.mxu0 %v3035_v24  ;;  %1990 = vmatprep.subr.bf16.mxu1 %v3038_v25  ;;  %v3068_v45 = vld [vmem:[#allocation8 + $0x224] ss:$16 sps:$4 sm:$0xff]   ;;  %v3066_v47 = vld [vmem:[#allocation8 + $0x220] ss:$16 sps:$4 sm:$0xff]  }
  0x54   :  { %v3071_v48 = vld [vmem:[#allocation8 + $0x4] ss:$16 sps:$4 sm:$0xff]   ;;  %v3069_v49 = vld [vmem:[#allocation8] ss:$16 sps:$4 sm:$0xff]   ;;  %v3648_v23 = vshrl.u32 %v107_v22, 7 }
  0x55   :  { %v3074_v50 = vld [vmem:[#allocation8 + $0x204] ss:$16 sps:$4 sm:$0xff]   ;;  %v3072_v51 = vld [vmem:[#allocation8 + $0x200] ss:$16 sps:$4 sm:$0xff]  }
  0x56   :  { %1948 = vmatpush1.bf16.msra.mxu0 %v3033_v26  ;;  %1991 = vmatpush1.bf16.msra.mxu1 %v3036_v27  ;;  %v3077_v52 = vld [vmem:[#allocation8 + $0x1e4] ss:$16 sps:$4 sm:$0xff]   ;;  %v3075_v54 = vld [vmem:[#allocation8 + $0x1e0] ss:$16 sps:$4 sm:$0xff]   ;;  %v113_v24 = vsub.s32 1, %v3648_v23  ;;  %v109_v25 = vsub.s32 0, %v3648_v23 }
  0x57   :  { %1949 = vmatprep.subr.bf16.mxu0 %v3041_v28  ;;  %1992 = vmatprep.subr.bf16.mxu1 %v3044_v29  ;;  %v3080_v53 = vld [vmem:[#allocation8 + $0x3e4] ss:$16 sps:$4 sm:$0xff]   ;;  %v3078_v55 = vld [vmem:[#allocation8 + $0x3e0] ss:$16 sps:$4 sm:$0xff]   ;;  %v121_v26 = vsub.s32 3, %v3648_v23  ;;  %v3653_v27 = vld [vmem:[#allocation7] sm:$0xff] }
  0x58   :  { %v3083_v56 = vld [vmem:[#allocation8 + $0x1c4] ss:$16 sps:$4 sm:$0xff]   ;;  %v3081_v58 = vld [vmem:[#allocation8 + $0x1c0] ss:$16 sps:$4 sm:$0xff]   ;;  %v117_v28 = vsub.s32 2, %v3648_v23 }
  0x59   :  { %v3086_v57 = vld [vmem:[#allocation8 + $0x3c4] ss:$16 sps:$4 sm:$0xff]   ;;  %v3084_v59 = vld [vmem:[#allocation8 + $0x3c0] ss:$16 sps:$4 sm:$0xff]  }
  0x5a   :  { %1950 = vmatpush1.bf16.msra.mxu0 %v3039_v30  ;;  %1993 = vmatpush1.bf16.msra.mxu1 %v3042_v31  ;;  %v3089_v60 = vld [vmem:[#allocation8 + $0x1a4] ss:$16 sps:$4 sm:$0xff]   ;;  %v3087_v62 = vld [vmem:[#allocation8 + $0x1a0] ss:$16 sps:$4 sm:$0xff]   ;;  %v114_v31 = vrot.slane %v3653_v27, %v113_v24 }
  0x5b   :  { %1951 = vmatprep.subr.bf16.mxu0 %v3047_v32  ;;  %1994 = vmatprep.subr.bf16.mxu1 %v3050_v33  ;;  %v3092_v61 = vld [vmem:[#allocation8 + $0x3a4] ss:$16 sps:$4 sm:$0xff]   ;;  %v3090_v63 = vld [vmem:[#allocation8 + $0x3a0] ss:$16 sps:$4 sm:$0xff]   ;;  %v110_v32 = vrot.slane %v3653_v27, %v109_v25 }
  0x5c   :  { %v3095_v0 = vld [vmem:[#allocation8 + $0x184] ss:$16 sps:$4 sm:$0xff]   ;;  %v3093_v2 = vld [vmem:[#allocation8 + $0x180] ss:$16 sps:$4 sm:$0xff]  }
  0x5d   :  { %v3098_v1 = vld [vmem:[#allocation8 + $0x384] ss:$16 sps:$4 sm:$0xff]   ;;  %v3096_v3 = vld [vmem:[#allocation8 + $0x380] ss:$16 sps:$4 sm:$0xff]  }
  0x5e   :  { %1952 = vmatpush1.bf16.msra.mxu0 %v3045_v34  ;;  %1995 = vmatpush1.bf16.msra.mxu1 %v3048_v35  ;;  %v3101_v4 = vld [vmem:[#allocation8 + $0x164] ss:$16 sps:$4 sm:$0xff]   ;;  %v3099_v6 = vld [vmem:[#allocation8 + $0x160] ss:$16 sps:$4 sm:$0xff]   ;;  %v122_v34 = vrot.slane %v3653_v27, %v121_v26  ;;  %v118_v35 = vrot.slane %v3653_v27, %v117_v28 }
  0x5f   :  { %1953 = vmatprep.subr.bf16.mxu0 %v3053_v36  ;;  %1996 = vmatprep.subr.bf16.mxu1 %v3056_v37  ;;  %v3104_v5 = vld [vmem:[#allocation8 + $0x364] ss:$16 sps:$4 sm:$0xff]   ;;  %v3102_v7 = vld [vmem:[#allocation8 + $0x360] ss:$16 sps:$4 sm:$0xff]   ;;  %v129_v37 = vsub.s32 5, %v3648_v23 }
  0x60   :  { %v3107_v8 = vld [vmem:[#allocation8 + $0x144] ss:$16 sps:$4 sm:$0xff]   ;;  %v3105_v10 = vld [vmem:[#allocation8 + $0x140] ss:$16 sps:$4 sm:$0xff]  }
  0x61   :  { %v3110_v9 = vld [vmem:[#allocation8 + $0x344] ss:$16 sps:$4 sm:$0xff]   ;;  %v3108_v11 = vld [vmem:[#allocation8 + $0x340] ss:$16 sps:$4 sm:$0xff]  }
  0x62   :  { %1954 = vmatpush1.bf16.msra.mxu0 %v3051_v38  ;;  %1997 = vmatpush1.bf16.msra.mxu1 %v3054_v39  ;;  %v3113_v12 = vld [vmem:[#allocation8 + $0x124] ss:$16 sps:$4 sm:$0xff]   ;;  %v3111_v14 = vld [vmem:[#allocation8 + $0x120] ss:$16 sps:$4 sm:$0xff]   ;;  %v137_v39 = vsub.s32 7, %v3648_v23 }
  0x63   :  { %1955 = vmatprep.subr.bf16.mxu0 %v3059_v40  ;;  %1998 = vmatprep.subr.bf16.mxu1 %v3062_v41  ;;  %v3116_v13 = vld [vmem:[#allocation8 + $0x324] ss:$16 sps:$4 sm:$0xff]   ;;  %v3114_v15 = vld [vmem:[#allocation8 + $0x320] ss:$16 sps:$4 sm:$0xff]  }
  0x64   :  { %v3119_v16 = vld [vmem:[#allocation8 + $0x104] ss:$16 sps:$4 sm:$0xff]   ;;  %v3117_v18 = vld [vmem:[#allocation8 + $0x100] ss:$16 sps:$4 sm:$0xff]  }
  0x65   :  { %v3122_v17 = vld [vmem:[#allocation8 + $0x304] ss:$16 sps:$4 sm:$0xff]   ;;  %v3120_v19 = vld [vmem:[#allocation8 + $0x300] ss:$16 sps:$4 sm:$0xff]  }
  0x66   :  { %1956 = vmatpush1.bf16.msra.mxu0 %v3057_v42  ;;  %1999 = vmatpush1.bf16.msra.mxu1 %v3060_v43  ;;  %v3125_v20 = vld [vmem:[#allocation8 + $0x4e4] ss:$16 sps:$4 sm:$0xff]  }
  0x67   :  { %1957 = vmatprep.subr.bf16.mxu0 %v3065_v44  ;;  %2000 = vmatprep.subr.bf16.mxu1 %v3068_v45  ;;  %v3128_v21 = vld [vmem:[#allocation8 + $0x6e4] ss:$16 sps:$4 sm:$0xff]  }
  0x68   :  { %v3140_v22 = vld [vmem:[#allocation8 + $0x6a4] ss:$16 sps:$4 sm:$0xff]  }
  0x6a   :  { %1958 = vmatpush1.bf16.msra.mxu0 %v3063_v46  ;;  %2001 = vmatpush1.bf16.msra.mxu1 %v3066_v47 }
  0x6b   :  { %1959 = vmatprep.subr.bf16.mxu0 %v3071_v48  ;;  %2002 = vmatprep.subr.bf16.mxu1 %v3074_v50  ;;  %v130_v50 = vrot.slane %v3653_v27, %v129_v37  ;;  %v3141_v37 = vld [vmem:[#allocation8 + $0x480] ss:$16 sps:$4 sm:$0xff]  }
  0x6e   :  { %1960 = vmatpush1.bf16.msra.mxu0 %v3069_v49  ;;  %2003 = vmatpush1.bf16.msra.mxu1 %v3072_v51 }
  0x6f   :  { %1961 = vmatprep.subr.bf16.mxu0 %v3077_v52  ;;  %2004 = vmatprep.subr.bf16.mxu1 %v3080_v53 }
  0x72   :  { %1962 = vmatpush2.bf16.msra.mxu0 %v3075_v54  ;;  %2005 = vmatpush2.bf16.msra.mxu1 %v3078_v55  ;;  %v138_v54 = vrot.slane %v3653_v27, %v137_v39  ;;  %v3149_v39 = vld [vmem:[#allocation8 + $0x464] ss:$16 sps:$4 sm:$0xff]  }
  0x73   :  { %1963 = vmatprep.subr.bf16.mxu0 %v3083_v56  ;;  %2006 = vmatprep.subr.bf16.mxu1 %v3086_v57 }
  0x76   :  { %1964 = vmatpush2.bf16.msra.mxu0 %v3081_v58  ;;  %2007 = vmatpush2.bf16.msra.mxu1 %v3084_v59 }
  0x77   :  { %1965 = vmatprep.subr.bf16.mxu0 %v3089_v60  ;;  %2008 = vmatprep.subr.bf16.mxu1 %v3092_v61 }
  0x7a   :  { %1966 = vmatpush2.bf16.msra.mxu0 %v3087_v62  ;;  %2009 = vmatpush2.bf16.msra.mxu1 %v3090_v63 }
  0x7b   :  { %1967 = vmatprep.subr.bf16.mxu0 %v3095_v0  ;;  %2010 = vmatprep.subr.bf16.mxu1 %v3098_v1  ;;  %v3123_v1 = vld [vmem:[#allocation8 + $0x4e0] ss:$16 sps:$4 sm:$0xff]  }
  0x7e   :  { %1968 = vmatpush2.bf16.msra.mxu0 %v3093_v2  ;;  %2011 = vmatpush2.bf16.msra.mxu1 %v3096_v3 }
  0x7f   :  { %1969 = vmatprep.subr.bf16.mxu0 %v3101_v4  ;;  %2012 = vmatprep.subr.bf16.mxu1 %v3104_v5 }
  0x82   :  { %1970 = vmatpush2.bf16.msra.mxu0 %v3099_v6  ;;  %2013 = vmatpush2.bf16.msra.mxu1 %v3102_v7  ;;  %v3126_v6 = vld [vmem:[#allocation8 + $0x6e0] ss:$16 sps:$4 sm:$0xff]   ;;  %v3131_v7 = vld [vmem:[#allocation8 + $0x4c4] ss:$16 sps:$4 sm:$0xff]  }
  0x83   :  { %1971 = vmatprep.subr.bf16.mxu0 %v3107_v8  ;;  %2014 = vmatprep.subr.bf16.mxu1 %v3110_v9 }
  0x86   :  { %1972 = vmatpush2.bf16.msra.mxu0 %v3105_v10  ;;  %2015 = vmatpush2.bf16.msra.mxu1 %v3108_v11  ;;  %v3134_v11 = vld [vmem:[#allocation8 + $0x6c4] ss:$16 sps:$4 sm:$0xff]  }
  0x87   :  { %1973 = vmatprep.subr.bf16.mxu0 %v3113_v12  ;;  %2016 = vmatprep.subr.bf16.mxu1 %v3116_v13 }
  0x8a   :  { %1974 = vmatpush2.bf16.msra.mxu0 %v3111_v14  ;;  %2017 = vmatpush2.bf16.msra.mxu1 %v3114_v15  ;;  %v3129_v14 = vld [vmem:[#allocation8 + $0x4c0] ss:$16 sps:$4 sm:$0xff]  }
  0x8b   :  { %1975 = vmatprep.subr.bf16.mxu0 %v3119_v16  ;;  %2018 = vmatprep.subr.bf16.mxu1 %v3122_v17 }
  0x8e   :  { %1976 = vmatpush2.bf16.msra.mxu0 %v3117_v18  ;;  %2019 = vmatpush2.bf16.msra.mxu1 %v3120_v19  ;;  %v3132_v18 = vld [vmem:[#allocation8 + $0x6c0] ss:$16 sps:$4 sm:$0xff]   ;;  %v3137_v19 = vld [vmem:[#allocation8 + $0x4a4] ss:$16 sps:$4 sm:$0xff]  }
  0x8f   :  { %2031 = vmatprep.subr.bf16.mxu0 %v3125_v20  ;;  %2074 = vmatprep.subr.bf16.mxu1 %v3128_v21 }
 0x109   :  { %v225_v29 = vpop.f32.mrf.mxu0  ;;  %v268_v30 = vpop.f32.mrf.mxu1 }
 0x10a   :  { %v226_v43 = vadd.f32 %v225_v29, %v110_v32  ;;  %v269_v47 = vadd.f32 %v268_v30, %v118_v35 }
 0x10b   :  { %v227_v33 = vpop.f32.mrf.mxu0  ;;  %v270_v36 = vpop.f32.mrf.mxu1 }
 0x10c   :  { %v228_v40 = vadd.f32 %v227_v33, %v114_v31  ;;  %v271_v44 = vadd.f32 %v270_v36, %v122_v34  ;;  %v363_v59 = vmax.f32 %v226_v43, 0.0  ;;  %v365_v63 = vmax.f32 %v269_v47, 0.0  ;;  %v3138_v33 = vld [vmem:[#allocation8 + $0x6a0] ss:$16 sps:$4 sm:$0xff]   ;;  %v3146_v36 = vld [vmem:[#allocation8 + $0x684] ss:$16 sps:$4 sm:$0xff]  }
 0x10d   :  { %v229_v38 = vpop.f32.mrf.mxu0  ;;  %v272_v42 = vpop.f32.mrf.mxu1  ;;  %v3155_v43 = vld [vmem:[#allocation8 + $0x444] ss:$16 sps:$4 sm:$0xff]  }
 0x10e   :  { %v230_v41 = vadd.f32 %v229_v38, %v110_v32  ;;  %v273_v45 = vadd.f32 %v272_v42, %v118_v35  ;;  %v364_v55 = vmax.f32 %v228_v40, 0.0  ;;  %v366_v60 = vmax.f32 %v271_v44, 0.0  ;;  %v3144_v38 = vld [vmem:[#allocation8 + $0x680] ss:$16 sps:$4 sm:$0xff]   ;;  %v3152_v40 = vld [vmem:[#allocation8 + $0x664] ss:$16 sps:$4 sm:$0xff]  }
 0x10f   :  { %v231_v46 = vpop.f32.mrf.mxu0  ;;  %v274_v49 = vpop.f32.mrf.mxu1  ;;  %v3150_v42 = vld [vmem:[#allocation8 + $0x660] ss:$16 sps:$4 sm:$0xff]   ;;  %v3158_v44 = vld [vmem:[#allocation8 + $0x644] ss:$16 sps:$4 sm:$0xff]  }
 0x110   :  { %v232_v48 = vadd.f32 %v231_v46, %v114_v31  ;;  %v371_v51 = vmax.f32 %v230_v41, 0.0  ;;  %v275_v52 = vadd.f32 %v274_v49, %v122_v34  ;;  %v373_v56 = vmax.f32 %v273_v45, 0.0  ;;  %v3135_v31 = vld [vmem:[#allocation8 + $0x4a0] ss:$16 sps:$4 sm:$0xff]   ;;  %v3143_v34 = vld [vmem:[#allocation8 + $0x484] ss:$16 sps:$4 sm:$0xff]  }
 0x111   :  { %v3671_v53 = vpop.f32.mrf.mxu0  ;;  %v3674_v58 = vpop.f32.mrf.mxu1  ;;  %v3147_v41 = vld [vmem:[#allocation8 + $0x460] ss:$16 sps:$4 sm:$0xff]   ;;  %v3161_v47 = vld [vmem:[#allocation8 + $0x424] ss:$16 sps:$4 sm:$0xff]  }
 0x112   :  { %v372_v57 = vmax.f32 %v232_v48, 0.0  ;;  %v374_v61 = vmax.f32 %v275_v52, 0.0  ;;  %v3678_v4 = vpack.c.bf16 %v371_v51, %v363_v59  ;;  %v3684_v10 = vpack.c.bf16 %v373_v56, %v365_v63  ;;  %v3153_v45 = vld [vmem:[#allocation8 + $0x440] ss:$16 sps:$4 sm:$0xff]   ;;  %v3164_v48 = vld [vmem:[#allocation8 + $0x624] ss:$16 sps:$4 sm:$0xff]  }
 0x113   :  { %v313_v62 = vpop.f32.mrf.mxu0  ;;  %v356_v3 = vpop.f32.mrf.mxu1  ;;  %v3156_v46 = vld [vmem:[#allocation8 + $0x640] ss:$16 sps:$4 sm:$0xff]   ;;  %v3167_v51 = vld [vmem:[#allocation8 + $0x404] ss:$16 sps:$4 sm:$0xff]  }
 0x114   :  { %v3676_v0 = vpack.c.bf16 %v372_v57, %v364_v55  ;;  %v314_v2 = vadd.f32 %v313_v62, %v130_v50  ;;  %v3680_v5 = vpack.c.bf16 %v374_v61, %v366_v60  ;;  %v357_v9 = vadd.f32 %v356_v3, %v138_v54  ;;  %v3159_v49 = vld [vmem:[#allocation8 + $0x420] ss:$16 sps:$4 sm:$0xff]   ;;  %v3170_v52 = vld [vmem:[#allocation8 + $0x604] ss:$16 sps:$4 sm:$0xff]  }
 0x115   :  { %v3682_v8 = vpop.f32.mrf.mxu0  ;;  %v3687_v12 = vpop.f32.mrf.mxu1  ;;  %v3168_v55 = vld [vmem:[#allocation8 + $0x600] ss:$16 sps:$4 sm:$0xff]   ;;  %v3173_v56 = vld [vmem:[#allocation8 + $0x5e4] ss:$16 sps:$4 sm:$0xff]  }
 0x116   :  { %1977 = vmatprep.mubr.bf16.mxu0 %v3676_v0  ;;  %2020 = vmatprep.mubr.bf16.mxu1 %v3680_v5  ;;  %v368_v15 = vmax.f32 %v314_v2, 0.0  ;;  %v370_v20 = vmax.f32 %v357_v9, 0.0  ;;  %v3176_v57 = vld [vmem:[#allocation8 + $0x7e4] ss:$16 sps:$4 sm:$0xff]   ;;  %v3171_v59 = vld [vmem:[#allocation8 + $0x5e0] ss:$16 sps:$4 sm:$0xff]  }
 0x117   :  { %1978 = vmatmul.mubr.bf16.vlgmr.msra.gmra.mxu0 %v3678_v4  ;;  %v317_v13 = vpop.f32.mrf.mxu0  ;;  %2021 = vmatmul.mubr.bf16.vlgmr.msra.gmra.mxu1 %v3684_v10  ;;  %v360_v17 = vpop.f32.mrf.mxu1  ;;  %v3174_v60 = vld [vmem:[#allocation8 + $0x7e0] ss:$16 sps:$4 sm:$0xff]   ;;  %v3179_v61 = vld [vmem:[#allocation8 + $0x5c4] ss:$16 sps:$4 sm:$0xff]  }
 0x118   :  { %2032 = vmatpush1.bf16.msra.mxu0 %v3123_v1  ;;  %v318_v16 = vadd.f32 %v317_v13, %v130_v50  ;;  %2075 = vmatpush1.bf16.msra.mxu1 %v3126_v6  ;;  %v361_v21 = vadd.f32 %v360_v17, %v138_v54  ;;  %v3162_v50 = vld [vmem:[#allocation8 + $0x620] ss:$16 sps:$4 sm:$0xff]   ;;  %v3182_v62 = vld [vmem:[#allocation8 + $0x7c4] ss:$16 sps:$4 sm:$0xff]  }
 0x119   :  { %2033 = vmatprep.subr.bf16.mxu0 %v3131_v7  ;;  %2076 = vmatprep.subr.bf16.mxu1 %v3134_v11  ;;  %v3165_v54 = vld [vmem:[#allocation8 + $0x400] ss:$16 sps:$4 sm:$0xff]   ;;  %v3185_v2 = vld [vmem:[#allocation8 + $0x5a4] ss:$16 sps:$4 sm:$0xff]  }
 0x11a   :  { %v376_v29 = vmax.f32 %v318_v16, 0.0  ;;  %v378_v30 = vmax.f32 %v361_v21, 0.0  ;;  %v3177_v63 = vld [vmem:[#allocation8 + $0x5c0] ss:$16 sps:$4 sm:$0xff]   ;;  %v3188_v3 = vld [vmem:[#allocation8 + $0x7a4] ss:$16 sps:$4 sm:$0xff]  }
 0x11b   :  { %v3180_v1 = vld [vmem:[#allocation8 + $0x7c0] ss:$16 sps:$4 sm:$0xff]   ;;  %v3191_v9 = vld [vmem:[#allocation8 + $0x584] ss:$16 sps:$4 sm:$0xff]   ;;  %v133_v21 = vsub.s32 6, %v3648_v23 }
 0x11c   :  { %2034 = vmatpush1.bf16.msra.mxu0 %v3129_v14  ;;  %v3692_v32 = vpack.c.bf16 %v376_v29, %v368_v15  ;;  %2077 = vmatpush1.bf16.msra.mxu1 %v3132_v18  ;;  %v3694_v35 = vpack.c.bf16 %v378_v30, %v370_v20  ;;  %v3183_v6 = vld [vmem:[#allocation8 + $0x5a0] ss:$16 sps:$4 sm:$0xff]   ;;  %v3194_v11 = vld [vmem:[#allocation8 + $0x784] ss:$16 sps:$4 sm:$0xff]   ;;  %v125_v18 = vsub.s32 4, %v3648_v23 }
 0x11d   :  { %2035 = vmatprep.subr.bf16.mxu0 %v3137_v19  ;;  %2078 = vmatprep.subr.bf16.mxu1 %v3140_v22  ;;  %v3186_v7 = vld [vmem:[#allocation8 + $0x7a0] ss:$16 sps:$4 sm:$0xff]   ;;  %v3197_v15 = vld [vmem:[#allocation8 + $0x564] ss:$16 sps:$4 sm:$0xff]  }
 0x11e   :  { %2063 = vmatprep.mubr.bf16.mxu0 %v3692_v32  ;;  %2106 = vmatprep.mubr.bf16.mxu1 %v3694_v35  ;;  %v3189_v13 = vld [vmem:[#allocation8 + $0x580] ss:$16 sps:$4 sm:$0xff]   ;;  %v3200_v16 = vld [vmem:[#allocation8 + $0x764] ss:$16 sps:$4 sm:$0xff]   ;;  %v126_v30 = vrot.slane %v3653_v27, %v125_v18  ;;  %v3263_v18 = vld [vmem:[#allocation8 + $0xc] ss:$16 sps:$4 sm:$0xff]  }
 0x11f   :  { %v3192_v14 = vld [vmem:[#allocation8 + $0x780] ss:$16 sps:$4 sm:$0xff]   ;;  %v3203_v20 = vld [vmem:[#allocation8 + $0x544] ss:$16 sps:$4 sm:$0xff]  }
 0x120   :  { %2036 = vmatpush1.bf16.msra.mxu0 %v3135_v31  ;;  %2079 = vmatpush1.bf16.msra.mxu1 %v3138_v33  ;;  %v3195_v17 = vld [vmem:[#allocation8 + $0x560] ss:$16 sps:$4 sm:$0xff]   ;;  %v3206_v22 = vld [vmem:[#allocation8 + $0x744] ss:$16 sps:$4 sm:$0xff]  }
 0x121   :  { %2037 = vmatprep.subr.bf16.mxu0 %v3143_v34  ;;  %2080 = vmatprep.subr.bf16.mxu1 %v3146_v36  ;;  %v3198_v19 = vld [vmem:[#allocation8 + $0x760] ss:$16 sps:$4 sm:$0xff]   ;;  %v3209_v33 = vld [vmem:[#allocation8 + $0x524] ss:$16 sps:$4 sm:$0xff]   ;;  %v134_v34 = vrot.slane %v3653_v27, %v133_v21  ;;  %v3264_v21 = vld [vmem:[#allocation8 + $0x208] ss:$16 sps:$4 sm:$0xff]  }
 0x122   :  { %v3201_v29 = vld [vmem:[#allocation8 + $0x540] ss:$16 sps:$4 sm:$0xff]   ;;  %v3212_v36 = vld [vmem:[#allocation8 + $0x724] ss:$16 sps:$4 sm:$0xff]  }
 0x123   :  { %v3204_v31 = vld [vmem:[#allocation8 + $0x740] ss:$16 sps:$4 sm:$0xff]  }
 0x124   :  { %2038 = vmatpush1.bf16.msra.mxu0 %v3141_v37  ;;  %2081 = vmatpush1.bf16.msra.mxu1 %v3144_v38  ;;  %v3207_v37 = vld [vmem:[#allocation8 + $0x520] ss:$16 sps:$4 sm:$0xff]   ;;  %v312_v38 = vadd.f32 %v3671_v53, %v126_v30  ;;  %v3221_v53 = vld [vmem:[#allocation8 + $0xec] ss:$16 sps:$4 sm:$0xff]  }
 0x125   :  { %2039 = vmatprep.subr.bf16.mxu0 %v3149_v39  ;;  %2082 = vmatprep.subr.bf16.mxu1 %v3152_v40  ;;  %v316_v39 = vadd.f32 %v3682_v8, %v126_v30  ;;  %v3210_v40 = vld [vmem:[#allocation8 + $0x720] ss:$16 sps:$4 sm:$0xff]   ;;  %v3267_v30 = vld [vmem:[#allocation8 + $0x1e8] ss:$16 sps:$4 sm:$0xff]  }
 0x126   :  { %v3213_v27 = vld [vmem:[#allocation8 + $0x500] ss:$16 sps:$4 sm:$0xff]  }
 0x128   :  { %2040 = vmatpush1.bf16.msra.mxu0 %v3147_v41  ;;  %2083 = vmatpush1.bf16.msra.mxu1 %v3150_v42  ;;  %v3215_v41 = vld [vmem:[#allocation8 + $0x504] ss:$16 sps:$4 sm:$0xff]   ;;  %v355_v42 = vadd.f32 %v3674_v58, %v134_v34  ;;  %v3222_v58 = vld [vmem:[#allocation8 + $0x2e8] ss:$16 sps:$4 sm:$0xff]  }
 0x129   :  { %2041 = vmatprep.subr.bf16.mxu0 %v3155_v43  ;;  %2084 = vmatprep.subr.bf16.mxu1 %v3158_v44  ;;  %v359_v43 = vadd.f32 %v3687_v12, %v134_v34  ;;  %v3218_v44 = vld [vmem:[#allocation8 + $0x704] ss:$16 sps:$4 sm:$0xff]   ;;  %v3278_v34 = vld [vmem:[#allocation8 + $0x3cc] ss:$16 sps:$4 sm:$0xff]  }
 0x12b   :  { %v377_v8 = vmax.f32 %v359_v43, 0.0  ;;  %v3290_v43 = vld [vmem:[#allocation8 + $0x38c] ss:$16 sps:$4 sm:$0xff]  }
 0x12c   :  { %2042 = vmatpush1.bf16.msra.mxu0 %v3153_v45  ;;  %2085 = vmatpush1.bf16.msra.mxu1 %v3156_v46  ;;  %v367_v45 = vmax.f32 %v312_v38, 0.0  ;;  %v375_v46 = vmax.f32 %v316_v39, 0.0  ;;  %v3281_v38 = vld [vmem:[#allocation8 + $0x1ac] ss:$16 sps:$4 sm:$0xff]  }
 0x12d   :  { %2043 = vmatprep.subr.bf16.mxu0 %v3161_v47  ;;  %2086 = vmatprep.subr.bf16.mxu1 %v3164_v48  ;;  %v3216_v47 = vld [vmem:[#allocation8 + $0x700] ss:$16 sps:$4 sm:$0xff]   ;;  %v369_v48 = vmax.f32 %v355_v42, 0.0  ;;  %v3284_v39 = vld [vmem:[#allocation8 + $0x3ac] ss:$16 sps:$4 sm:$0xff]  }
 0x12e   :  { %v3287_v42 = vld [vmem:[#allocation8 + $0x18c] ss:$16 sps:$4 sm:$0xff]  }
 0x12f   :  { %v3708_v12 = vpack.c.bf16 %v377_v8, %v369_v48  ;;  %v3299_v48 = vld [vmem:[#allocation8 + $0x14c] ss:$16 sps:$4 sm:$0xff]  }
 0x130   :  { %2044 = vmatpush1.bf16.msra.mxu0 %v3159_v49  ;;  %2087 = vmatpush1.bf16.msra.mxu1 %v3162_v50  ;;  %v3224_v49 = vld [vmem:[#allocation8 + $0x2ec] ss:$16 sps:$4 sm:$0xff]   ;;  %v3219_v50 = vld [vmem:[#allocation8 + $0xe8] ss:$16 sps:$4 sm:$0xff]  }
 0x131   :  { %2045 = vmatprep.subr.bf16.mxu0 %v3167_v51  ;;  %2088 = vmatprep.subr.bf16.mxu1 %v3170_v52  ;;  %v3706_v51 = vpack.c.bf16 %v375_v46, %v367_v45  ;;  %v3227_v52 = vld [vmem:[#allocation8 + $0xcc] ss:$16 sps:$4 sm:$0xff]  }
 0x132   :  { %v3293_v45 = vld [vmem:[#allocation8 + $0x16c] ss:$16 sps:$4 sm:$0xff]  }
 0x133   :  { %v3296_v46 = vld [vmem:[#allocation8 + $0x36c] ss:$16 sps:$4 sm:$0xff]  }
 0x134   :  { %2046 = vmatpush1.bf16.msra.mxu0 %v3165_v54  ;;  %2089 = vmatpush1.bf16.msra.mxu1 %v3168_v55  ;;  %v3230_v54 = vld [vmem:[#allocation8 + $0x2cc] ss:$16 sps:$4 sm:$0xff]   ;;  %v3225_v55 = vld [vmem:[#allocation8 + $0xc8] ss:$16 sps:$4 sm:$0xff]  }
 0x135   :  { %2047 = vmatprep.subr.bf16.mxu0 %v3173_v56  ;;  %2090 = vmatprep.subr.bf16.mxu1 %v3176_v57  ;;  %v3228_v56 = vld [vmem:[#allocation8 + $0x2c8] ss:$16 sps:$4 sm:$0xff]   ;;  %v3233_v57 = vld [vmem:[#allocation8 + $0xac] ss:$16 sps:$4 sm:$0xff]  }
 0x136   :  { %v3302_v8 = vld [vmem:[#allocation8 + $0x34c] ss:$16 sps:$4 sm:$0xff]  }
 0x138   :  { %2048 = vmatpush2.bf16.msra.mxu0 %v3171_v59  ;;  %2091 = vmatpush2.bf16.msra.mxu1 %v3174_v60  ;;  %v3236_v59 = vld [vmem:[#allocation8 + $0x2ac] ss:$16 sps:$4 sm:$0xff]   ;;  %v3231_v60 = vld [vmem:[#allocation8 + $0xa8] ss:$16 sps:$4 sm:$0xff]  }
 0x139   :  { %2049 = vmatprep.subr.bf16.mxu0 %v3179_v61  ;;  %2092 = vmatprep.subr.bf16.mxu1 %v3182_v62  ;;  %v3234_v61 = vld [vmem:[#allocation8 + $0x2a8] ss:$16 sps:$4 sm:$0xff]   ;;  %v3239_v62 = vld [vmem:[#allocation8 + $0x8c] ss:$16 sps:$4 sm:$0xff]  }
 0x13c   :  { %2050 = vmatpush2.bf16.msra.mxu0 %v3177_v63  ;;  %2093 = vmatpush2.bf16.msra.mxu1 %v3180_v1  ;;  %v3242_v63 = vld [vmem:[#allocation8 + $0x28c] ss:$16 sps:$4 sm:$0xff]   ;;  %v3237_v1 = vld [vmem:[#allocation8 + $0x88] ss:$16 sps:$4 sm:$0xff]  }
 0x13d   :  { %2051 = vmatprep.subr.bf16.mxu0 %v3185_v2  ;;  %2094 = vmatprep.subr.bf16.mxu1 %v3188_v3  ;;  %v3245_v2 = vld [vmem:[#allocation8 + $0x6c] ss:$16 sps:$4 sm:$0xff]  }
 0x13e   :  { %v3248_v3 = vld [vmem:[#allocation8 + $0x26c] ss:$16 sps:$4 sm:$0xff]  }
 0x140   :  { %2052 = vmatpush2.bf16.msra.mxu0 %v3183_v6  ;;  %2095 = vmatpush2.bf16.msra.mxu1 %v3186_v7  ;;  %v3246_v6 = vld [vmem:[#allocation8 + $0x268] ss:$16 sps:$4 sm:$0xff]   ;;  %v3251_v7 = vld [vmem:[#allocation8 + $0x4c] ss:$16 sps:$4 sm:$0xff]  }
 0x141   :  { %2053 = vmatprep.subr.bf16.mxu0 %v3191_v9  ;;  %2096 = vmatprep.subr.bf16.mxu1 %v3194_v11  ;;  %v3254_v9 = vld [vmem:[#allocation8 + $0x24c] ss:$16 sps:$4 sm:$0xff]   ;;  %v3249_v11 = vld [vmem:[#allocation8 + $0x48] ss:$16 sps:$4 sm:$0xff]  }
 0x144   :  { %2054 = vmatpush2.bf16.msra.mxu0 %v3189_v13  ;;  %2097 = vmatpush2.bf16.msra.mxu1 %v3192_v14  ;;  %v3252_v13 = vld [vmem:[#allocation8 + $0x248] ss:$16 sps:$4 sm:$0xff]   ;;  %v3257_v14 = vld [vmem:[#allocation8 + $0x2c] ss:$16 sps:$4 sm:$0xff]  }
 0x145   :  { %2055 = vmatprep.subr.bf16.mxu0 %v3197_v15  ;;  %2098 = vmatprep.subr.bf16.mxu1 %v3200_v16  ;;  %v3260_v15 = vld [vmem:[#allocation8 + $0x22c] ss:$16 sps:$4 sm:$0xff]   ;;  %v3255_v16 = vld [vmem:[#allocation8 + $0x28] ss:$16 sps:$4 sm:$0xff]  }
 0x148   :  { %2056 = vmatpush2.bf16.msra.mxu0 %v3195_v17  ;;  %2099 = vmatpush2.bf16.msra.mxu1 %v3198_v19  ;;  %v3258_v17 = vld [vmem:[#allocation8 + $0x228] ss:$16 sps:$4 sm:$0xff]   ;;  %v3266_v19 = vld [vmem:[#allocation8 + $0x20c] ss:$16 sps:$4 sm:$0xff]  }
 0x149   :  { %2057 = vmatprep.subr.bf16.mxu0 %v3203_v20  ;;  %2100 = vmatprep.subr.bf16.mxu1 %v3206_v22  ;;  %v3261_v20 = vld [vmem:[#allocation8 + $0x8] ss:$16 sps:$4 sm:$0xff]   ;;  %v3269_v22 = vld [vmem:[#allocation8 + $0x1ec] ss:$16 sps:$4 sm:$0xff]  }
 0x14c   :  { %2058 = vmatpush2.bf16.msra.mxu0 %v3201_v29  ;;  %2101 = vmatpush2.bf16.msra.mxu1 %v3204_v31  ;;  %v3272_v29 = vld [vmem:[#allocation8 + $0x3ec] ss:$16 sps:$4 sm:$0xff]   ;;  %v3270_v31 = vld [vmem:[#allocation8 + $0x3e8] ss:$16 sps:$4 sm:$0xff]  }
 0x14d   :  { %2059 = vmatprep.subr.bf16.mxu0 %v3209_v33  ;;  %2102 = vmatprep.subr.bf16.mxu1 %v3212_v36  ;;  %v3275_v33 = vld [vmem:[#allocation8 + $0x1cc] ss:$16 sps:$4 sm:$0xff]   ;;  %v3273_v36 = vld [vmem:[#allocation8 + $0x1c8] ss:$16 sps:$4 sm:$0xff]  }
 0x150   :  { %2060 = vmatpush2.bf16.msra.mxu0 %v3207_v37  ;;  %2103 = vmatpush2.bf16.msra.mxu1 %v3210_v40  ;;  %v3276_v37 = vld [vmem:[#allocation8 + $0x3c8] ss:$16 sps:$4 sm:$0xff]  }
 0x151   :  { %2061 = vmatprep.subr.bf16.mxu0 %v3215_v41  ;;  %2104 = vmatprep.subr.bf16.mxu1 %v3218_v44  ;;  %v3279_v40 = vld [vmem:[#allocation8 + $0x1a8] ss:$16 sps:$4 sm:$0xff]  }
 0x152   :  { %v3282_v41 = vld [vmem:[#allocation8 + $0x3a8] ss:$16 sps:$4 sm:$0xff]  }
 0x153   :  { %v3285_v44 = vld [vmem:[#allocation8 + $0x188] ss:$16 sps:$4 sm:$0xff]  }
 0x154   :  { %2062 = vmatpush2.bf16.msra.mxu0 %v3213_v27  ;;  %2105 = vmatpush2.bf16.msra.mxu1 %v3216_v47  ;;  %v3288_v27 = vld [vmem:[#allocation8 + $0x388] ss:$16 sps:$4 sm:$0xff]  }
 0x155   :  { %2117 = vmatprep.subr.bf16.mxu0 %v3221_v53  ;;  %2160 = vmatprep.subr.bf16.mxu1 %v3224_v49  ;;  %v3291_v47 = vld [vmem:[#allocation8 + $0x168] ss:$16 sps:$4 sm:$0xff]  }
 0x156   :  { %v3294_v53 = vld [vmem:[#allocation8 + $0x368] ss:$16 sps:$4 sm:$0xff]  }
 0x157   :  { %2064 = vmatmul.mubr.bf16.vlgmr.msra.gmra.mxu0 %v3706_v51  ;;  %2107 = vmatmul.mubr.bf16.vlgmr.msra.gmra.mxu1 %v3708_v12  ;;  %v3297_v49 = vld [vmem:[#allocation8 + $0x148] ss:$16 sps:$4 sm:$0xff]  }
 0x158   :  { %2118 = vmatpush1.bf16.msra.mxu0 %v3219_v50  ;;  %2149 = vmatprep.mubr.bf16.mxu0 %v3676_v0  ;;  %v3240_v0 = vld [vmem:[#allocation8 + $0x288] ss:$16 sps:$4 sm:$0xff]  }
 0x159   :  { %2161 = vmatpush1.bf16.msra.mxu1 %v3222_v58  ;;  %2192 = vmatprep.mubr.bf16.mxu1 %v3680_v5  ;;  %v3243_v5 = vld [vmem:[#allocation8 + $0x68] ss:$16 sps:$4 sm:$0xff]   ;;  %v3305_v58 = vld [vmem:[#allocation8 + $0x12c] ss:$16 sps:$4 sm:$0xff]  }
 0x15a   :  { %2119 = vmatprep.subr.bf16.mxu0 %v3227_v52  ;;  %2162 = vmatprep.subr.bf16.mxu1 %v3230_v54  ;;  %v3300_v50 = vld [vmem:[#allocation8 + $0x348] ss:$16 sps:$4 sm:$0xff]   ;;  %v3308_v52 = vld [vmem:[#allocation8 + $0x32c] ss:$16 sps:$4 sm:$0xff]  }
 0x15b   :  { %v3303_v54 = vld [vmem:[#allocation8 + $0x128] ss:$16 sps:$4 sm:$0xff]  }
 0x15c   :  { %2120 = vmatpush1.bf16.msra.mxu0 %v3225_v55  ;;  %v3306_v55 = vld [vmem:[#allocation8 + $0x328] ss:$16 sps:$4 sm:$0xff]  }
 0x15d   :  { %2163 = vmatpush1.bf16.msra.mxu1 %v3228_v56  ;;  %2121 = vmatprep.subr.bf16.mxu0 %v3233_v57  ;;  %v3311_v56 = vld [vmem:[#allocation8 + $0x10c] ss:$16 sps:$4 sm:$0xff]  }
 0x15e   :  { %2164 = vmatprep.subr.bf16.mxu1 %v3236_v59  ;;  %v3314_v57 = vld [vmem:[#allocation8 + $0x30c] ss:$16 sps:$4 sm:$0xff]   ;;  %v3309_v59 = vld [vmem:[#allocation8 + $0x108] ss:$16 sps:$4 sm:$0xff]  }
 0x160   :  { %2122 = vmatpush1.bf16.msra.mxu0 %v3231_v60  ;;  %v3312_v60 = vld [vmem:[#allocation8 + $0x308] ss:$16 sps:$4 sm:$0xff]  }
 0x161   :  { %2165 = vmatpush1.bf16.msra.mxu1 %v3234_v61  ;;  %2123 = vmatprep.subr.bf16.mxu0 %v3239_v62  ;;  %v3317_v61 = vld [vmem:[#allocation8 + $0x4ec] ss:$16 sps:$4 sm:$0xff]  }
 0x162   :  { %2166 = vmatprep.subr.bf16.mxu1 %v3242_v63  ;;  %v3320_v62 = vld [vmem:[#allocation8 + $0x6ec] ss:$16 sps:$4 sm:$0xff]   ;;  %v3315_v63 = vld [vmem:[#allocation8 + $0x4e8] ss:$16 sps:$4 sm:$0xff]  }
 0x164   :  { %2124 = vmatpush1.bf16.msra.mxu0 %v3237_v1  ;;  %v3318_v1 = vld [vmem:[#allocation8 + $0x6e8] ss:$16 sps:$4 sm:$0xff]  }
 0x165   :  { %2167 = vmatpush1.bf16.msra.mxu1 %v3240_v0  ;;  %2125 = vmatprep.subr.bf16.mxu0 %v3245_v2  ;;  %v3323_v0 = vld [vmem:[#allocation8 + $0x4cc] ss:$16 sps:$4 sm:$0xff]  }
 0x166   :  { %2168 = vmatprep.subr.bf16.mxu1 %v3248_v3  ;;  %v3326_v2 = vld [vmem:[#allocation8 + $0x6cc] ss:$16 sps:$4 sm:$0xff]   ;;  %v3321_v3 = vld [vmem:[#allocation8 + $0x4c8] ss:$16 sps:$4 sm:$0xff]  }
 0x168   :  { %2126 = vmatpush1.bf16.msra.mxu0 %v3243_v5  ;;  %v3324_v5 = vld [vmem:[#allocation8 + $0x6c8] ss:$16 sps:$4 sm:$0xff]  }
 0x169   :  { %2169 = vmatpush1.bf16.msra.mxu1 %v3246_v6  ;;  %2127 = vmatprep.subr.bf16.mxu0 %v3251_v7  ;;  %v3329_v6 = vld [vmem:[#allocation8 + $0x4ac] ss:$16 sps:$4 sm:$0xff]  }
 0x16a   :  { %2170 = vmatprep.subr.bf16.mxu1 %v3254_v9  ;;  %v3332_v7 = vld [vmem:[#allocation8 + $0x6ac] ss:$16 sps:$4 sm:$0xff]   ;;  %v3327_v9 = vld [vmem:[#allocation8 + $0x4a8] ss:$16 sps:$4 sm:$0xff]  }
 0x16c   :  { %2128 = vmatpush1.bf16.msra.mxu0 %v3249_v11  ;;  %v3335_v11 = vld [vmem:[#allocation8 + $0x48c] ss:$16 sps:$4 sm:$0xff]  }
 0x16d   :  { %2171 = vmatpush1.bf16.msra.mxu1 %v3252_v13  ;;  %2129 = vmatprep.subr.bf16.mxu0 %v3257_v14  ;;  %v3333_v13 = vld [vmem:[#allocation8 + $0x488] ss:$16 sps:$4 sm:$0xff]   ;;  %v3341_v14 = vld [vmem:[#allocation8 + $0x46c] ss:$16 sps:$4 sm:$0xff]  }
 0x16e   :  { %2172 = vmatprep.subr.bf16.mxu1 %v3260_v15  ;;  %v3344_v15 = vld [vmem:[#allocation8 + $0x66c] ss:$16 sps:$4 sm:$0xff]  }
 0x170   :  { %2130 = vmatpush1.bf16.msra.mxu0 %v3255_v16  ;;  %v3342_v16 = vld [vmem:[#allocation8 + $0x668] ss:$16 sps:$4 sm:$0xff]  }
 0x171   :  { %2173 = vmatpush1.bf16.msra.mxu1 %v3258_v17  ;;  %2131 = vmatprep.subr.bf16.mxu0 %v3263_v18  ;;  %v3347_v17 = vld [vmem:[#allocation8 + $0x44c] ss:$16 sps:$4 sm:$0xff]  }
 0x172   :  { %2174 = vmatprep.subr.bf16.mxu1 %v3266_v19  ;;  %v3350_v18 = vld [vmem:[#allocation8 + $0x64c] ss:$16 sps:$4 sm:$0xff]   ;;  %v3345_v19 = vld [vmem:[#allocation8 + $0x448] ss:$16 sps:$4 sm:$0xff]  }
 0x174   :  { %2132 = vmatpush1.bf16.msra.mxu0 %v3261_v20  ;;  %v3348_v20 = vld [vmem:[#allocation8 + $0x648] ss:$16 sps:$4 sm:$0xff]  }
 0x175   :  { %2175 = vmatpush1.bf16.msra.mxu1 %v3264_v21  ;;  %2133 = vmatprep.subr.bf16.mxu0 %v3269_v22  ;;  %v3353_v21 = vld [vmem:[#allocation8 + $0x42c] ss:$16 sps:$4 sm:$0xff]  }
 0x176   :  { %2176 = vmatprep.subr.bf16.mxu1 %v3272_v29  ;;  %v3356_v22 = vld [vmem:[#allocation8 + $0x62c] ss:$16 sps:$4 sm:$0xff]   ;;  %v3351_v29 = vld [vmem:[#allocation8 + $0x428] ss:$16 sps:$4 sm:$0xff]  }
 0x178   :  { %2134 = vmatpush2.bf16.msra.mxu0 %v3267_v30  ;;  %v3354_v30 = vld [vmem:[#allocation8 + $0x628] ss:$16 sps:$4 sm:$0xff]  }
 0x179   :  { %2177 = vmatpush2.bf16.msra.mxu1 %v3270_v31  ;;  %2135 = vmatprep.subr.bf16.mxu0 %v3275_v33  ;;  %v3359_v31 = vld [vmem:[#allocation8 + $0x40c] ss:$16 sps:$4 sm:$0xff]  }
 0x17a   :  { %2178 = vmatprep.subr.bf16.mxu1 %v3278_v34  ;;  %v3362_v33 = vld [vmem:[#allocation8 + $0x60c] ss:$16 sps:$4 sm:$0xff]   ;;  %v3357_v34 = vld [vmem:[#allocation8 + $0x408] ss:$16 sps:$4 sm:$0xff]  }
 0x17c   :  { %2136 = vmatpush2.bf16.msra.mxu0 %v3273_v36  ;;  %v3360_v36 = vld [vmem:[#allocation8 + $0x608] ss:$16 sps:$4 sm:$0xff]  }
 0x17d   :  { %2179 = vmatpush2.bf16.msra.mxu1 %v3276_v37  ;;  %2137 = vmatprep.subr.bf16.mxu0 %v3281_v38  ;;  %v3365_v37 = vld [vmem:[#allocation8 + $0x5ec] ss:$16 sps:$4 sm:$0xff]  }
 0x17e   :  { %2180 = vmatprep.subr.bf16.mxu1 %v3284_v39  ;;  %v3368_v38 = vld [vmem:[#allocation8 + $0x7ec] ss:$16 sps:$4 sm:$0xff]   ;;  %v3363_v39 = vld [vmem:[#allocation8 + $0x5e8] ss:$16 sps:$4 sm:$0xff]  }
 0x180   :  { %2138 = vmatpush2.bf16.msra.mxu0 %v3279_v40  ;;  %v3366_v40 = vld [vmem:[#allocation8 + $0x7e8] ss:$16 sps:$4 sm:$0xff]  }
 0x181   :  { %2181 = vmatpush2.bf16.msra.mxu1 %v3282_v41  ;;  %2139 = vmatprep.subr.bf16.mxu0 %v3287_v42  ;;  %v3371_v41 = vld [vmem:[#allocation8 + $0x5cc] ss:$16 sps:$4 sm:$0xff]  }
 0x182   :  { %2182 = vmatprep.subr.bf16.mxu1 %v3290_v43  ;;  %v3374_v42 = vld [vmem:[#allocation8 + $0x7cc] ss:$16 sps:$4 sm:$0xff]   ;;  %v3369_v43 = vld [vmem:[#allocation8 + $0x5c8] ss:$16 sps:$4 sm:$0xff]  }
 0x184   :  { %2140 = vmatpush2.bf16.msra.mxu0 %v3285_v44  ;;  %v3372_v44 = vld [vmem:[#allocation8 + $0x7c8] ss:$16 sps:$4 sm:$0xff]  }
 0x185   :  { %2183 = vmatpush2.bf16.msra.mxu1 %v3288_v27  ;;  %2141 = vmatprep.subr.bf16.mxu0 %v3293_v45  ;;  %v3377_v27 = vld [vmem:[#allocation8 + $0x5ac] ss:$16 sps:$4 sm:$0xff]  }
 0x186   :  { %2184 = vmatprep.subr.bf16.mxu1 %v3296_v46  ;;  %v3380_v45 = vld [vmem:[#allocation8 + $0x7ac] ss:$16 sps:$4 sm:$0xff]   ;;  %v3375_v46 = vld [vmem:[#allocation8 + $0x5a8] ss:$16 sps:$4 sm:$0xff]  }
 0x188   :  { %2142 = vmatpush2.bf16.msra.mxu0 %v3291_v47  ;;  %v3378_v47 = vld [vmem:[#allocation8 + $0x7a8] ss:$16 sps:$4 sm:$0xff]  }
 0x189   :  { %2185 = vmatpush2.bf16.msra.mxu1 %v3294_v53  ;;  %2143 = vmatprep.subr.bf16.mxu0 %v3299_v48  ;;  %v3383_v53 = vld [vmem:[#allocation8 + $0x58c] ss:$16 sps:$4 sm:$0xff]  }
 0x18a   :  { %2186 = vmatprep.subr.bf16.mxu1 %v3302_v8  ;;  %v3386_v48 = vld [vmem:[#allocation8 + $0x78c] ss:$16 sps:$4 sm:$0xff]   ;;  %v3381_v8 = vld [vmem:[#allocation8 + $0x588] ss:$16 sps:$4 sm:$0xff]  }
 0x18c   :  { %2144 = vmatpush2.bf16.msra.mxu0 %v3297_v49  ;;  %v3384_v49 = vld [vmem:[#allocation8 + $0x788] ss:$16 sps:$4 sm:$0xff]  }
 0x18d   :  { %2187 = vmatpush2.bf16.msra.mxu1 %v3300_v50  ;;  %2145 = vmatprep.subr.bf16.mxu0 %v3305_v58  ;;  %v3389_v50 = vld [vmem:[#allocation8 + $0x56c] ss:$16 sps:$4 sm:$0xff]  }
 0x18e   :  { %2188 = vmatprep.subr.bf16.mxu1 %v3308_v52  ;;  %v3392_v58 = vld [vmem:[#allocation8 + $0x76c] ss:$16 sps:$4 sm:$0xff]   ;;  %v3387_v52 = vld [vmem:[#allocation8 + $0x568] ss:$16 sps:$4 sm:$0xff]  }
 0x190   :  { %2146 = vmatpush2.bf16.msra.mxu0 %v3303_v54  ;;  %v3390_v54 = vld [vmem:[#allocation8 + $0x768] ss:$16 sps:$4 sm:$0xff]  }
 0x191   :  { %2189 = vmatpush2.bf16.msra.mxu1 %v3306_v55  ;;  %2147 = vmatprep.subr.bf16.mxu0 %v3311_v56  ;;  %v3395_v55 = vld [vmem:[#allocation8 + $0x54c] ss:$16 sps:$4 sm:$0xff]  }
 0x192   :  { %2190 = vmatprep.subr.bf16.mxu1 %v3314_v57  ;;  %v3398_v56 = vld [vmem:[#allocation8 + $0x74c] ss:$16 sps:$4 sm:$0xff]   ;;  %v3393_v57 = vld [vmem:[#allocation8 + $0x548] ss:$16 sps:$4 sm:$0xff]  }
 0x194   :  { %2148 = vmatpush2.bf16.msra.mxu0 %v3309_v59  ;;  %v3396_v59 = vld [vmem:[#allocation8 + $0x748] ss:$16 sps:$4 sm:$0xff]  }
 0x195   :  { %2191 = vmatpush2.bf16.msra.mxu1 %v3312_v60  ;;  %2203 = vmatprep.subr.bf16.mxu0 %v3317_v61  ;;  %v3401_v60 = vld [vmem:[#allocation8 + $0x52c] ss:$16 sps:$4 sm:$0xff]  }
 0x196   :  { %2246 = vmatprep.subr.bf16.mxu1 %v3320_v62  ;;  %v3404_v61 = vld [vmem:[#allocation8 + $0x72c] ss:$16 sps:$4 sm:$0xff]   ;;  %v3399_v62 = vld [vmem:[#allocation8 + $0x528] ss:$16 sps:$4 sm:$0xff]  }
 0x197   :  { %2150 = vmatmul.mubr.bf16.vlgmr.msra.gmra.mxu0 %v3678_v4  ;;  %v3330_v4 = vld [vmem:[#allocation8 + $0x6a8] ss:$16 sps:$4 sm:$0xff]  }
 0x198   :  { %2193 = vmatmul.mubr.bf16.vlgmr.msra.gmra.mxu1 %v3684_v10  ;;  %2204 = vmatpush1.bf16.msra.mxu0 %v3315_v63  ;;  %v3338_v10 = vld [vmem:[#allocation8 + $0x68c] ss:$16 sps:$4 sm:$0xff]   ;;  %v3402_v63 = vld [vmem:[#allocation8 + $0x728] ss:$16 sps:$4 sm:$0xff]  }
 0x199   :  { %2235 = vmatprep.mubr.bf16.mxu0 %v3692_v32  ;;  %2247 = vmatpush1.bf16.msra.mxu1 %v3318_v1  ;;  %v3336_v32 = vld [vmem:[#allocation8 + $0x688] ss:$16 sps:$4 sm:$0xff]   ;;  %v3407_v1 = vld [vmem:[#allocation8 + $0x50c] ss:$16 sps:$4 sm:$0xff]  }
 0x19a   :  { %2278 = vmatprep.mubr.bf16.mxu1 %v3694_v35  ;;  %2205 = vmatprep.subr.bf16.mxu0 %v3323_v0  ;;  %v3339_v35 = vld [vmem:[#allocation8 + $0x468] ss:$16 sps:$4 sm:$0xff]   ;;  %v3410_v0 = vld [vmem:[#allocation8 + $0x70c] ss:$16 sps:$4 sm:$0xff]  }
 0x19b   :  { %2248 = vmatprep.subr.bf16.mxu1 %v3326_v2  ;;  %v3405_v2 = vld [vmem:[#allocation8 + $0x508] ss:$16 sps:$4 sm:$0xff]  }
 0x19c   :  { %2206 = vmatpush1.bf16.msra.mxu0 %v3321_v3  ;;  %v3408_v3 = vld [vmem:[#allocation8 + $0x708] ss:$16 sps:$4 sm:$0xff]  }
 0x19d   :  { %2249 = vmatpush1.bf16.msra.mxu1 %v3324_v5  ;;  %2207 = vmatprep.subr.bf16.mxu0 %v3329_v6  ;;  %v3411_v5 = vld [vmem:[#allocation10 + $0x78] sm:$0xff]  }
 0x19e   :  { %2250 = vmatprep.subr.bf16.mxu1 %v3332_v7  ;;  %v3412_v6 = vld [vmem:[#allocation10 + $0x38] sm:$0xff]   ;;  %v3413_v7 = vld [vmem:[#allocation10 + $0x70] sm:$0xff]  }
 0x1a0   :  { %2208 = vmatpush1.bf16.msra.mxu0 %v3327_v9  ;;  %v3414_v9 = vld [vmem:[#allocation10 + $0x30] sm:$0xff]  }
 0x1a1   :  { %2251 = vmatpush1.bf16.msra.mxu1 %v3330_v4  ;;  %2209 = vmatprep.subr.bf16.mxu0 %v3335_v11  ;;  %v3415_v4 = vld [vmem:[#allocation10 + $0x68] sm:$0xff]  }
 0x1a2   :  { %2252 = vmatprep.subr.bf16.mxu1 %v3338_v10  ;;  %v3416_v11 = vld [vmem:[#allocation10 + $0x28] sm:$0xff]   ;;  %v3417_v10 = vld [vmem:[#allocation10 + $0x60] sm:$0xff]  }
 0x1a4   :  { %2210 = vmatpush1.bf16.msra.mxu0 %v3333_v13  ;;  %v3418_v13 = vld [vmem:[#allocation10 + $0x20] sm:$0xff]  }
 0x1a5   :  { %2253 = vmatpush1.bf16.msra.mxu1 %v3336_v32  ;;  %2211 = vmatprep.subr.bf16.mxu0 %v3341_v14  ;;  %v3427_v32 = vld [vmem:[#allocation10 + $0xf8] sm:$0xff]  }
 0x1a6   :  { %2254 = vmatprep.subr.bf16.mxu1 %v3344_v15  ;;  %v3428_v14 = vld [vmem:[#allocation10 + $0xb8] sm:$0xff]   ;;  %v3429_v15 = vld [vmem:[#allocation10 + $0xf0] sm:$0xff]  }
 0x1a8   :  { %2212 = vmatpush1.bf16.msra.mxu0 %v3339_v35  ;;  %v3419_v35 = vld [vmem:[#allocation10 + $0x58] sm:$0xff]  }
 0x1a9   :  { %2255 = vmatpush1.bf16.msra.mxu1 %v3342_v16  ;;  %2213 = vmatprep.subr.bf16.mxu0 %v3347_v17  ;;  %v3431_v16 = vld [vmem:[#allocation10 + $0xe8] sm:$0xff]   ;;  %v3421_v17 = vld [vmem:[#allocation10 + $0x50] sm:$0xff]  }
 0x1aa   :  { %2256 = vmatprep.subr.bf16.mxu1 %v3350_v18  ;;  %v3432_v18 = vld [vmem:[#allocation10 + $0xa8] sm:$0xff]  }
 0x1ac   :  { %2214 = vmatpush1.bf16.msra.mxu0 %v3345_v19  ;;  %v3422_v19 = vld [vmem:[#allocation10 + $0x10] sm:$0xff]  }
 0x1ad   :  { %2257 = vmatpush1.bf16.msra.mxu1 %v3348_v20  ;;  %2215 = vmatprep.subr.bf16.mxu0 %v3353_v21  ;;  %v3433_v20 = vld [vmem:[#allocation10 + $0xe0] sm:$0xff]   ;;  %v3423_v21 = vld [vmem:[#allocation10 + $0x48] sm:$0xff]  }
 0x1ae   :  { %2258 = vmatprep.subr.bf16.mxu1 %v3356_v22  ;;  %v3434_v22 = vld [vmem:[#allocation10 + $0xa0] sm:$0xff]  }
 0x1b0   :  { %2216 = vmatpush1.bf16.msra.mxu0 %v3351_v29  ;;  %v3424_v29 = vld [vmem:[#allocation10 + $0x8] sm:$0xff]  }
 0x1b1   :  { %2259 = vmatpush1.bf16.msra.mxu1 %v3354_v30  ;;  %2217 = vmatprep.subr.bf16.mxu0 %v3359_v31  ;;  %v3425_v30 = vld [vmem:[#allocation10 + $0x40] sm:$0xff]  }
 0x1b2   :  { %2260 = vmatprep.subr.bf16.mxu1 %v3362_v33  ;;  %v3426_v31 = vld [vmem:[#allocation10] sm:$0xff]  }
 0x1b4   :  { %2218 = vmatpush1.bf16.msra.mxu0 %v3357_v34 }
 0x1b5   :  { %2261 = vmatpush1.bf16.msra.mxu1 %v3360_v36  ;;  %2219 = vmatprep.subr.bf16.mxu0 %v3365_v37  ;;  %v643_v37 = vld [vmem:[%s3744_s4] sm:$0xf] }
 0x1b6   :  { %2262 = vmatprep.subr.bf16.mxu1 %v3368_v38 }
 0x1b8   :  { %2220 = vmatpush2.bf16.msra.mxu0 %v3363_v39  ;;  %v652_v39 = vrot.slane %v643_v37, %v113_v24 }
 0x1b9   :  { %2263 = vmatpush2.bf16.msra.mxu1 %v3366_v40  ;;  %2221 = vmatprep.subr.bf16.mxu0 %v3371_v41  ;;  %v648_v40 = vrot.slane %v643_v37, %v109_v25 }
 0x1ba   :  { %2264 = vmatprep.subr.bf16.mxu1 %v3374_v42 }
 0x1bc   :  { %2222 = vmatpush2.bf16.msra.mxu0 %v3369_v43 }
 0x1bd   :  { %2265 = vmatpush2.bf16.msra.mxu1 %v3372_v44  ;;  %2223 = vmatprep.subr.bf16.mxu0 %v3377_v27 }
 0x1be   :  { %2266 = vmatprep.subr.bf16.mxu1 %v3380_v45 }
 0x1c0   :  { %2224 = vmatpush2.bf16.msra.mxu0 %v3375_v46 }
 0x1c1   :  { %2267 = vmatpush2.bf16.msra.mxu1 %v3378_v47  ;;  %2225 = vmatprep.subr.bf16.mxu0 %v3383_v53  ;;  %v3435_v53 = vld [vmem:[#allocation10 + $0xd8] sm:$0xff]  }
 0x1c2   :  { %2268 = vmatprep.subr.bf16.mxu1 %v3386_v48 }
 0x1c4   :  { %2226 = vmatpush2.bf16.msra.mxu0 %v3381_v8 }
 0x1c5   :  { %2269 = vmatpush2.bf16.msra.mxu1 %v3384_v49  ;;  %2227 = vmatprep.subr.bf16.mxu0 %v3389_v50  ;;  %v3436_v50 = vld [vmem:[#allocation10 + $0x98] sm:$0xff]  }
 0x1c6   :  { %2270 = vmatprep.subr.bf16.mxu1 %v3392_v58 }
 0x1c8   :  { %2228 = vmatpush2.bf16.msra.mxu0 %v3387_v52 }
 0x1c9   :  { %2271 = vmatpush2.bf16.msra.mxu1 %v3390_v54  ;;  %2229 = vmatprep.subr.bf16.mxu0 %v3395_v55 }
 0x1ca   :  { %2272 = vmatprep.subr.bf16.mxu1 %v3398_v56 }
 0x1cc   :  { %2230 = vmatpush2.bf16.msra.mxu0 %v3393_v57  ;;  %v3437_v57 = vld [vmem:[#allocation10 + $0xd0] sm:$0xff]  }
 0x1cd   :  { %2273 = vmatpush2.bf16.msra.mxu1 %v3396_v59  ;;  %2231 = vmatprep.subr.bf16.mxu0 %v3401_v60 }
 0x1ce   :  { %2274 = vmatprep.subr.bf16.mxu1 %v3404_v61 }
 0x1d0   :  { %2232 = vmatpush2.bf16.msra.mxu0 %v3399_v62  ;;  %v3438_v62 = vld [vmem:[#allocation10 + $0x90] sm:$0xff]  }
 0x1d1   :  { %2275 = vmatpush2.bf16.msra.mxu1 %v3402_v63  ;;  %2233 = vmatprep.subr.bf16.mxu0 %v3407_v1 }
 0x1d2   :  { %2276 = vmatprep.subr.bf16.mxu1 %v3410_v0 }
 0x1d4   :  { %2234 = vmatpush2.bf16.msra.mxu0 %v3405_v2 }
 0x1d5   :  { %2277 = vmatpush2.bf16.msra.mxu1 %v3408_v3  ;;  %2968 = vmatprep.subr.bf16.mxu0 %v3411_v5 }
 0x1d6   :  { %2990 = vmatprep.subr.bf16.mxu1 %v3427_v32  ;;  %v3441_v32 = vld [vmem:[#allocation10 + $0xc0] sm:$0xff]  }
 0x1d7   :  { %2236 = vmatmul.mubr.bf16.vlgmr.msra.gmra.mxu0 %v3706_v51  ;;  %v3430_v51 = vld [vmem:[#allocation10 + $0xb0] sm:$0xff]   ;;  %v1979_v33 = vpop.f32.mrf.mxu0  ;;  %v2022_v34 = vpop.f32.mrf.mxu1 }
 0x1d8   :  { %2279 = vmatmul.mubr.bf16.vlgmr.msra.gmra.mxu1 %v3708_v12  ;;  %2969 = vmatpush3.bf16.msra.mxu0 %v3412_v6  ;;  %v3420_v12 = vld [vmem:[#allocation10 + $0x18] sm:$0xff]   ;;  %v1980_v44 = vadd.f32 %v1979_v33, %v648_v40  ;;  %v3439_v6 = vld [vmem:[#allocation10 + $0xc8] sm:$0xff]  }
 0x1d9   :  { %2970 = vmatprep.subr.bf16.mxu0 %v3413_v7  ;;  %2991 = vmatpush3.bf16.msra.mxu1 %v3428_v14  ;;  %v1981_v36 = vpop.f32.mrf.mxu0  ;;  %v2024_v38 = vpop.f32.mrf.mxu1 }
 0x1da   :  { %2992 = vmatprep.subr.bf16.mxu1 %v3429_v15  ;;  %v1982_v43 = vadd.f32 %v1981_v36, %v652_v39  ;;  %v2023_v58 = vadd.f32 %v2022_v34, %v1980_v44  ;;  %v3442_v15 = vld [vmem:[#allocation10 + $0x80] sm:$0xff]  }
 0x1db   :  { %v1983_v41 = vpop.f32.mrf.mxu0  ;;  %v2026_v42 = vpop.f32.mrf.mxu1 }
 0x1dc   :  { %2971 = vmatpush3.bf16.msra.mxu0 %v3414_v9  ;;  %v1984_v45 = vadd.f32 %v1983_v41, %v648_v40  ;;  %v2025_v48 = vadd.f32 %v2024_v38, %v1982_v43  ;;  %v3440_v9 = vld [vmem:[#allocation10 + $0x88] sm:$0xff]  }
 0x1dd   :  { %2972 = vmatprep.subr.bf16.mxu0 %v3415_v4  ;;  %2993 = vmatpush3.bf16.msra.mxu1 %v3430_v51  ;;  %v1985_v27 = vpop.f32.mrf.mxu0  ;;  %v2028_v46 = vpop.f32.mrf.mxu1 }
 0x1de   :  { %2994 = vmatprep.subr.bf16.mxu1 %v3431_v16  ;;  %v1986_v8 = vadd.f32 %v1985_v27, %v652_v39  ;;  %v2027_v24 = vadd.f32 %v2026_v42, %v1984_v45 }
 0x1e0   :  { %2973 = vmatpush3.bf16.msra.mxu0 %v3416_v11  ;;  %v2029_v59 = vadd.f32 %v2028_v46, %v1986_v8 }
 0x1e1   :  { %2974 = vmatprep.subr.bf16.mxu0 %v3417_v10  ;;  %2995 = vmatpush3.bf16.msra.mxu1 %v3432_v18  ;;  %v660_v18 = vrot.slane %v643_v37, %v121_v26 }
 0x1e2   :  { %2996 = vmatprep.subr.bf16.mxu1 %v3433_v20 }
 0x1e4   :  { %2975 = vmatpush3.bf16.msra.mxu0 %v3418_v13 }
 0x1e5   :  { %2976 = vmatprep.subr.bf16.mxu0 %v3419_v35  ;;  %2997 = vmatpush3.bf16.msra.mxu1 %v3434_v22 }
 0x1e6   :  { %2998 = vmatprep.subr.bf16.mxu1 %v3435_v53 }
 0x1e8   :  { %2977 = vmatpush3.bf16.msra.mxu0 %v3420_v12 }
 0x1e9   :  { %2978 = vmatprep.subr.bf16.mxu0 %v3421_v17  ;;  %2999 = vmatpush3.bf16.msra.mxu1 %v3436_v50 }
 0x1ea   :  { %3000 = vmatprep.subr.bf16.mxu1 %v3437_v57 }
 0x1ec   :  { %2979 = vmatpush3.bf16.msra.mxu0 %v3422_v19  ;;  %v656_v19 = vrot.slane %v643_v37, %v117_v28 }
 0x1ed   :  { %2980 = vmatprep.subr.bf16.mxu0 %v3423_v21  ;;  %3001 = vmatpush3.bf16.msra.mxu1 %v3438_v62 }
 0x1ee   :  { %3002 = vmatprep.subr.bf16.mxu1 %v3439_v6 }
 0x1f0   :  { %2981 = vmatpush3.bf16.msra.mxu0 %v3424_v29 }
 0x1f1   :  { %2982 = vmatprep.subr.bf16.mxu0 %v3425_v30  ;;  %3003 = vmatpush3.bf16.msra.mxu1 %v3440_v9 }
 0x1f2   :  { %3004 = vmatprep.subr.bf16.mxu1 %v3441_v32 }
 0x1f4   :  { %2983 = vmatpush3.bf16.msra.mxu0 %v3426_v31 }
 0x1f5   :  { %3005 = vmatpush3.bf16.msra.mxu1 %v3442_v15 }
 0x217   :  { %v2065_v47 = vpop.f32.mrf.mxu0  ;;  %v2108_v49 = vpop.f32.mrf.mxu1 }
 0x218   :  { %v2066_v25 = vadd.f32 %v2065_v47, %v2023_v58 }
 0x219   :  { %v2067_v52 = vpop.f32.mrf.mxu0  ;;  %v2110_v55 = vpop.f32.mrf.mxu1 }
 0x21a   :  { %v2068_v54 = vadd.f32 %v2067_v52, %v2025_v48  ;;  %v2109_v3 = vadd.f32 %v2108_v49, %v2066_v25 }
 0x21b   :  { %v2069_v56 = vpop.f32.mrf.mxu0  ;;  %v2112_v61 = vpop.f32.mrf.mxu1 }
 0x21c   :  { %v2070_v60 = vadd.f32 %v2069_v56, %v2027_v24  ;;  %v2111_v1 = vadd.f32 %v2110_v55, %v2068_v54  ;;  %v2289_v13 = vmax.f32 %v2109_v3, 0.0 }
 0x21d   :  { %v2071_v63 = vpop.f32.mrf.mxu0  ;;  %v2114_v5 = vpop.f32.mrf.mxu1 }
 0x21e   :  { %v2113_v0 = vadd.f32 %v2112_v61, %v2070_v60  ;;  %v2072_v2 = vadd.f32 %v2071_v63, %v2029_v59  ;;  %v2290_v11 = vmax.f32 %v2111_v1, 0.0  ;;  %v2935_v60 = vld [vmem:[%s3746_s6] ss:$0 sm:$0xff] }
 0x220   :  { %v2115_v7 = vadd.f32 %v2114_v5, %v2072_v2  ;;  %v2293_v4 = vmax.f32 %v2113_v0, 0.0 }
 0x222   :  { %v2294_v10 = vmax.f32 %v2115_v7, 0.0  ;;  %v2297_v35 = vpack.c.bf16 %v2293_v4, %v2289_v13 }
 0x224   :  { %v2298_v14 = vpack.c.bf16 %v2294_v10, %v2290_v11 }
 0x226   :  { %2596 = vmatprep.mubr.bf16.mxu0 %v2298_v14 }
 0x227   :  { %2597 = vmatmul.mubr.bf16.vlgmr.msra.gmra.mxu0 %v2297_v35 }
 0x257   :  { %v2151_v51 = vpop.f32.mrf.mxu0 }
 0x258   :  { %v2194_v12 = vpop.f32.mrf.mxu1  ;;  %v2152_v29 = vadd.f32 %v2151_v51, %v656_v19 }
 0x259   :  { %v2153_v16 = vpop.f32.mrf.mxu0 }
 0x25a   :  { %v2196_v17 = vpop.f32.mrf.mxu1  ;;  %v2154_v22 = vadd.f32 %v2153_v16, %v660_v18  ;;  %v2195_v40 = vadd.f32 %v2194_v12, %v2152_v29 }
 0x25b   :  { %v2155_v20 = vpop.f32.mrf.mxu0 }
 0x25c   :  { %v2198_v21 = vpop.f32.mrf.mxu1  ;;  %v2156_v31 = vadd.f32 %v2155_v20, %v656_v19  ;;  %v2197_v36 = vadd.f32 %v2196_v17, %v2154_v22 }
 0x25d   :  { %v2157_v30 = vpop.f32.mrf.mxu0 }
 0x25e   :  { %v2200_v33 = vpop.f32.mrf.mxu1  ;;  %v2158_v38 = vadd.f32 %v2157_v30, %v660_v18  ;;  %v2199_v42 = vadd.f32 %v2198_v21, %v2156_v31 }
 0x260   :  { %v2201_v23 = vadd.f32 %v2200_v33, %v2158_v38 }
 0x297   :  { %v2237_v34 = vpop.f32.mrf.mxu0 }
 0x298   :  { %v2280_v39 = vpop.f32.mrf.mxu1  ;;  %v2238_v26 = vadd.f32 %v2237_v34, %v2195_v40 }
 0x299   :  { %v2239_v41 = vpop.f32.mrf.mxu0 }
 0x29a   :  { %v2240_v43 = vadd.f32 %v2239_v41, %v2197_v36  ;;  %v2282_v44 = vpop.f32.mrf.mxu1  ;;  %v2281_v48 = vadd.f32 %v2280_v39, %v2238_v26 }
 0x29b   :  { %v2241_v27 = vpop.f32.mrf.mxu0 }
 0x29c   :  { %v2242_v28 = vadd.f32 %v2241_v27, %v2199_v42  ;;  %v2284_v37 = vpop.f32.mrf.mxu1  ;;  %v2283_v46 = vadd.f32 %v2282_v44, %v2240_v43  ;;  %v2291_v24 = vmax.f32 %v2281_v48, 0.0 }
 0x29d   :  { %v2243_v45 = vpop.f32.mrf.mxu0 }
 0x29e   :  { %v2285_v47 = vadd.f32 %v2284_v37, %v2242_v28  ;;  %v2244_v53 = vadd.f32 %v2243_v45, %v2201_v23  ;;  %v2286_v8 = vpop.f32.mrf.mxu1  ;;  %v2292_v58 = vmax.f32 %v2283_v46, 0.0 }
 0x2a0   :  { %v2287_v49 = vadd.f32 %v2286_v8, %v2244_v53  ;;  %v2295_v50 = vmax.f32 %v2285_v47, 0.0 }
 0x2a2   :  { %v2296_v52 = vmax.f32 %v2287_v49, 0.0  ;;  %v2299_v55 = vpack.c.bf16 %v2295_v50, %v2291_v24 }
 0x2a4   :  { %v2300_v54 = vpack.c.bf16 %v2296_v52, %v2292_v58 }
 0x2a6   :  { %2637 = vmatprep.mubr.bf16.mxu1 %v2300_v54 }
 0x2a7   :  { %2638 = vmatmul.mubr.bf16.vlgmr.msra.gmra.mxu1 %v2299_v55 }
 0x2e7   :  { %v2984_v25 = vpop.f32.mrf.mxu0 }
 0x2e9   :  { %v2985_v56 = vpop.f32.mrf.mxu0 }
 0x2ea   :  { %v2986_v59 = vadd.f32 %v2985_v56, %v2984_v25 }
 0x2eb   :  { %v2987_v57 = vpop.f32.mrf.mxu0 }
 0x2ec   :  { %v2599_v1 = vadd.f32 %v2986_v59, %v2935_v60 }
 0x2ed   :  { %v2988_v61 = vpop.f32.mrf.mxu0 }
 0x2ee   :  { %v2989_v0 = vadd.f32 %v2988_v61, %v2987_v57 }
 0x2f0   :  { %v2602_v7 = vadd.f32 %v2989_v0, %v2935_v60 }
 0x367   :  { %v3006_v62 = vpop.f32.mrf.mxu1 }
 0x369   :  { %v3007_v63 = vpop.f32.mrf.mxu1 }
 0x36a   :  { %v3008_v2 = vadd.f32 %v3007_v63, %v3006_v62 }
 0x36b   :  { %v3009_v3 = vpop.f32.mrf.mxu1 }
 0x36c   :  { %v2640_v5 = vadd.f32 %v3008_v2, %v2599_v1 }
 0x36d   :  { %v3010_v6 = vpop.f32.mrf.mxu1 }
 0x36e   :  { %2646 = vst [vmem:[#allocation11] sm:$0xff] %v2640_v5  ;;  %v3011_v9 = vadd.f32 %v3010_v6, %v3009_v3 }
 0x370   :  { %v2643_v4 = vadd.f32 %v3011_v9, %v2602_v7 }
 0x372   :  { %2647 = vst [vmem:[#allocation11 + $0x8] sm:$0xff] %v2643_v4 }
 0x373   :  { %3554 = shalt.err (!%p3551_p1)
}
 0x374   :  { %2659 = dma.vmem_to_hbm [thread:$0]  %s2654_s10, 256, %s3747_s7, [#allocation4], %s3578_s17, %s3578_s17, %s3579_s18  }
 0x375   :  { %3569 = dma.done.wait [#allocation4], 256  }
 0x376   :  { %3570 = vsyncadd [#allocation4], 4294967040 }
 0x377   :  { %2663 = vsyncpa [#allocation3], 1 }
 0x378   :  { %2664 = vsyncpa [#allocation6], 1 }
 0x379   :  { %2665 = vsyncpa [#allocation9], 1 }
 0x37a   :  { %2666 = vsyncpa [#allocation4], 1 }

</bundles_post_ra>
